<compile_context>
chip_gen: v6e
topology: v6e:2x2x1
jax: 0.10.0
libtpu: 0.0.40
codegen_flags: <defaults>
</compile_context>

<pallas_src>
import functools

import jax
import jax.numpy as jnp
from jax import lax
from jax.experimental import pallas as pl
from jax.experimental.pallas import tpu as pltpu

EPS = 1e-5                       # torch.nn.LayerNorm default eps
SQRT_HALF = 0.7071067811865476   # 1/sqrt(2)
# EUP approximate reciprocal for the softmax denominator (nearly free slot);
# set to False for strict numerical parity testing against a torch reference.
SOFTMAX_APPROX_RECIP = True


# ----------------------------------------------------------------------------
# Small helpers
# ----------------------------------------------------------------------------
def _itemsize(dt):
    return jnp.dtype(dt).itemsize


def _vmem_limit(est_bytes):
    """Scoped-VMEM cap: per-step working set + headroom, clamped to sane bounds."""
    return int(min(max(int(1.5 * est_bytes) + (4 << 20), 32 << 20), 100 << 20))


def _single_buffered(shape, index_map):
    """BlockSpec for constant-index operands: 1-deep buffering halves their VMEM."""
    try:
        return pl.BlockSpec(shape, index_map, pipeline_mode=pl.Buffered(1))
    except (TypeError, AttributeError, ValueError):
        # Older jax without pipeline_mode/Buffered: fall back to default buffering.
        return pl.BlockSpec(shape, index_map)


def _cast(x, dt):
    return x if dt is None else x.astype(dt)


# ----------------------------------------------------------------------------
# In-kernel math (LN / softmax / GELU in f32; MXU operands optionally bf16)
# ----------------------------------------------------------------------------
def _layernorm_f32(x, g, b):
    mu = jnp.mean(x, axis=-1, keepdims=True)
    var = jnp.mean(jnp.square(x - mu), axis=-1, keepdims=True)
    return (x - mu) * lax.rsqrt(var + EPS) * g + b


def _erf_f32(x):
    # Abramowitz & Stegun 7.1.26, |err| < 1.5e-7 (~f32 precision) -> matches
    # torch.nn.GELU() (exact, erf-based) at f32.
    z = jnp.abs(x)
    t = 1.0 / (1.0 + 0.3275911 * z)
    poly = ((((1.061405429 * t - 1.453152027) * t + 1.421413741) * t
             - 0.284496736) * t + 0.254829592) * t
    e = 1.0 - poly * jnp.exp(-z * z)
    return jnp.where(x < 0, -e, e)


def _gelu_f32(x):
    return 0.5 * x * (1.0 + _erf_f32(x * SQRT_HALF))


def _softmax_lastdim(s):
    s = s - jnp.max(s, axis=-1, keepdims=True)
    p = jnp.exp(s)
    denom = jnp.sum(p, axis=-1, keepdims=True)
    if SOFTMAX_APPROX_RECIP:
        return p * pl.reciprocal(denom, approx=True)
    return p / denom


# ----------------------------------------------------------------------------
# Kernels
# ----------------------------------------------------------------------------
def attn_block_kernel(x_ref, kv_ref, g_ref, b_ref, wq_ref, wk_ref, wv_ref,
                      rpb_ref, wo_ref, bo_ref, o_ref, k_sc, v_sc, *,
                      num_heads, cdt):
    """LN -> Q/K/V proj -> head-batched attention -> out proj -> +residual."""
    H = num_heads
    tq, D = x_ref.shape[1], x_ref.shape[2]
    M = kv_ref.shape[1]
    d = D // H

    g = g_ref[...].astype(jnp.float32)          # (1, D)
    b = b_ref[...].astype(jnp.float32)

    # K/V from the layer-normed kv-source sequence; computed once per batch
    # index (the query-tile axis is "arbitrary", so qi == 0 always runs first)
    # and cached in VMEM scratch for every query tile of that batch element.
    @pl.when(pl.program_id(1) == 0)
    def _():
        kvn = _layernorm_f32(kv_ref[0].astype(jnp.float32), g, b)       # (M, D)
        kvc = _cast(kvn, cdt)
        k_sc[...] = jnp.dot(kvc, wk_ref[...],
                            preferred_element_type=jnp.float32).astype(k_sc.dtype)
        v_sc[...] = jnp.dot(kvc, wv_ref[...],
                            preferred_element_type=jnp.float32).astype(v_sc.dtype)

    x = x_ref[0].astype(jnp.float32)                                    # (tq, D)
    xn = _layernorm_f32(x, g, b)
    q = jnp.dot(_cast(xn, cdt), wq_ref[...],                            # scale pre-folded
                preferred_element_type=jnp.float32)                     # (tq, D)

    # Head-batched layout: one reshape/permute per operand instead of H slices.
    q3 = jnp.swapaxes(_cast(q, cdt).reshape(tq, H, d), 0, 1)            # (H, tq, d)
    k3 = jnp.swapaxes(k_sc[...].reshape(M, H, d), 0, 1)                 # (H, M, d)
    v3 = jnp.swapaxes(v_sc[...].reshape(M, H, d), 0, 1)                 # (H, M, d)

    s = jnp.einsum('hqd,hkd->hqk', q3, k3,
                   preferred_element_type=jnp.float32)                  # (H, tq, M)
    s = s + rpb_ref[...].astype(jnp.float32)
    p = _softmax_lastdim(s)
    oh = jnp.einsum('hqk,hkd->hqd', _cast(p, cdt), v3,
                    preferred_element_type=jnp.float32)                 # (H, tq, d)

    o2 = jnp.swapaxes(oh, 0, 1).reshape(tq, D)      # torch's 'b h n d -> b n (h d)'
    out = jnp.dot(_cast(o2, cdt), wo_ref[...],      # single K=D output projection
                  preferred_element_type=jnp.float32)
    o_ref[0] = (x + out + bo_ref[...].astype(jnp.float32)).astype(o_ref.dtype)


def ffn_block_kernel(x_ref, g_ref, b_ref, w1_ref, b1_ref, w2_ref, b2_ref,
                     gf_ref, bf_ref, o_ref, acc_ref, xn_ref, *, cdt,
                     fuse_final_ln):
    """LN -> W1(chunk) -> GELU -> W2(chunk) accumulate -> (+residual, opt final LN)."""
    k = pl.program_id(1)

    @pl.when(k == 0)
    def _():
        x = x_ref[...].astype(jnp.float32)
        xn = _layernorm_f32(x, g_ref[...].astype(jnp.float32),
                            b_ref[...].astype(jnp.float32))
        xn_ref[...] = xn.astype(xn_ref.dtype)                   # cached LN(x)
        acc_ref[...] = x + b2_ref[...].astype(jnp.float32)      # residual + W2 bias

    h = jnp.dot(xn_ref[...], w1_ref[...], preferred_element_type=jnp.float32)
    h = h + b1_ref[...].astype(jnp.float32)
    h = _gelu_f32(h)                                            # exact (erf) GELU
    acc_ref[...] += jnp.dot(_cast(h, cdt), w2_ref[...],
                            preferred_element_type=jnp.float32)

    @pl.when(k == pl.num_programs(1) - 1)
    def _():
        y = acc_ref[...]
        if fuse_final_ln:                                       # last layer: norm_out
            y = _layernorm_f32(y, gf_ref[...].astype(jnp.float32),
                               bf_ref[...].astype(jnp.float32))
        o_ref[...] = y.astype(o_ref.dtype)


def layernorm_kernel(x_ref, g_ref, b_ref, o_ref):
    x = x_ref[...].astype(jnp.float32)
    o_ref[...] = _layernorm_f32(x, g_ref[...].astype(jnp.float32),
                                b_ref[...].astype(jnp.float32)).astype(o_ref.dtype)


# ----------------------------------------------------------------------------
# Kernel wrappers
# ----------------------------------------------------------------------------
def attention_block(x, kv, rpb, p, *, num_heads, q_block=256, matmul_dtype=None):
    """Self-attention (kv is x) or cross-attention (kv is context) block.

    The reference applies the same input_norm to x and context, so a single
    kernel serves both; rel-pos bias must be (H, N_q, N_kv) as in the reference.
    """
    B, N, D = x.shape
    M = kv.shape[1]
    H = num_heads
    assert D % H == 0, "dim must be evenly divisible by num_heads"
    assert rpb.shape == (H, N, M), "relative_position_bias must be (H, N_q, N_kv)"

    tq = q_block if (q_block <= N and N % q_block == 0) else N
    nq = N // tq
    cdt = matmul_dtype
    sdt = jnp.float32 if cdt is None else cdt

    kern = functools.partial(attn_block_kernel, num_heads=H, cdt=cdt)

    rpb_spec = (_single_buffered((H, tq, M), lambda bi, qi: (0, qi, 0)) if nq == 1
                else pl.BlockSpec((H, tq, M), lambda bi, qi: (0, qi, 0)))

    in_specs = [
        pl.BlockSpec((1, tq, D), lambda bi, qi: (bi, qi, 0)),     # x query tile (+residual)
        pl.BlockSpec((1, M, D), lambda bi, qi: (bi, 0, 0)),       # K/V source (full seq)
        _single_buffered((1, D), lambda bi, qi: (0, 0)),          # ln gamma
        _single_buffered((1, D), lambda bi, qi: (0, 0)),          # ln beta
        _single_buffered((D, D), lambda bi, qi: (0, 0)),          # w_q (scale folded)
        _single_buffered((D, D), lambda bi, qi: (0, 0)),          # w_k
        _single_buffered((D, D), lambda bi, qi: (0, 0)),          # w_v
        rpb_spec,                                                 # rel-pos bias tile
        _single_buffered((D, D), lambda bi, qi: (0, 0)),          # w_out
        _single_buffered((1, D), lambda bi, qi: (0, 0)),          # b_out
    ]

    xb, kb, wb = _itemsize(x.dtype), _itemsize(kv.dtype), _itemsize(p["w_q"].dtype)
    est = (4 * tq * D * xb                                   # x in + out (double)
           + 2 * M * D * kb                                  # kv source (double)
           + 4 * D * D * wb                                  # w_q/w_k/w_v/w_out (single)
           + (1 if nq == 1 else 2) * H * tq * M * _itemsize(rpb.dtype)
           + 2 * M * D * _itemsize(sdt)                      # K/V scratch
           + 2 * H * tq * M * 4                              # f32 scores + probs
           + 8 * tq * D * 4)                                 # misc f32 temporaries

    return pl.pallas_call(
        kern,
        out_shape=jax.ShapeDtypeStruct((B, N, D), x.dtype),
        grid=(B, nq),
        in_specs=in_specs,
        out_specs=pl.BlockSpec((1, tq, D), lambda bi, qi: (bi, qi, 0)),
        scratch_shapes=[pltpu.VMEM((M, D), sdt),             # K cache (per batch idx)
                        pltpu.VMEM((M, D), sdt)],            # V cache
        compiler_params=pltpu.CompilerParams(
            dimension_semantics=("parallel", "arbitrary"),
            vmem_limit_bytes=_vmem_limit(est)),
    )(x, kv, p["ln_g"], p["ln_b"], p["w_q"], p["w_k"], p["w_v"], rpb,
      p["w_out"], p["b_out"])


def ffn_block(x, p, final_ln_g, final_ln_b, *, fuse_final_ln, row_block=256,
              hidden_block=512, matmul_dtype=None):
    B, N, D = x.shape
    R = B * N
    Dh = p["w1"].shape[1]
    rb = row_block if (row_block <= R and R % row_block == 0) else R
    tk = hidden_block if (hidden_block <= Dh and Dh % hidden_block == 0) else Dh
    kt = Dh // tk
    cdt = matmul_dtype
    sdt = jnp.float32 if cdt is None else cdt

    kern = functools.partial(ffn_block_kernel, cdt=cdt, fuse_final_ln=fuse_final_ln)

    def _wspec(shape, index_map):
        # Single-buffer when the index is constant (kt == 1), else keep default
        # double-buffering so the next K-chunk's weight DMA overlaps compute.
        return (_single_buffered(shape, index_map) if kt == 1
                else pl.BlockSpec(shape, index_map))

    in_specs = [
        pl.BlockSpec((rb, D), lambda i, k: (i, 0)),               # x (LN in + residual)
        _single_buffered((1, D), lambda i, k: (0, 0)),            # ln gamma
        _single_buffered((1, D), lambda i, k: (0, 0)),            # ln beta
        _wspec((D, tk), lambda i, k: (0, k)),                     # w1 K-tile
        _wspec((1, tk), lambda i, k: (0, k)),                     # b1 K-tile
        _wspec((tk, D), lambda i, k: (k, 0)),                     # w2 K-tile
        _single_buffered((1, D), lambda i, k: (0, 0)),            # b2
        _single_buffered((1, D), lambda i, k: (0, 0)),            # final LN gamma
        _single_buffered((1, D), lambda i, k: (0, 0)),            # final LN beta
    ]

    xb, wb = _itemsize(x.dtype), _itemsize(p["w1"].dtype)
    wbuf = 1 if kt == 1 else 2
    est = (4 * rb * D * xb
           + wbuf * 2 * D * tk * wb
           + rb * D * (4 + _itemsize(sdt))                   # acc + cached LN(x)
           + 2 * rb * tk * 4                                 # f32 hidden chunk
           + 6 * rb * D * 4)

    y = pl.pallas_call(
        kern,
        out_shape=jax.ShapeDtypeStruct((R, D), x.dtype),
        grid=(R // rb, kt),
        in_specs=in_specs,
        out_specs=pl.BlockSpec((rb, D), lambda i, k: (i, 0)),
        scratch_shapes=[pltpu.VMEM((rb, D), jnp.float32),     # f32 accumulator
                        pltpu.VMEM((rb, D), sdt)],            # cached LN(x)
        compiler_params=pltpu.CompilerParams(
            dimension_semantics=("parallel", "arbitrary"),
            vmem_limit_bytes=_vmem_limit(est)),
    )(x.reshape(R, D), p["ln_g"], p["ln_b"], p["w1"], p["b1"], p["w2"], p["b2"],
      final_ln_g, final_ln_b)
    return y.reshape(B, N, D)


def final_layernorm(x, gamma, beta, *, row_block=256):
    # Only used when depth == 0 (otherwise fused into the last FFN block).
    B, N, D = x.shape
    R = B * N
    rb = row_block if (row_block <= R and R % row_block == 0) else R
    est = 4 * rb * D * _itemsize(x.dtype) + 4 * rb * D * 4
    y = pl.pallas_call(
        layernorm_kernel,
        out_shape=jax.ShapeDtypeStruct((R, D), x.dtype),
        grid=(R // rb,),
        in_specs=[pl.BlockSpec((rb, D), lambda i: (i, 0)),
                  _single_buffered((1, D), lambda i: (0, 0)),
                  _single_buffered((1, D), lambda i: (0, 0))],
        out_specs=pl.BlockSpec((rb, D), lambda i: (i, 0)),
        compiler_params=pltpu.CompilerParams(
            dimension_semantics=("parallel",),
            vmem_limit_bytes=_vmem_limit(est)),
    )(x.reshape(R, D), gamma.reshape(1, D), beta.reshape(1, D))
    return y.reshape(B, N, D)


# ----------------------------------------------------------------------------
# Full module forward
# ----------------------------------------------------------------------------
def base_transformer_cross_attn(x, context, rpb, params, *, num_heads,
                                q_block=256, row_block=256, hidden_block=512):
    """params must come from prepare_params (weights optionally bf16, w_q pre-scaled)."""
    layers = params["layers"]
    if layers:
        w_dt = layers[0]["self_attn"]["w_q"].dtype
        cdt = None if w_dt == jnp.float32 else w_dt
    else:
        cdt = None
    # Store the (large) rel-pos bias in the matmul dtype: halves its DMA per block.
    rpb_c = rpb if cdt is None else rpb.astype(cdt)

    n_layers = len(layers)
    for li, layer in enumerate(layers):
        x = attention_block(x, x, rpb_c, layer["self_attn"], num_heads=num_heads,
                            q_block=q_block, matmul_dtype=cdt)
        x = attention_block(x, context, rpb_c, layer["cross_attn"],
                            num_heads=num_heads, q_block=q_block, matmul_dtype=cdt)
        x = ffn_block(x, layer["ffn"], params["norm_g"], params["norm_b"],
                      fuse_final_ln=(li == n_layers - 1), row_block=row_block,
                      hidden_block=hidden_block, matmul_dtype=cdt)
    if n_layers == 0:
        x = final_layernorm(x, params["norm_g"], params["norm_b"],
                            row_block=row_block)
    return x


# ----------------------------------------------------------------------------
# Parameter preparation (split qkv, fold scale into w_q, cast weights to bf16)
# ----------------------------------------------------------------------------
def prepare_params(raw, *, num_heads, matmul_dtype=jnp.bfloat16):
    def wcast(w):
        return w if matmul_dtype is None else w.astype(matmul_dtype)

    out_layers = []
    for lyr in raw["layers"]:
        sa, ca, ff = lyr["self_attn"], lyr["cross_attn"], lyr["ffn"]
        D = sa["w_qkv"].shape[0]
        Dh = ff["w1"].shape[1]
        scale = (D // num_heads) ** (-0.5)
        wq, wk, wv = jnp.split(sa["w_qkv"], 3, axis=1)
        out_layers.append({
            "self_attn": {
                "ln_g": sa["ln_g"].reshape(1, D), "ln_b": sa["ln_b"].reshape(1, D),
                "w_q": wcast(wq * scale), "w_k": wcast(wk), "w_v": wcast(wv),
                "w_out": wcast(sa["w_out"]), "b_out": sa["b_out"].reshape(1, D)},
            "cross_attn": {
                "ln_g": ca["ln_g"].reshape(1, D), "ln_b": ca["ln_b"].reshape(1, D),
                "w_q": wcast(ca["w_q"] * scale), "w_k": wcast(ca["w_k"]),
                "w_v": wcast(ca["w_v"]),
                "w_out": wcast(ca["w_out"]), "b_out": ca["b_out"].reshape(1, D)},
            "ffn": {
                "ln_g": ff["ln_g"].reshape(1, D), "ln_b": ff["ln_b"].reshape(1, D),
                "w1": wcast(ff["w1"]), "b1": ff["b1"].reshape(1, Dh),
                "w2": wcast(ff["w2"]), "b2": ff["b2"].reshape(1, D)},
        })
    return {"layers": out_layers,
            "norm_g": raw["norm_g"].reshape(1, -1),
            "norm_b": raw["norm_b"].reshape(1, -1)}


# ----------------------------------------------------------------------------
# Deterministic parameter init (mirrors the __init__ shapes; synthetic weights)
# ----------------------------------------------------------------------------
def _lin_init(key, din, dout, bias=True, dtype=jnp.float32):
    k1, k2 = jax.random.split(key)
    bound = 1.0 / (din ** 0.5)
    w = jax.random.uniform(k1, (din, dout), dtype, -bound, bound)
    b = jax.random.uniform(k2, (dout,), dtype, -bound, bound) if bias else None
    return w, b


def init_params(key, dim, depth, num_heads, ff_mult, dtype=jnp.float32):
    layers = []
    for _ in range(depth):
        keys = jax.random.split(key, 8)
        key = keys[0]
        w_qkv, _ = _lin_init(keys[1], dim, 3 * dim, bias=False, dtype=dtype)
        w_so, b_so = _lin_init(keys[2], dim, dim, dtype=dtype)
        w_q, _ = _lin_init(keys[3], dim, dim, bias=False, dtype=dtype)
        w_k, _ = _lin_init(keys[4], dim, dim, bias=False, dtype=dtype)
        w_v, _ = _lin_init(keys[5], dim, dim, bias=False, dtype=dtype)
        w_co, b_co = _lin_init(keys[6], dim, dim, dtype=dtype)
        kf1, kf2 = jax.random.split(keys[7])
        w1, b1 = _lin_init(kf1, dim, dim * ff_mult, dtype=dtype)
        w2, b2 = _lin_init(kf2, dim * ff_mult, dim, dtype=dtype)
        layers.append({
            "self_attn": {"ln_g": jnp.ones((dim,), dtype),
                          "ln_b": jnp.zeros((dim,), dtype),
                          "w_qkv": w_qkv, "w_out": w_so, "b_out": b_so},
            "cross_attn": {"ln_g": jnp.ones((dim,), dtype),
                           "ln_b": jnp.zeros((dim,), dtype),
                           "w_q": w_q, "w_k": w_k, "w_v": w_v,
                           "w_out": w_co, "b_out": b_co},
            "ffn": {"ln_g": jnp.ones((dim,), dtype),
                    "ln_b": jnp.zeros((dim,), dtype),
                    "w1": w1, "b1": b1, "w2": w2, "b2": b2},
        })
    return {"layers": layers,
            "norm_g": jnp.ones((dim,), dtype),
            "norm_b": jnp.zeros((dim,), dtype)}


# ----------------------------------------------------------------------------
if __name__ == "__main__":
    B, N, D, H, DEPTH, FF_MULT = 2, 8, 32, 4, 2, 4

    root = jax.random.PRNGKey(0)
    kx, kc, kb, kp = jax.random.split(root, 4)
    x = jax.random.normal(kx, (B, N, D), jnp.float32)
    context = jax.random.normal(kc, (B, N, D), jnp.float32)
    rel_pos_bias = 0.1 * jax.random.normal(kb, (H, N, N), jnp.float32)

    raw_params = init_params(kp, D, DEPTH, H, FF_MULT)
    # bf16 MXU operands by default (f32 accumulation); pass matmul_dtype=None
    # to prepare_params for a full-f32 parity configuration.
    params = prepare_params(raw_params, num_heads=H, matmul_dtype=jnp.bfloat16)

    fwd = jax.jit(functools.partial(base_transformer_cross_attn, num_heads=H))
    out = fwd(x, context, rel_pos_bias, params)
    jax.block_until_ready(out)
    assert out.shape == (B, N, D)
    print("KERNEL_OK")
</pallas_src>

<mosaic_0001>
module attributes {stable_mosaic.version = 11 : i64} {
  func.func @attn_block_kernel(%arg0: i32, %arg1: i32, %arg2: memref<1x8x32xf32, #tpu.memory_space<vmem>>, %arg3: memref<1x8x32xf32, #tpu.memory_space<vmem>>, %arg4: memref<1x32xf32, #tpu.memory_space<vmem>>, %arg5: memref<1x32xf32, #tpu.memory_space<vmem>>, %arg6: memref<32x32xbf16, #tpu.memory_space<vmem>>, %arg7: memref<32x32xbf16, #tpu.memory_space<vmem>>, %arg8: memref<32x32xbf16, #tpu.memory_space<vmem>>, %arg9: memref<4x8x8xbf16, #tpu.memory_space<vmem>>, %arg10: memref<32x32xbf16, #tpu.memory_space<vmem>>, %arg11: memref<1x32xf32, #tpu.memory_space<vmem>>, %arg12: memref<1x8x32xf32, #tpu.memory_space<vmem>>, %arg13: memref<8x32xbf16, #tpu.memory_space<vmem>>, %arg14: memref<8x32xbf16, #tpu.memory_space<vmem>>) attributes {dimension_semantics = [#tpu.dimension_semantics<parallel>, #tpu.dimension_semantics<arbitrary>], iteration_bounds = array<i64: 2, 1>, scalar_prefetch = 0 : i64, scratch_operands = 2 : i64, tpu.core_type = #tpu.core_type<tc>, window_params = [{transform_indices = @transform_0, window_bounds = array<i64: 1, 8, 32>}, {transform_indices = @transform_1, window_bounds = array<i64: 1, 8, 32>}, {pipeline_mode = #tpu.pipeline_mode<synchronous>, transform_indices = @transform_2, window_bounds = array<i64: 1, 32>}, {pipeline_mode = #tpu.pipeline_mode<synchronous>, transform_indices = @transform_3, window_bounds = array<i64: 1, 32>}, {pipeline_mode = #tpu.pipeline_mode<synchronous>, transform_indices = @transform_4, window_bounds = array<i64: 32, 32>}, {pipeline_mode = #tpu.pipeline_mode<synchronous>, transform_indices = @transform_5, window_bounds = array<i64: 32, 32>}, {pipeline_mode = #tpu.pipeline_mode<synchronous>, transform_indices = @transform_6, window_bounds = array<i64: 32, 32>}, {pipeline_mode = #tpu.pipeline_mode<synchronous>, transform_indices = @transform_7, window_bounds = array<i64: 4, 8, 8>}, {pipeline_mode = #tpu.pipeline_mode<synchronous>, transform_indices = @transform_8, window_bounds = array<i64: 32, 32>}, {pipeline_mode = #tpu.pipeline_mode<synchronous>, transform_indices = @transform_9, window_bounds = array<i64: 1, 32>}, {transform_indices = @transform_10, window_bounds = array<i64: 1, 8, 32>}]} {
    %c0 = arith.constant 0 : index
    %c0_0 = arith.constant 0 : index
    %0 = vector.load %arg4[%c0, %c0_0] : memref<1x32xf32, #tpu.memory_space<vmem>>, vector<1x32xf32>
    %c0_1 = arith.constant 0 : index
    %c0_2 = arith.constant 0 : index
    %1 = vector.load %arg5[%c0_1, %c0_2] : memref<1x32xf32, #tpu.memory_space<vmem>>, vector<1x32xf32>
    %c0_i32 = arith.constant 0 : i32
    %2 = arith.cmpi eq, %arg1, %c0_i32 : i32
    %3 = arith.extui %2 : i1 to i32
    %c0_i32_3 = arith.constant 0 : i32
    %4 = arith.cmpi ne, %3, %c0_i32_3 : i32
    scf.if %4 {
      %c0_33 = arith.constant 0 : index
      %c0_34 = arith.constant 0 : index
      %c0_35 = arith.constant 0 : index
      %69 = vector.load %arg3[%c0_33, %c0_34, %c0_35] : memref<1x8x32xf32, #tpu.memory_space<vmem>>, vector<1x8x32xf32>
      %70 = vector.shape_cast %69 : vector<1x8x32xf32> to vector<8x32xf32>
      %cst_36 = arith.constant dense<0.000000e+00> : vector<8xf32>
      %71 = vector.multi_reduction <add>, %70, %cst_36 [1] : vector<8x32xf32> to vector<8xf32>
      %72 = vector.shape_cast %71 : vector<8xf32> to vector<8x1xf32>
      %cst_37 = arith.constant 3.200000e+01 : f32
      %73 = vector.broadcast %cst_37 : f32 to vector<8x1xf32>
      %74 = arith.divf %72, %73 : vector<8x1xf32>
      %75 = vector.broadcast %74 : vector<8x1xf32> to vector<8x32xf32>
      %76 = arith.subf %70, %75 : vector<8x32xf32>
      %77 = arith.mulf %76, %76 : vector<8x32xf32>
      %cst_38 = arith.constant dense<0.000000e+00> : vector<8xf32>
      %78 = vector.multi_reduction <add>, %77, %cst_38 [1] : vector<8x32xf32> to vector<8xf32>
      %79 = vector.shape_cast %78 : vector<8xf32> to vector<8x1xf32>
      %cst_39 = arith.constant 3.200000e+01 : f32
      %80 = vector.broadcast %cst_39 : f32 to vector<8x1xf32>
      %81 = arith.divf %79, %80 : vector<8x1xf32>
      %82 = vector.broadcast %74 : vector<8x1xf32> to vector<8x32xf32>
      %83 = arith.subf %70, %82 : vector<8x32xf32>
      %cst_40 = arith.constant 9.99999974E-6 : f32
      %84 = vector.broadcast %cst_40 : f32 to vector<8x1xf32>
      %85 = arith.addf %81, %84 : vector<8x1xf32>
      %86 = math.rsqrt %85 : vector<8x1xf32>
      %87 = vector.broadcast %86 : vector<8x1xf32> to vector<8x32xf32>
      %88 = arith.mulf %83, %87 : vector<8x32xf32>
      %89 = vector.broadcast %0 : vector<1x32xf32> to vector<8x32xf32>
      %90 = arith.mulf %88, %89 : vector<8x32xf32>
      %91 = vector.broadcast %1 : vector<1x32xf32> to vector<8x32xf32>
      %92 = arith.addf %90, %91 : vector<8x32xf32>
      %93 = arith.truncf %92 : vector<8x32xf32> to vector<8x32xbf16>
      %c0_41 = arith.constant 0 : index
      %c0_42 = arith.constant 0 : index
      %94 = vector.load %arg7[%c0_41, %c0_42] : memref<32x32xbf16, #tpu.memory_space<vmem>>, vector<32x32xbf16>
      %cst_43 = arith.constant dense<0.000000e+00> : vector<8x32xf32>
      %95 = tpu.matmul %93, %94, %cst_43 {dimension_numbers = #tpu.dot_dimension_numbers<[1], [0], [0], [1], [0, 0, 1, 1], [], []>} : vector<8x32xbf16>, vector<32x32xbf16>, vector<8x32xf32> -> vector<8x32xf32>
      %96 = arith.truncf %95 : vector<8x32xf32> to vector<8x32xbf16>
      %c0_44 = arith.constant 0 : index
      %c0_45 = arith.constant 0 : index
      %97 = vector.load %arg13[%c0_44, %c0_45] : memref<8x32xbf16, #tpu.memory_space<vmem>>, vector<8x32xbf16>
      tpu.vector_store %arg13[%c0_44, %c0_45], %96 {strides = array<i32>} : memref<8x32xbf16, #tpu.memory_space<vmem>>, vector<8x32xbf16>,
      %c0_46 = arith.constant 0 : index
      %c0_47 = arith.constant 0 : index
      %98 = vector.load %arg8[%c0_46, %c0_47] : memref<32x32xbf16, #tpu.memory_space<vmem>>, vector<32x32xbf16>
      %cst_48 = arith.constant dense<0.000000e+00> : vector<8x32xf32>
      %99 = tpu.matmul %93, %98, %cst_48 {dimension_numbers = #tpu.dot_dimension_numbers<[1], [0], [0], [1], [0, 0, 1, 1], [], []>} : vector<8x32xbf16>, vector<32x32xbf16>, vector<8x32xf32> -> vector<8x32xf32>
      %100 = arith.truncf %99 : vector<8x32xf32> to vector<8x32xbf16>
      %c0_49 = arith.constant 0 : index
      %c0_50 = arith.constant 0 : index
      %101 = vector.load %arg14[%c0_49, %c0_50] : memref<8x32xbf16, #tpu.memory_space<vmem>>, vector<8x32xbf16>
      tpu.vector_store %arg14[%c0_49, %c0_50], %100 {strides = array<i32>} : memref<8x32xbf16, #tpu.memory_space<vmem>>, vector<8x32xbf16>,
    } else {
    }
    %c0_4 = arith.constant 0 : index
    %c0_5 = arith.constant 0 : index
    %c0_6 = arith.constant 0 : index
    %5 = vector.load %arg2[%c0_4, %c0_5, %c0_6] : memref<1x8x32xf32, #tpu.memory_space<vmem>>, vector<1x8x32xf32>
    %6 = vector.shape_cast %5 : vector<1x8x32xf32> to vector<8x32xf32>
    %cst = arith.constant dense<0.000000e+00> : vector<8xf32>
    %7 = vector.multi_reduction <add>, %6, %cst [1] : vector<8x32xf32> to vector<8xf32>
    %8 = vector.shape_cast %7 : vector<8xf32> to vector<8x1xf32>
    %cst_7 = arith.constant 3.200000e+01 : f32
    %9 = vector.broadcast %cst_7 : f32 to vector<8x1xf32>
    %10 = arith.divf %8, %9 : vector<8x1xf32>
    %11 = vector.broadcast %10 : vector<8x1xf32> to vector<8x32xf32>
    %12 = arith.subf %6, %11 : vector<8x32xf32>
    %13 = arith.mulf %12, %12 : vector<8x32xf32>
    %cst_8 = arith.constant dense<0.000000e+00> : vector<8xf32>
    %14 = vector.multi_reduction <add>, %13, %cst_8 [1] : vector<8x32xf32> to vector<8xf32>
    %15 = vector.shape_cast %14 : vector<8xf32> to vector<8x1xf32>
    %cst_9 = arith.constant 3.200000e+01 : f32
    %16 = vector.broadcast %cst_9 : f32 to vector<8x1xf32>
    %17 = arith.divf %15, %16 : vector<8x1xf32>
    %18 = vector.broadcast %10 : vector<8x1xf32> to vector<8x32xf32>
    %19 = arith.subf %6, %18 : vector<8x32xf32>
    %cst_10 = arith.constant 9.99999974E-6 : f32
    %20 = vector.broadcast %cst_10 : f32 to vector<8x1xf32>
    %21 = arith.addf %17, %20 : vector<8x1xf32>
    %22 = math.rsqrt %21 : vector<8x1xf32>
    %23 = vector.broadcast %22 : vector<8x1xf32> to vector<8x32xf32>
    %24 = arith.mulf %19, %23 : vector<8x32xf32>
    %25 = vector.broadcast %0 : vector<1x32xf32> to vector<8x32xf32>
    %26 = arith.mulf %24, %25 : vector<8x32xf32>
    %27 = vector.broadcast %1 : vector<1x32xf32> to vector<8x32xf32>
    %28 = arith.addf %26, %27 : vector<8x32xf32>
    %29 = arith.truncf %28 : vector<8x32xf32> to vector<8x32xbf16>
    %c0_11 = arith.constant 0 : index
    %c0_12 = arith.constant 0 : index
    %30 = vector.load %arg6[%c0_11, %c0_12] : memref<32x32xbf16, #tpu.memory_space<vmem>>, vector<32x32xbf16>
    %cst_13 = arith.constant dense<0.000000e+00> : vector<8x32xf32>
    %31 = tpu.matmul %29, %30, %cst_13 {dimension_numbers = #tpu.dot_dimension_numbers<[1], [0], [0], [1], [0, 0, 1, 1], [], []>} : vector<8x32xbf16>, vector<32x32xbf16>, vector<8x32xf32> -> vector<8x32xf32>
    %32 = arith.truncf %31 : vector<8x32xf32> to vector<8x32xbf16>
    %33 = vector.shape_cast %32 : vector<8x32xbf16> to vector<8x4x8xbf16>
    %34 = tpu.transpose %33, [1, 0, 2] : vector<8x4x8xbf16> -> vector<4x8x8xbf16>
    %c0_14 = arith.constant 0 : index
    %c0_15 = arith.constant 0 : index
    %35 = vector.load %arg13[%c0_14, %c0_15] : memref<8x32xbf16, #tpu.memory_space<vmem>>, vector<8x32xbf16>
    %36 = vector.shape_cast %35 : vector<8x32xbf16> to vector<8x4x8xbf16>
    %37 = tpu.transpose %36, [1, 0, 2] : vector<8x4x8xbf16> -> vector<4x8x8xbf16>
    %c0_16 = arith.constant 0 : index
    %c0_17 = arith.constant 0 : index
    %38 = vector.load %arg14[%c0_16, %c0_17] : memref<8x32xbf16, #tpu.memory_space<vmem>>, vector<8x32xbf16>
    %39 = vector.shape_cast %38 : vector<8x32xbf16> to vector<8x4x8xbf16>
    %40 = tpu.transpose %39, [1, 0, 2] : vector<8x4x8xbf16> -> vector<4x8x8xbf16>
    "tpu.trace_start"() <{level = 10 : i32, message = "hqd,hkd->hqk"}> : () -> ()
    %cst_18 = arith.constant dense<0.000000e+00> : vector<4x8x8xf32>
    %41 = tpu.matmul %34, %37, %cst_18 {dimension_numbers = #tpu.dot_dimension_numbers<[2], [2], [1], [1], [0, 0, 0, 1, 1, 1], [0], [0]>} : vector<4x8x8xbf16>, vector<4x8x8xbf16>, vector<4x8x8xf32> -> vector<4x8x8xf32>
    "tpu.trace_stop"() : () -> ()
    %c0_19 = arith.constant 0 : index
    %c0_20 = arith.constant 0 : index
    %c0_21 = arith.constant 0 : index
    %42 = vector.load %arg9[%c0_19, %c0_20, %c0_21] : memref<4x8x8xbf16, #tpu.memory_space<vmem>>, vector<4x8x8xbf16>
    %43 = arith.extf %42 : vector<4x8x8xbf16> to vector<4x8x8xf32>
    %44 = arith.addf %41, %43 : vector<4x8x8xf32>
    %cst_22 = arith.constant dense<0xFF800000> : vector<4x8xf32>
    %45 = vector.multi_reduction <maximumf>, %44, %cst_22 [2] : vector<4x8x8xf32> to vector<4x8xf32>
    %46 = vector.shape_cast %45 : vector<4x8xf32> to vector<4x8x1xf32>
    %47 = vector.broadcast %46 : vector<4x8x1xf32> to vector<4x8x8xf32>
    %48 = arith.subf %44, %47 : vector<4x8x8xf32>
    %49 = math.exp %48 : vector<4x8x8xf32>
    %cst_23 = arith.constant dense<0.000000e+00> : vector<4x8xf32>
    %50 = vector.multi_reduction <add>, %49, %cst_23 [2] : vector<4x8x8xf32> to vector<4x8xf32>
    %51 = vector.shape_cast %50 : vector<4x8xf32> to vector<4x8x1xf32>
    %52 = tpu.reciprocal %51 {approx = true} : vector<4x8x1xf32> -> vector<4x8x1xf32>
    %53 = vector.broadcast %52 : vector<4x8x1xf32> to vector<4x8x8xf32>
    %54 = arith.mulf %49, %53 : vector<4x8x8xf32>
    %55 = arith.truncf %54 : vector<4x8x8xf32> to vector<4x8x8xbf16>
    "tpu.trace_start"() <{level = 10 : i32, message = "hqk,hkd->hqd"}> : () -> ()
    %cst_24 = arith.constant dense<0.000000e+00> : vector<4x8x8xf32>
    %56 = tpu.matmul %55, %40, %cst_24 {dimension_numbers = #tpu.dot_dimension_numbers<[2], [1], [1], [2], [0, 0, 0, 1, 1, 2], [0], [0]>} : vector<4x8x8xbf16>, vector<4x8x8xbf16>, vector<4x8x8xf32> -> vector<4x8x8xf32>
    "tpu.trace_stop"() : () -> ()
    %57 = tpu.transpose %56, [1, 0, 2] : vector<4x8x8xf32> -> vector<8x4x8xf32>
    %58 = vector.shape_cast %57 : vector<8x4x8xf32> to vector<8x32xf32>
    %59 = arith.truncf %58 : vector<8x32xf32> to vector<8x32xbf16>
    %c0_25 = arith.constant 0 : index
    %c0_26 = arith.constant 0 : index
    %60 = vector.load %arg10[%c0_25, %c0_26] : memref<32x32xbf16, #tpu.memory_space<vmem>>, vector<32x32xbf16>
    %cst_27 = arith.constant dense<0.000000e+00> : vector<8x32xf32>
    %61 = tpu.matmul %59, %60, %cst_27 {dimension_numbers = #tpu.dot_dimension_numbers<[1], [0], [0], [1], [0, 0, 1, 1], [], []>} : vector<8x32xbf16>, vector<32x32xbf16>, vector<8x32xf32> -> vector<8x32xf32>
    %62 = arith.addf %6, %61 : vector<8x32xf32>
    %c0_28 = arith.constant 0 : index
    %c0_29 = arith.constant 0 : index
    %63 = vector.load %arg11[%c0_28, %c0_29] : memref<1x32xf32, #tpu.memory_space<vmem>>, vector<1x32xf32>
    %64 = vector.broadcast %63 : vector<1x32xf32> to vector<8x32xf32>
    %65 = arith.addf %62, %64 : vector<8x32xf32>
    %c0_30 = arith.constant 0 : index
    %c0_31 = arith.constant 0 : index
    %c0_32 = arith.constant 0 : index
    %66 = vector.load %arg12[%c0_30, %c0_31, %c0_32] : memref<1x8x32xf32, #tpu.memory_space<vmem>>, vector<1x8x32xf32>
    %67 = vector.shape_cast %66 : vector<1x8x32xf32> to vector<8x32xf32>
    %68 = vector.shape_cast %65 : vector<8x32xf32> to vector<1x8x32xf32>
    tpu.vector_store %arg12[%c0_30, %c0_31, %c0_32], %68 {strides = array<i32>} : memref<1x8x32xf32, #tpu.memory_space<vmem>>, vector<1x8x32xf32>,
    return
  }
  func.func @transform_0(%arg0: i32, %arg1: i32) -> (i32, i32, i32) {
    %c0_i32 = arith.constant 0 : i32
    %c0_i32_0 = arith.constant 0 : i32
    return %arg0, %arg1, %c0_i32 : i32, i32, i32
  }
  func.func @transform_1(%arg0: i32, %arg1: i32) -> (i32, i32, i32) {
    %c0_i32 = arith.constant 0 : i32
    %c0_i32_0 = arith.constant 0 : i32
    %c0_i32_1 = arith.constant 0 : i32
    return %arg0, %c0_i32, %c0_i32_0 : i32, i32, i32
  }
  func.func @transform_2(%arg0: i32, %arg1: i32) -> (i32, i32) {
    %c0_i32 = arith.constant 0 : i32
    %c0_i32_0 = arith.constant 0 : i32
    %c0_i32_1 = arith.constant 0 : i32
    return %c0_i32, %c0_i32_0 : i32, i32
  }
  func.func @transform_3(%arg0: i32, %arg1: i32) -> (i32, i32) {
    %c0_i32 = arith.constant 0 : i32
    %c0_i32_0 = arith.constant 0 : i32
    %c0_i32_1 = arith.constant 0 : i32
    return %c0_i32, %c0_i32_0 : i32, i32
  }
  func.func @transform_4(%arg0: i32, %arg1: i32) -> (i32, i32) {
    %c0_i32 = arith.constant 0 : i32
    %c0_i32_0 = arith.constant 0 : i32
    %c0_i32_1 = arith.constant 0 : i32
    return %c0_i32, %c0_i32_0 : i32, i32
  }
  func.func @transform_5(%arg0: i32, %arg1: i32) -> (i32, i32) {
    %c0_i32 = arith.constant 0 : i32
    %c0_i32_0 = arith.constant 0 : i32
    %c0_i32_1 = arith.constant 0 : i32
    return %c0_i32, %c0_i32_0 : i32, i32
  }
  func.func @transform_6(%arg0: i32, %arg1: i32) -> (i32, i32) {
    %c0_i32 = arith.constant 0 : i32
    %c0_i32_0 = arith.constant 0 : i32
    %c0_i32_1 = arith.constant 0 : i32
    return %c0_i32, %c0_i32_0 : i32, i32
  }
  func.func @transform_7(%arg0: i32, %arg1: i32) -> (i32, i32, i32) {
    %c0_i32 = arith.constant 0 : i32
    %c0_i32_0 = arith.constant 0 : i32
    %c0_i32_1 = arith.constant 0 : i32
    return %c0_i32, %arg1, %c0_i32_0 : i32, i32, i32
  }
  func.func @transform_8(%arg0: i32, %arg1: i32) -> (i32, i32) {
    %c0_i32 = arith.constant 0 : i32
    %c0_i32_0 = arith.constant 0 : i32
    %c0_i32_1 = arith.constant 0 : i32
    return %c0_i32, %c0_i32_0 : i32, i32
  }
  func.func @transform_9(%arg0: i32, %arg1: i32) -> (i32, i32) {
    %c0_i32 = arith.constant 0 : i32
    %c0_i32_0 = arith.constant 0 : i32
    %c0_i32_1 = arith.constant 0 : i32
    return %c0_i32, %c0_i32_0 : i32, i32
  }
  func.func @transform_10(%arg0: i32, %arg1: i32) -> (i32, i32, i32) {
    %c0_i32 = arith.constant 0 : i32
    %c0_i32_0 = arith.constant 0 : i32
    return %arg0, %arg1, %c0_i32 : i32, i32, i32
  }
}

module attributes {stable_mosaic.version = 11 : i64} {
  func.func @attn_block_kernel(%arg0: i32, %arg1: i32, %arg2: memref<1x8x32xf32, #tpu.memory_space<vmem>>, %arg3: memref<1x8x32xf32, #tpu.memory_space<vmem>>, %arg4: memref<1x32xf32, #tpu.memory_space<vmem>>, %arg5: memref<1x32xf32, #tpu.memory_space<vmem>>, %arg6: memref<32x32xbf16, #tpu.memory_space<vmem>>, %arg7: memref<32x32xbf16, #tpu.memory_space<vmem>>, %arg8: memref<32x32xbf16, #tpu.memory_space<vmem>>, %arg9: memref<4x8x8xbf16, #tpu.memory_space<vmem>>, %arg10: memref<32x32xbf16, #tpu.memory_space<vmem>>, %arg11: memref<1x32xf32, #tpu.memory_space<vmem>>, %arg12: memref<1x8x32xf32, #tpu.memory_space<vmem>>, %arg13: memref<8x32xbf16, #tpu.memory_space<vmem>>, %arg14: memref<8x32xbf16, #tpu.memory_space<vmem>>) attributes {dimension_semantics = [#tpu.dimension_semantics<parallel>, #tpu.dimension_semantics<arbitrary>], iteration_bounds = array<i64: 2, 1>, scalar_prefetch = 0 : i64, scratch_operands = 2 : i64, tpu.core_type = #tpu.core_type<tc>, window_params = [{transform_indices = @transform_0, window_bounds = array<i64: 1, 8, 32>}, {transform_indices = @transform_1, window_bounds = array<i64: 1, 8, 32>}, {pipeline_mode = #tpu.pipeline_mode<synchronous>, transform_indices = @transform_2, window_bounds = array<i64: 1, 32>}, {pipeline_mode = #tpu.pipeline_mode<synchronous>, transform_indices = @transform_3, window_bounds = array<i64: 1, 32>}, {pipeline_mode = #tpu.pipeline_mode<synchronous>, transform_indices = @transform_4, window_bounds = array<i64: 32, 32>}, {pipeline_mode = #tpu.pipeline_mode<synchronous>, transform_indices = @transform_5, window_bounds = array<i64: 32, 32>}, {pipeline_mode = #tpu.pipeline_mode<synchronous>, transform_indices = @transform_6, window_bounds = array<i64: 32, 32>}, {pipeline_mode = #tpu.pipeline_mode<synchronous>, transform_indices = @transform_7, window_bounds = array<i64: 4, 8, 8>}, {pipeline_mode = #tpu.pipeline_mode<synchronous>, transform_indices = @transform_8, window_bounds = array<i64: 32, 32>}, {pipeline_mode = #tpu.pipeline_mode<synchronous>, transform_indices = @transform_9, window_bounds = array<i64: 1, 32>}, {transform_indices = @transform_10, window_bounds = array<i64: 1, 8, 32>}]} {
    %c0 = arith.constant 0 : index
    %c0_0 = arith.constant 0 : index
    %0 = vector.load %arg4[%c0, %c0_0] : memref<1x32xf32, #tpu.memory_space<vmem>>, vector<1x32xf32>
    %c0_1 = arith.constant 0 : index
    %c0_2 = arith.constant 0 : index
    %1 = vector.load %arg5[%c0_1, %c0_2] : memref<1x32xf32, #tpu.memory_space<vmem>>, vector<1x32xf32>
    %c0_i32 = arith.constant 0 : i32
    %2 = arith.cmpi eq, %arg1, %c0_i32 : i32
    %3 = arith.extui %2 : i1 to i32
    %c0_i32_3 = arith.constant 0 : i32
    %4 = arith.cmpi ne, %3, %c0_i32_3 : i32
    scf.if %4 {
      %c0_33 = arith.constant 0 : index
      %c0_34 = arith.constant 0 : index
      %c0_35 = arith.constant 0 : index
      %69 = vector.load %arg3[%c0_33, %c0_34, %c0_35] : memref<1x8x32xf32, #tpu.memory_space<vmem>>, vector<1x8x32xf32>
      %70 = vector.shape_cast %69 : vector<1x8x32xf32> to vector<8x32xf32>
      %cst_36 = arith.constant dense<0.000000e+00> : vector<8xf32>
      %71 = vector.multi_reduction <add>, %70, %cst_36 [1] : vector<8x32xf32> to vector<8xf32>
      %72 = vector.shape_cast %71 : vector<8xf32> to vector<8x1xf32>
      %cst_37 = arith.constant 3.200000e+01 : f32
      %73 = vector.broadcast %cst_37 : f32 to vector<8x1xf32>
      %74 = arith.divf %72, %73 : vector<8x1xf32>
      %75 = vector.broadcast %74 : vector<8x1xf32> to vector<8x32xf32>
      %76 = arith.subf %70, %75 : vector<8x32xf32>
      %77 = arith.mulf %76, %76 : vector<8x32xf32>
      %cst_38 = arith.constant dense<0.000000e+00> : vector<8xf32>
      %78 = vector.multi_reduction <add>, %77, %cst_38 [1] : vector<8x32xf32> to vector<8xf32>
      %79 = vector.shape_cast %78 : vector<8xf32> to vector<8x1xf32>
      %cst_39 = arith.constant 3.200000e+01 : f32
      %80 = vector.broadcast %cst_39 : f32 to vector<8x1xf32>
      %81 = arith.divf %79, %80 : vector<8x1xf32>
      %82 = vector.broadcast %74 : vector<8x1xf32> to vector<8x32xf32>
      %83 = arith.subf %70, %82 : vector<8x32xf32>
      %cst_40 = arith.constant 9.99999974E-6 : f32
      %84 = vector.broadcast %cst_40 : f32 to vector<8x1xf32>
      %85 = arith.addf %81, %84 : vector<8x1xf32>
      %86 = math.rsqrt %85 : vector<8x1xf32>
      %87 = vector.broadcast %86 : vector<8x1xf32> to vector<8x32xf32>
      %88 = arith.mulf %83, %87 : vector<8x32xf32>
      %89 = vector.broadcast %0 : vector<1x32xf32> to vector<8x32xf32>
      %90 = arith.mulf %88, %89 : vector<8x32xf32>
      %91 = vector.broadcast %1 : vector<1x32xf32> to vector<8x32xf32>
      %92 = arith.addf %90, %91 : vector<8x32xf32>
      %93 = arith.truncf %92 : vector<8x32xf32> to vector<8x32xbf16>
      %c0_41 = arith.constant 0 : index
      %c0_42 = arith.constant 0 : index
      %94 = vector.load %arg7[%c0_41, %c0_42] : memref<32x32xbf16, #tpu.memory_space<vmem>>, vector<32x32xbf16>
      %cst_43 = arith.constant dense<0.000000e+00> : vector<8x32xf32>
      %95 = tpu.matmul %93, %94, %cst_43 {dimension_numbers = #tpu.dot_dimension_numbers<[1], [0], [0], [1], [0, 0, 1, 1], [], []>} : vector<8x32xbf16>, vector<32x32xbf16>, vector<8x32xf32> -> vector<8x32xf32>
      %96 = arith.truncf %95 : vector<8x32xf32> to vector<8x32xbf16>
      %c0_44 = arith.constant 0 : index
      %c0_45 = arith.constant 0 : index
      %97 = vector.load %arg13[%c0_44, %c0_45] : memref<8x32xbf16, #tpu.memory_space<vmem>>, vector<8x32xbf16>
      tpu.vector_store %arg13[%c0_44, %c0_45], %96 {strides = array<i32>} : memref<8x32xbf16, #tpu.memory_space<vmem>>, vector<8x32xbf16>,
      %c0_46 = arith.constant 0 : index
      %c0_47 = arith.constant 0 : index
      %98 = vector.load %arg8[%c0_46, %c0_47] : memref<32x32xbf16, #tpu.memory_space<vmem>>, vector<32x32xbf16>
      %cst_48 = arith.constant dense<0.000000e+00> : vector<8x32xf32>
      %99 = tpu.matmul %93, %98, %cst_48 {dimension_numbers = #tpu.dot_dimension_numbers<[1], [0], [0], [1], [0, 0, 1, 1], [], []>} : vector<8x32xbf16>, vector<32x32xbf16>, vector<8x32xf32> -> vector<8x32xf32>
      %100 = arith.truncf %99 : vector<8x32xf32> to vector<8x32xbf16>
      %c0_49 = arith.constant 0 : index
      %c0_50 = arith.constant 0 : index
      %101 = vector.load %arg14[%c0_49, %c0_50] : memref<8x32xbf16, #tpu.memory_space<vmem>>, vector<8x32xbf16>
      tpu.vector_store %arg14[%c0_49, %c0_50], %100 {strides = array<i32>} : memref<8x32xbf16, #tpu.memory_space<vmem>>, vector<8x32xbf16>,
    } else {
    }
    %c0_4 = arith.constant 0 : index
    %c0_5 = arith.constant 0 : index
    %c0_6 = arith.constant 0 : index
    %5 = vector.load %arg2[%c0_4, %c0_5, %c0_6] : memref<1x8x32xf32, #tpu.memory_space<vmem>>, vector<1x8x32xf32>
    %6 = vector.shape_cast %5 : vector<1x8x32xf32> to vector<8x32xf32>
    %cst = arith.constant dense<0.000000e+00> : vector<8xf32>
    %7 = vector.multi_reduction <add>, %6, %cst [1] : vector<8x32xf32> to vector<8xf32>
    %8 = vector.shape_cast %7 : vector<8xf32> to vector<8x1xf32>
    %cst_7 = arith.constant 3.200000e+01 : f32
    %9 = vector.broadcast %cst_7 : f32 to vector<8x1xf32>
    %10 = arith.divf %8, %9 : vector<8x1xf32>
    %11 = vector.broadcast %10 : vector<8x1xf32> to vector<8x32xf32>
    %12 = arith.subf %6, %11 : vector<8x32xf32>
    %13 = arith.mulf %12, %12 : vector<8x32xf32>
    %cst_8 = arith.constant dense<0.000000e+00> : vector<8xf32>
    %14 = vector.multi_reduction <add>, %13, %cst_8 [1] : vector<8x32xf32> to vector<8xf32>
    %15 = vector.shape_cast %14 : vector<8xf32> to vector<8x1xf32>
    %cst_9 = arith.constant 3.200000e+01 : f32
    %16 = vector.broadcast %cst_9 : f32 to vector<8x1xf32>
    %17 = arith.divf %15, %16 : vector<8x1xf32>
    %18 = vector.broadcast %10 : vector<8x1xf32> to vector<8x32xf32>
    %19 = arith.subf %6, %18 : vector<8x32xf32>
    %cst_10 = arith.constant 9.99999974E-6 : f32
    %20 = vector.broadcast %cst_10 : f32 to vector<8x1xf32>
    %21 = arith.addf %17, %20 : vector<8x1xf32>
    %22 = math.rsqrt %21 : vector<8x1xf32>
    %23 = vector.broadcast %22 : vector<8x1xf32> to vector<8x32xf32>
    %24 = arith.mulf %19, %23 : vector<8x32xf32>
    %25 = vector.broadcast %0 : vector<1x32xf32> to vector<8x32xf32>
    %26 = arith.mulf %24, %25 : vector<8x32xf32>
    %27 = vector.broadcast %1 : vector<1x32xf32> to vector<8x32xf32>
    %28 = arith.addf %26, %27 : vector<8x32xf32>
    %29 = arith.truncf %28 : vector<8x32xf32> to vector<8x32xbf16>
    %c0_11 = arith.constant 0 : index
    %c0_12 = arith.constant 0 : index
    %30 = vector.load %arg6[%c0_11, %c0_12] : memref<32x32xbf16, #tpu.memory_space<vmem>>, vector<32x32xbf16>
    %cst_13 = arith.constant dense<0.000000e+00> : vector<8x32xf32>
    %31 = tpu.matmul %29, %30, %cst_13 {dimension_numbers = #tpu.dot_dimension_numbers<[1], [0], [0], [1], [0, 0, 1, 1], [], []>} : vector<8x32xbf16>, vector<32x32xbf16>, vector<8x32xf32> -> vector<8x32xf32>
    %32 = arith.truncf %31 : vector<8x32xf32> to vector<8x32xbf16>
    %33 = vector.shape_cast %32 : vector<8x32xbf16> to vector<8x4x8xbf16>
    %34 = tpu.transpose %33, [1, 0, 2] : vector<8x4x8xbf16> -> vector<4x8x8xbf16>
    %c0_14 = arith.constant 0 : index
    %c0_15 = arith.constant 0 : index
    %35 = vector.load %arg13[%c0_14, %c0_15] : memref<8x32xbf16, #tpu.memory_space<vmem>>, vector<8x32xbf16>
    %36 = vector.shape_cast %35 : vector<8x32xbf16> to vector<8x4x8xbf16>
    %37 = tpu.transpose %36, [1, 0, 2] : vector<8x4x8xbf16> -> vector<4x8x8xbf16>
    %c0_16 = arith.constant 0 : index
    %c0_17 = arith.constant 0 : index
    %38 = vector.load %arg14[%c0_16, %c0_17] : memref<8x32xbf16, #tpu.memory_space<vmem>>, vector<8x32xbf16>
    %39 = vector.shape_cast %38 : vector<8x32xbf16> to vector<8x4x8xbf16>
    %40 = tpu.transpose %39, [1, 0, 2] : vector<8x4x8xbf16> -> vector<4x8x8xbf16>
    "tpu.trace_start"() <{level = 10 : i32, message = "hqd,hkd->hqk"}> : () -> ()
    %cst_18 = arith.constant dense<0.000000e+00> : vector<4x8x8xf32>
    %41 = tpu.matmul %34, %37, %cst_18 {dimension_numbers = #tpu.dot_dimension_numbers<[2], [2], [1], [1], [0, 0, 0, 1, 1, 1], [0], [0]>} : vector<4x8x8xbf16>, vector<4x8x8xbf16>, vector<4x8x8xf32> -> vector<4x8x8xf32>
    "tpu.trace_stop"() : () -> ()
    %c0_19 = arith.constant 0 : index
    %c0_20 = arith.constant 0 : index
    %c0_21 = arith.constant 0 : index
    %42 = vector.load %arg9[%c0_19, %c0_20, %c0_21] : memref<4x8x8xbf16, #tpu.memory_space<vmem>>, vector<4x8x8xbf16>
    %43 = arith.extf %42 : vector<4x8x8xbf16> to vector<4x8x8xf32>
    %44 = arith.addf %41, %43 : vector<4x8x8xf32>
    %cst_22 = arith.constant dense<0xFF800000> : vector<4x8xf32>
    %45 = vector.multi_reduction <maximumf>, %44, %cst_22 [2] : vector<4x8x8xf32> to vector<4x8xf32>
    %46 = vector.shape_cast %45 : vector<4x8xf32> to vector<4x8x1xf32>
    %47 = vector.broadcast %46 : vector<4x8x1xf32> to vector<4x8x8xf32>
    %48 = arith.subf %44, %47 : vector<4x8x8xf32>
    %49 = math.exp %48 : vector<4x8x8xf32>
    %cst_23 = arith.constant dense<0.000000e+00> : vector<4x8xf32>
    %50 = vector.multi_reduction <add>, %49, %cst_23 [2] : vector<4x8x8xf32> to vector<4x8xf32>
    %51 = vector.shape_cast %50 : vector<4x8xf32> to vector<4x8x1xf32>
    %52 = tpu.reciprocal %51 {approx = true} : vector<4x8x1xf32> -> vector<4x8x1xf32>
    %53 = vector.broadcast %52 : vector<4x8x1xf32> to vector<4x8x8xf32>
    %54 = arith.mulf %49, %53 : vector<4x8x8xf32>
    %55 = arith.truncf %54 : vector<4x8x8xf32> to vector<4x8x8xbf16>
    "tpu.trace_start"() <{level = 10 : i32, message = "hqk,hkd->hqd"}> : () -> ()
    %cst_24 = arith.constant dense<0.000000e+00> : vector<4x8x8xf32>
    %56 = tpu.matmul %55, %40, %cst_24 {dimension_numbers = #tpu.dot_dimension_numbers<[2], [1], [1], [2], [0, 0, 0, 1, 1, 2], [0], [0]>} : vector<4x8x8xbf16>, vector<4x8x8xbf16>, vector<4x8x8xf32> -> vector<4x8x8xf32>
    "tpu.trace_stop"() : () -> ()
    %57 = tpu.transpose %56, [1, 0, 2] : vector<4x8x8xf32> -> vector<8x4x8xf32>
    %58 = vector.shape_cast %57 : vector<8x4x8xf32> to vector<8x32xf32>
    %59 = arith.truncf %58 : vector<8x32xf32> to vector<8x32xbf16>
    %c0_25 = arith.constant 0 : index
    %c0_26 = arith.constant 0 : index
    %60 = vector.load %arg10[%c0_25, %c0_26] : memref<32x32xbf16, #tpu.memory_space<vmem>>, vector<32x32xbf16>
    %cst_27 = arith.constant dense<0.000000e+00> : vector<8x32xf32>
    %61 = tpu.matmul %59, %60, %cst_27 {dimension_numbers = #tpu.dot_dimension_numbers<[1], [0], [0], [1], [0, 0, 1, 1], [], []>} : vector<8x32xbf16>, vector<32x32xbf16>, vector<8x32xf32> -> vector<8x32xf32>
    %62 = arith.addf %6, %61 : vector<8x32xf32>
    %c0_28 = arith.constant 0 : index
    %c0_29 = arith.constant 0 : index
    %63 = vector.load %arg11[%c0_28, %c0_29] : memref<1x32xf32, #tpu.memory_space<vmem>>, vector<1x32xf32>
    %64 = vector.broadcast %63 : vector<1x32xf32> to vector<8x32xf32>
    %65 = arith.addf %62, %64 : vector<8x32xf32>
    %c0_30 = arith.constant 0 : index
    %c0_31 = arith.constant 0 : index
    %c0_32 = arith.constant 0 : index
    %66 = vector.load %arg12[%c0_30, %c0_31, %c0_32] : memref<1x8x32xf32, #tpu.memory_space<vmem>>, vector<1x8x32xf32>
    %67 = vector.shape_cast %66 : vector<1x8x32xf32> to vector<8x32xf32>
    %68 = vector.shape_cast %65 : vector<8x32xf32> to vector<1x8x32xf32>
    tpu.vector_store %arg12[%c0_30, %c0_31, %c0_32], %68 {strides = array<i32>} : memref<1x8x32xf32, #tpu.memory_space<vmem>>, vector<1x8x32xf32>,
    return
  }
  func.func @transform_0(%arg0: i32, %arg1: i32) -> (i32, i32, i32) {
    %c0_i32 = arith.constant 0 : i32
    %c0_i32_0 = arith.constant 0 : i32
    return %arg0, %arg1, %c0_i32 : i32, i32, i32
  }
  func.func @transform_1(%arg0: i32, %arg1: i32) -> (i32, i32, i32) {
    %c0_i32 = arith.constant 0 : i32
    %c0_i32_0 = arith.constant 0 : i32
    %c0_i32_1 = arith.constant 0 : i32
    return %arg0, %c0_i32, %c0_i32_0 : i32, i32, i32
  }
  func.func @transform_2(%arg0: i32, %arg1: i32) -> (i32, i32) {
    %c0_i32 = arith.constant 0 : i32
    %c0_i32_0 = arith.constant 0 : i32
    %c0_i32_1 = arith.constant 0 : i32
    return %c0_i32, %c0_i32_0 : i32, i32
  }
  func.func @transform_3(%arg0: i32, %arg1: i32) -> (i32, i32) {
    %c0_i32 = arith.constant 0 : i32
    %c0_i32_0 = arith.constant 0 : i32
    %c0_i32_1 = arith.constant 0 : i32
    return %c0_i32, %c0_i32_0 : i32, i32
  }
  func.func @transform_4(%arg0: i32, %arg1: i32) -> (i32, i32) {
    %c0_i32 = arith.constant 0 : i32
    %c0_i32_0 = arith.constant 0 : i32
    %c0_i32_1 = arith.constant 0 : i32
    return %c0_i32, %c0_i32_0 : i32, i32
  }
  func.func @transform_5(%arg0: i32, %arg1: i32) -> (i32, i32) {
    %c0_i32 = arith.constant 0 : i32
    %c0_i32_0 = arith.constant 0 : i32
    %c0_i32_1 = arith.constant 0 : i32
    return %c0_i32, %c0_i32_0 : i32, i32
  }
  func.func @transform_6(%arg0: i32, %arg1: i32) -> (i32, i32) {
    %c0_i32 = arith.constant 0 : i32
    %c0_i32_0 = arith.constant 0 : i32
    %c0_i32_1 = arith.constant 0 : i32
    return %c0_i32, %c0_i32_0 : i32, i32
  }
  func.func @transform_7(%arg0: i32, %arg1: i32) -> (i32, i32, i32) {
    %c0_i32 = arith.constant 0 : i32
    %c0_i32_0 = arith.constant 0 : i32
    %c0_i32_1 = arith.constant 0 : i32
    return %c0_i32, %arg1, %c0_i32_0 : i32, i32, i32
  }
  func.func @transform_8(%arg0: i32, %arg1: i32) -> (i32, i32) {
    %c0_i32 = arith.constant 0 : i32
    %c0_i32_0 = arith.constant 0 : i32
    %c0_i32_1 = arith.constant 0 : i32
    return %c0_i32, %c0_i32_0 : i32, i32
  }
  func.func @transform_9(%arg0: i32, %arg1: i32) -> (i32, i32) {
    %c0_i32 = arith.constant 0 : i32
    %c0_i32_0 = arith.constant 0 : i32
    %c0_i32_1 = arith.constant 0 : i32
    return %c0_i32, %c0_i32_0 : i32, i32
  }
  func.func @transform_10(%arg0: i32, %arg1: i32) -> (i32, i32, i32) {
    %c0_i32 = arith.constant 0 : i32
    %c0_i32_0 = arith.constant 0 : i32
    return %arg0, %arg1, %c0_i32 : i32, i32, i32
  }
}

module attributes {stable_mosaic.version = 11 : i64} {
  func.func @ffn_block_kernel(%arg0: i32, %arg1: i32, %arg2: memref<16x32xf32, #tpu.memory_space<vmem>>, %arg3: memref<1x32xf32, #tpu.memory_space<vmem>>, %arg4: memref<1x32xf32, #tpu.memory_space<vmem>>, %arg5: memref<32x128xbf16, #tpu.memory_space<vmem>>, %arg6: memref<1x128xf32, #tpu.memory_space<vmem>>, %arg7: memref<128x32xbf16, #tpu.memory_space<vmem>>, %arg8: memref<1x32xf32, #tpu.memory_space<vmem>>, %arg9: memref<1x32xf32, #tpu.memory_space<vmem>>, %arg10: memref<1x32xf32, #tpu.memory_space<vmem>>, %arg11: memref<16x32xf32, #tpu.memory_space<vmem>>, %arg12: memref<16x32xf32, #tpu.memory_space<vmem>>, %arg13: memref<16x32xbf16, #tpu.memory_space<vmem>>) attributes {dimension_semantics = [#tpu.dimension_semantics<parallel>, #tpu.dimension_semantics<arbitrary>], iteration_bounds = array<i64: 1, 1>, scalar_prefetch = 0 : i64, scratch_operands = 2 : i64, tpu.core_type = #tpu.core_type<tc>, window_params = [{transform_indices = @transform_0, window_bounds = array<i64: 16, 32>}, {pipeline_mode = #tpu.pipeline_mode<synchronous>, transform_indices = @transform_1, window_bounds = array<i64: 1, 32>}, {pipeline_mode = #tpu.pipeline_mode<synchronous>, transform_indices = @transform_2, window_bounds = array<i64: 1, 32>}, {pipeline_mode = #tpu.pipeline_mode<synchronous>, transform_indices = @transform_3, window_bounds = array<i64: 32, 128>}, {pipeline_mode = #tpu.pipeline_mode<synchronous>, transform_indices = @transform_4, window_bounds = array<i64: 1, 128>}, {pipeline_mode = #tpu.pipeline_mode<synchronous>, transform_indices = @transform_5, window_bounds = array<i64: 128, 32>}, {pipeline_mode = #tpu.pipeline_mode<synchronous>, transform_indices = @transform_6, window_bounds = array<i64: 1, 32>}, {pipeline_mode = #tpu.pipeline_mode<synchronous>, transform_indices = @transform_7, window_bounds = array<i64: 1, 32>}, {pipeline_mode = #tpu.pipeline_mode<synchronous>, transform_indices = @transform_8, window_bounds = array<i64: 1, 32>}, {transform_indices = @transform_9, window_bounds = array<i64: 16, 32>}]} {
    %c0_i32 = arith.constant 0 : i32
    %0 = arith.cmpi eq, %arg1, %c0_i32 : i32
    %1 = arith.extui %0 : i1 to i32
    %c0_i32_0 = arith.constant 0 : i32
    %2 = arith.cmpi ne, %1, %c0_i32_0 : i32
    scf.if %2 {
      %c0_30 = arith.constant 0 : index
      %c0_31 = arith.constant 0 : index
      %58 = vector.load %arg2[%c0_30, %c0_31] : memref<16x32xf32, #tpu.memory_space<vmem>>, vector<16x32xf32>
      %c0_32 = arith.constant 0 : index
      %c0_33 = arith.constant 0 : index
      %59 = vector.load %arg3[%c0_32, %c0_33] : memref<1x32xf32, #tpu.memory_space<vmem>>, vector<1x32xf32>
      %c0_34 = arith.constant 0 : index
      %c0_35 = arith.constant 0 : index
      %60 = vector.load %arg4[%c0_34, %c0_35] : memref<1x32xf32, #tpu.memory_space<vmem>>, vector<1x32xf32>
      %cst_36 = arith.constant dense<0.000000e+00> : vector<16xf32>
      %61 = vector.multi_reduction <add>, %58, %cst_36 [1] : vector<16x32xf32> to vector<16xf32>
      %62 = vector.shape_cast %61 : vector<16xf32> to vector<16x1xf32>
      %cst_37 = arith.constant 3.200000e+01 : f32
      %63 = vector.broadcast %cst_37 : f32 to vector<16x1xf32>
      %64 = arith.divf %62, %63 : vector<16x1xf32>
      %65 = vector.broadcast %64 : vector<16x1xf32> to vector<16x32xf32>
      %66 = arith.subf %58, %65 : vector<16x32xf32>
      %67 = arith.mulf %66, %66 : vector<16x32xf32>
      %cst_38 = arith.constant dense<0.000000e+00> : vector<16xf32>
      %68 = vector.multi_reduction <add>, %67, %cst_38 [1] : vector<16x32xf32> to vector<16xf32>
      %69 = vector.shape_cast %68 : vector<16xf32> to vector<16x1xf32>
      %cst_39 = arith.constant 3.200000e+01 : f32
      %70 = vector.broadcast %cst_39 : f32 to vector<16x1xf32>
      %71 = arith.divf %69, %70 : vector<16x1xf32>
      %72 = vector.broadcast %64 : vector<16x1xf32> to vector<16x32xf32>
      %73 = arith.subf %58, %72 : vector<16x32xf32>
      %cst_40 = arith.constant 9.99999974E-6 : f32
      %74 = vector.broadcast %cst_40 : f32 to vector<16x1xf32>
      %75 = arith.addf %71, %74 : vector<16x1xf32>
      %76 = math.rsqrt %75 : vector<16x1xf32>
      %77 = vector.broadcast %76 : vector<16x1xf32> to vector<16x32xf32>
      %78 = arith.mulf %73, %77 : vector<16x32xf32>
      %79 = vector.broadcast %59 : vector<1x32xf32> to vector<16x32xf32>
      %80 = arith.mulf %78, %79 : vector<16x32xf32>
      %81 = vector.broadcast %60 : vector<1x32xf32> to vector<16x32xf32>
      %82 = arith.addf %80, %81 : vector<16x32xf32>
      %83 = arith.truncf %82 : vector<16x32xf32> to vector<16x32xbf16>
      %c0_41 = arith.constant 0 : index
      %c0_42 = arith.constant 0 : index
      %84 = vector.load %arg13[%c0_41, %c0_42] : memref<16x32xbf16, #tpu.memory_space<vmem>>, vector<16x32xbf16>
      tpu.vector_store %arg13[%c0_41, %c0_42], %83 {strides = array<i32>} : memref<16x32xbf16, #tpu.memory_space<vmem>>, vector<16x32xbf16>,
      %c0_43 = arith.constant 0 : index
      %c0_44 = arith.constant 0 : index
      %85 = vector.load %arg8[%c0_43, %c0_44] : memref<1x32xf32, #tpu.memory_space<vmem>>, vector<1x32xf32>
      %86 = vector.broadcast %85 : vector<1x32xf32> to vector<16x32xf32>
      %87 = arith.addf %58, %86 : vector<16x32xf32>
      %c0_45 = arith.constant 0 : index
      %c0_46 = arith.constant 0 : index
      %88 = vector.load %arg12[%c0_45, %c0_46] : memref<16x32xf32, #tpu.memory_space<vmem>>, vector<16x32xf32>
      tpu.vector_store %arg12[%c0_45, %c0_46], %87 {strides = array<i32>} : memref<16x32xf32, #tpu.memory_space<vmem>>, vector<16x32xf32>,
    } else {
    }
    %c0 = arith.constant 0 : index
    %c0_1 = arith.constant 0 : index
    %3 = vector.load %arg13[%c0, %c0_1] : memref<16x32xbf16, #tpu.memory_space<vmem>>, vector<16x32xbf16>
    %c0_2 = arith.constant 0 : index
    %c0_3 = arith.constant 0 : index
    %4 = vector.load %arg5[%c0_2, %c0_3] : memref<32x128xbf16, #tpu.memory_space<vmem>>, vector<32x128xbf16>
    %cst = arith.constant dense<0.000000e+00> : vector<16x128xf32>
    %5 = tpu.matmul %3, %4, %cst {dimension_numbers = #tpu.dot_dimension_numbers<[1], [0], [0], [1], [0, 0, 1, 1], [], []>} : vector<16x32xbf16>, vector<32x128xbf16>, vector<16x128xf32> -> vector<16x128xf32>
    %c0_4 = arith.constant 0 : index
    %c0_5 = arith.constant 0 : index
    %6 = vector.load %arg6[%c0_4, %c0_5] : memref<1x128xf32, #tpu.memory_space<vmem>>, vector<1x128xf32>
    %7 = vector.broadcast %6 : vector<1x128xf32> to vector<16x128xf32>
    %8 = arith.addf %5, %7 : vector<16x128xf32>
    %cst_6 = arith.constant 5.000000e-01 : f32
    %9 = vector.broadcast %cst_6 : f32 to vector<16x128xf32>
    %10 = arith.mulf %9, %8 : vector<16x128xf32>
    %cst_7 = arith.constant 0.707106769 : f32
    %11 = vector.broadcast %cst_7 : f32 to vector<16x128xf32>
    %12 = arith.mulf %8, %11 : vector<16x128xf32>
    %13 = math.absf %12 : vector<16x128xf32>
    %cst_8 = arith.constant 0.327591091 : f32
    %14 = vector.broadcast %cst_8 : f32 to vector<16x128xf32>
    %15 = arith.mulf %14, %13 : vector<16x128xf32>
    %cst_9 = arith.constant 1.000000e+00 : f32
    %16 = vector.broadcast %cst_9 : f32 to vector<16x128xf32>
    %17 = arith.addf %16, %15 : vector<16x128xf32>
    %cst_10 = arith.constant 1.000000e+00 : f32
    %18 = vector.broadcast %cst_10 : f32 to vector<16x128xf32>
    %19 = arith.divf %18, %17 : vector<16x128xf32>
    %cst_11 = arith.constant 1.06140542 : f32
    %20 = vector.broadcast %cst_11 : f32 to vector<16x128xf32>
    %21 = arith.mulf %20, %19 : vector<16x128xf32>
    %cst_12 = arith.constant 1.45315206 : f32
    %22 = vector.broadcast %cst_12 : f32 to vector<16x128xf32>
    %23 = arith.subf %21, %22 : vector<16x128xf32>
    %24 = arith.mulf %23, %19 : vector<16x128xf32>
    %cst_13 = arith.constant 1.42141378 : f32
    %25 = vector.broadcast %cst_13 : f32 to vector<16x128xf32>
    %26 = arith.addf %24, %25 : vector<16x128xf32>
    %27 = arith.mulf %26, %19 : vector<16x128xf32>
    %cst_14 = arith.constant 0.284496725 : f32
    %28 = vector.broadcast %cst_14 : f32 to vector<16x128xf32>
    %29 = arith.subf %27, %28 : vector<16x128xf32>
    %30 = arith.mulf %29, %19 : vector<16x128xf32>
    %cst_15 = arith.constant 0.254829586 : f32
    %31 = vector.broadcast %cst_15 : f32 to vector<16x128xf32>
    %32 = arith.addf %30, %31 : vector<16x128xf32>
    %33 = arith.mulf %32, %19 : vector<16x128xf32>
    %cst_16 = arith.constant 0.000000e+00 : f32
    %34 = vector.broadcast %cst_16 : f32 to vector<16x128xf32>
    %35 = arith.subf %34, %13 : vector<16x128xf32>
    %36 = arith.mulf %35, %13 : vector<16x128xf32>
    %37 = math.exp %36 : vector<16x128xf32>
    %38 = arith.mulf %33, %37 : vector<16x128xf32>
    %cst_17 = arith.constant 1.000000e+00 : f32
    %39 = vector.broadcast %cst_17 : f32 to vector<16x128xf32>
    %40 = arith.subf %39, %38 : vector<16x128xf32>
    %cst_18 = arith.constant 0.000000e+00 : f32
    %41 = vector.broadcast %cst_18 : f32 to vector<16x128xf32>
    %42 = arith.cmpf olt, %12, %41 : vector<16x128xf32>
    %cst_19 = arith.constant 0.000000e+00 : f32
    %43 = vector.broadcast %cst_19 : f32 to vector<16x128xf32>
    %44 = arith.subf %43, %40 : vector<16x128xf32>
    %45 = arith.select %42, %44, %40 : vector<16x128xi1>, vector<16x128xf32>
    %cst_20 = arith.constant 1.000000e+00 : f32
    %46 = vector.broadcast %cst_20 : f32 to vector<16x128xf32>
    %47 = arith.addf %46, %45 : vector<16x128xf32>
    %48 = arith.mulf %10, %47 : vector<16x128xf32>
    %c0_21 = arith.constant 0 : index
    %c0_22 = arith.constant 0 : index
    %49 = vector.load %arg12[%c0_21, %c0_22] : memref<16x32xf32, #tpu.memory_space<vmem>>, vector<16x32xf32>
    %50 = arith.truncf %48 : vector<16x128xf32> to vector<16x128xbf16>
    %c0_23 = arith.constant 0 : index
    %c0_24 = arith.constant 0 : index
    %51 = vector.load %arg7[%c0_23, %c0_24] : memref<128x32xbf16, #tpu.memory_space<vmem>>, vector<128x32xbf16>
    %cst_25 = arith.constant dense<0.000000e+00> : vector<16x32xf32>
    %52 = tpu.matmul %50, %51, %cst_25 {dimension_numbers = #tpu.dot_dimension_numbers<[1], [0], [0], [1], [0, 0, 1, 1], [], []>} : vector<16x128xbf16>, vector<128x32xbf16>, vector<16x32xf32> -> vector<16x32xf32>
    %53 = arith.addf %49, %52 : vector<16x32xf32>
    %c0_26 = arith.constant 0 : index
    %c0_27 = arith.constant 0 : index
    %54 = vector.load %arg12[%c0_26, %c0_27] : memref<16x32xf32, #tpu.memory_space<vmem>>, vector<16x32xf32>
    tpu.vector_store %arg12[%c0_26, %c0_27], %53 {strides = array<i32>} : memref<16x32xf32, #tpu.memory_space<vmem>>, vector<16x32xf32>,
    %c0_i32_28 = arith.constant 0 : i32
    %55 = arith.cmpi eq, %arg1, %c0_i32_28 : i32
    %56 = arith.extui %55 : i1 to i32
    %c0_i32_29 = arith.constant 0 : i32
    %57 = arith.cmpi ne, %56, %c0_i32_29 : i32
    scf.if %57 {
      %c0_30 = arith.constant 0 : index
      %c0_31 = arith.constant 0 : index
      %58 = vector.load %arg12[%c0_30, %c0_31] : memref<16x32xf32, #tpu.memory_space<vmem>>, vector<16x32xf32>
      %c0_32 = arith.constant 0 : index
      %c0_33 = arith.constant 0 : index
      %59 = vector.load %arg11[%c0_32, %c0_33] : memref<16x32xf32, #tpu.memory_space<vmem>>, vector<16x32xf32>
      tpu.vector_store %arg11[%c0_32, %c0_33], %58 {strides = array<i32>} : memref<16x32xf32, #tpu.memory_space<vmem>>, vector<16x32xf32>,
    } else {
    }
    return
  }
  func.func @transform_0(%arg0: i32, %arg1: i32) -> (i32, i32) {
    %c0_i32 = arith.constant 0 : i32
    %c0_i32_0 = arith.constant 0 : i32
    return %arg0, %c0_i32 : i32, i32
  }
  func.func @transform_1(%arg0: i32, %arg1: i32) -> (i32, i32) {
    %c0_i32 = arith.constant 0 : i32
    %c0_i32_0 = arith.constant 0 : i32
    %c0_i32_1 = arith.constant 0 : i32
    return %c0_i32, %c0_i32_0 : i32, i32
  }
  func.func @transform_2(%arg0: i32, %arg1: i32) -> (i32, i32) {
    %c0_i32 = arith.constant 0 : i32
    %c0_i32_0 = arith.constant 0 : i32
    %c0_i32_1 = arith.constant 0 : i32
    return %c0_i32, %c0_i32_0 : i32, i32
  }
  func.func @transform_3(%arg0: i32, %arg1: i32) -> (i32, i32) {
    %c0_i32 = arith.constant 0 : i32
    %c0_i32_0 = arith.constant 0 : i32
    return %c0_i32, %arg1 : i32, i32
  }
  func.func @transform_4(%arg0: i32, %arg1: i32) -> (i32, i32) {
    %c0_i32 = arith.constant 0 : i32
    %c0_i32_0 = arith.constant 0 : i32
    return %c0_i32, %arg1 : i32, i32
  }
  func.func @transform_5(%arg0: i32, %arg1: i32) -> (i32, i32) {
    %c0_i32 = arith.constant 0 : i32
    %c0_i32_0 = arith.constant 0 : i32
    return %arg1, %c0_i32 : i32, i32
  }
  func.func @transform_6(%arg0: i32, %arg1: i32) -> (i32, i32) {
    %c0_i32 = arith.constant 0 : i32
    %c0_i32_0 = arith.constant 0 : i32
    %c0_i32_1 = arith.constant 0 : i32
    return %c0_i32, %c0_i32_0 : i32, i32
  }
  func.func @transform_7(%arg0: i32, %arg1: i32) -> (i32, i32) {
    %c0_i32 = arith.constant 0 : i32
    %c0_i32_0 = arith.constant 0 : i32
    %c0_i32_1 = arith.constant 0 : i32
    return %c0_i32, %c0_i32_0 : i32, i32
  }
  func.func @transform_8(%arg0: i32, %arg1: i32) -> (i32, i32) {
    %c0_i32 = arith.constant 0 : i32
    %c0_i32_0 = arith.constant 0 : i32
    %c0_i32_1 = arith.constant 0 : i32
    return %c0_i32, %c0_i32_0 : i32, i32
  }
  func.func @transform_9(%arg0: i32, %arg1: i32) -> (i32, i32) {
    %c0_i32 = arith.constant 0 : i32
    %c0_i32_0 = arith.constant 0 : i32
    return %arg0, %c0_i32 : i32, i32
  }
}

module attributes {stable_mosaic.version = 11 : i64} {
  func.func @ffn_block_kernel(%arg0: i32, %arg1: i32, %arg2: memref<16x32xf32, #tpu.memory_space<vmem>>, %arg3: memref<1x32xf32, #tpu.memory_space<vmem>>, %arg4: memref<1x32xf32, #tpu.memory_space<vmem>>, %arg5: memref<32x128xbf16, #tpu.memory_space<vmem>>, %arg6: memref<1x128xf32, #tpu.memory_space<vmem>>, %arg7: memref<128x32xbf16, #tpu.memory_space<vmem>>, %arg8: memref<1x32xf32, #tpu.memory_space<vmem>>, %arg9: memref<1x32xf32, #tpu.memory_space<vmem>>, %arg10: memref<1x32xf32, #tpu.memory_space<vmem>>, %arg11: memref<16x32xf32, #tpu.memory_space<vmem>>, %arg12: memref<16x32xf32, #tpu.memory_space<vmem>>, %arg13: memref<16x32xbf16, #tpu.memory_space<vmem>>) attributes {dimension_semantics = [#tpu.dimension_semantics<parallel>, #tpu.dimension_semantics<arbitrary>], iteration_bounds = array<i64: 1, 1>, scalar_prefetch = 0 : i64, scratch_operands = 2 : i64, tpu.core_type = #tpu.core_type<tc>, window_params = [{transform_indices = @transform_0, window_bounds = array<i64: 16, 32>}, {pipeline_mode = #tpu.pipeline_mode<synchronous>, transform_indices = @transform_1, window_bounds = array<i64: 1, 32>}, {pipeline_mode = #tpu.pipeline_mode<synchronous>, transform_indices = @transform_2, window_bounds = array<i64: 1, 32>}, {pipeline_mode = #tpu.pipeline_mode<synchronous>, transform_indices = @transform_3, window_bounds = array<i64: 32, 128>}, {pipeline_mode = #tpu.pipeline_mode<synchronous>, transform_indices = @transform_4, window_bounds = array<i64: 1, 128>}, {pipeline_mode = #tpu.pipeline_mode<synchronous>, transform_indices = @transform_5, window_bounds = array<i64: 128, 32>}, {pipeline_mode = #tpu.pipeline_mode<synchronous>, transform_indices = @transform_6, window_bounds = array<i64: 1, 32>}, {pipeline_mode = #tpu.pipeline_mode<synchronous>, transform_indices = @transform_7, window_bounds = array<i64: 1, 32>}, {pipeline_mode = #tpu.pipeline_mode<synchronous>, transform_indices = @transform_8, window_bounds = array<i64: 1, 32>}, {transform_indices = @transform_9, window_bounds = array<i64: 16, 32>}]} {
    %c0_i32 = arith.constant 0 : i32
    %0 = arith.cmpi eq, %arg1, %c0_i32 : i32
    %1 = arith.extui %0 : i1 to i32
    %c0_i32_0 = arith.constant 0 : i32
    %2 = arith.cmpi ne, %1, %c0_i32_0 : i32
    scf.if %2 {
      %c0_30 = arith.constant 0 : index
      %c0_31 = arith.constant 0 : index
      %58 = vector.load %arg2[%c0_30, %c0_31] : memref<16x32xf32, #tpu.memory_space<vmem>>, vector<16x32xf32>
      %c0_32 = arith.constant 0 : index
      %c0_33 = arith.constant 0 : index
      %59 = vector.load %arg3[%c0_32, %c0_33] : memref<1x32xf32, #tpu.memory_space<vmem>>, vector<1x32xf32>
      %c0_34 = arith.constant 0 : index
      %c0_35 = arith.constant 0 : index
      %60 = vector.load %arg4[%c0_34, %c0_35] : memref<1x32xf32, #tpu.memory_space<vmem>>, vector<1x32xf32>
      %cst_36 = arith.constant dense<0.000000e+00> : vector<16xf32>
      %61 = vector.multi_reduction <add>, %58, %cst_36 [1] : vector<16x32xf32> to vector<16xf32>
      %62 = vector.shape_cast %61 : vector<16xf32> to vector<16x1xf32>
      %cst_37 = arith.constant 3.200000e+01 : f32
      %63 = vector.broadcast %cst_37 : f32 to vector<16x1xf32>
      %64 = arith.divf %62, %63 : vector<16x1xf32>
      %65 = vector.broadcast %64 : vector<16x1xf32> to vector<16x32xf32>
      %66 = arith.subf %58, %65 : vector<16x32xf32>
      %67 = arith.mulf %66, %66 : vector<16x32xf32>
      %cst_38 = arith.constant dense<0.000000e+00> : vector<16xf32>
      %68 = vector.multi_reduction <add>, %67, %cst_38 [1] : vector<16x32xf32> to vector<16xf32>
      %69 = vector.shape_cast %68 : vector<16xf32> to vector<16x1xf32>
      %cst_39 = arith.constant 3.200000e+01 : f32
      %70 = vector.broadcast %cst_39 : f32 to vector<16x1xf32>
      %71 = arith.divf %69, %70 : vector<16x1xf32>
      %72 = vector.broadcast %64 : vector<16x1xf32> to vector<16x32xf32>
      %73 = arith.subf %58, %72 : vector<16x32xf32>
      %cst_40 = arith.constant 9.99999974E-6 : f32
      %74 = vector.broadcast %cst_40 : f32 to vector<16x1xf32>
      %75 = arith.addf %71, %74 : vector<16x1xf32>
      %76 = math.rsqrt %75 : vector<16x1xf32>
      %77 = vector.broadcast %76 : vector<16x1xf32> to vector<16x32xf32>
      %78 = arith.mulf %73, %77 : vector<16x32xf32>
      %79 = vector.broadcast %59 : vector<1x32xf32> to vector<16x32xf32>
      %80 = arith.mulf %78, %79 : vector<16x32xf32>
      %81 = vector.broadcast %60 : vector<1x32xf32> to vector<16x32xf32>
      %82 = arith.addf %80, %81 : vector<16x32xf32>
      %83 = arith.truncf %82 : vector<16x32xf32> to vector<16x32xbf16>
      %c0_41 = arith.constant 0 : index
      %c0_42 = arith.constant 0 : index
      %84 = vector.load %arg13[%c0_41, %c0_42] : memref<16x32xbf16, #tpu.memory_space<vmem>>, vector<16x32xbf16>
      tpu.vector_store %arg13[%c0_41, %c0_42], %83 {strides = array<i32>} : memref<16x32xbf16, #tpu.memory_space<vmem>>, vector<16x32xbf16>,
      %c0_43 = arith.constant 0 : index
      %c0_44 = arith.constant 0 : index
      %85 = vector.load %arg8[%c0_43, %c0_44] : memref<1x32xf32, #tpu.memory_space<vmem>>, vector<1x32xf32>
      %86 = vector.broadcast %85 : vector<1x32xf32> to vector<16x32xf32>
      %87 = arith.addf %58, %86 : vector<16x32xf32>
      %c0_45 = arith.constant 0 : index
      %c0_46 = arith.constant 0 : index
      %88 = vector.load %arg12[%c0_45, %c0_46] : memref<16x32xf32, #tpu.memory_space<vmem>>, vector<16x32xf32>
      tpu.vector_store %arg12[%c0_45, %c0_46], %87 {strides = array<i32>} : memref<16x32xf32, #tpu.memory_space<vmem>>, vector<16x32xf32>,
    } else {
    }
    %c0 = arith.constant 0 : index
    %c0_1 = arith.constant 0 : index
    %3 = vector.load %arg13[%c0, %c0_1] : memref<16x32xbf16, #tpu.memory_space<vmem>>, vector<16x32xbf16>
    %c0_2 = arith.constant 0 : index
    %c0_3 = arith.constant 0 : index
    %4 = vector.load %arg5[%c0_2, %c0_3] : memref<32x128xbf16, #tpu.memory_space<vmem>>, vector<32x128xbf16>
    %cst = arith.constant dense<0.000000e+00> : vector<16x128xf32>
    %5 = tpu.matmul %3, %4, %cst {dimension_numbers = #tpu.dot_dimension_numbers<[1], [0], [0], [1], [0, 0, 1, 1], [], []>} : vector<16x32xbf16>, vector<32x128xbf16>, vector<16x128xf32> -> vector<16x128xf32>
    %c0_4 = arith.constant 0 : index
    %c0_5 = arith.constant 0 : index
    %6 = vector.load %arg6[%c0_4, %c0_5] : memref<1x128xf32, #tpu.memory_space<vmem>>, vector<1x128xf32>
    %7 = vector.broadcast %6 : vector<1x128xf32> to vector<16x128xf32>
    %8 = arith.addf %5, %7 : vector<16x128xf32>
    %cst_6 = arith.constant 5.000000e-01 : f32
    %9 = vector.broadcast %cst_6 : f32 to vector<16x128xf32>
    %10 = arith.mulf %9, %8 : vector<16x128xf32>
    %cst_7 = arith.constant 0.707106769 : f32
    %11 = vector.broadcast %cst_7 : f32 to vector<16x128xf32>
    %12 = arith.mulf %8, %11 : vector<16x128xf32>
    %13 = math.absf %12 : vector<16x128xf32>
    %cst_8 = arith.constant 0.327591091 : f32
    %14 = vector.broadcast %cst_8 : f32 to vector<16x128xf32>
    %15 = arith.mulf %14, %13 : vector<16x128xf32>
    %cst_9 = arith.constant 1.000000e+00 : f32
    %16 = vector.broadcast %cst_9 : f32 to vector<16x128xf32>
    %17 = arith.addf %16, %15 : vector<16x128xf32>
    %cst_10 = arith.constant 1.000000e+00 : f32
    %18 = vector.broadcast %cst_10 : f32 to vector<16x128xf32>
    %19 = arith.divf %18, %17 : vector<16x128xf32>
    %cst_11 = arith.constant 1.06140542 : f32
    %20 = vector.broadcast %cst_11 : f32 to vector<16x128xf32>
    %21 = arith.mulf %20, %19 : vector<16x128xf32>
    %cst_12 = arith.constant 1.45315206 : f32
    %22 = vector.broadcast %cst_12 : f32 to vector<16x128xf32>
    %23 = arith.subf %21, %22 : vector<16x128xf32>
    %24 = arith.mulf %23, %19 : vector<16x128xf32>
    %cst_13 = arith.constant 1.42141378 : f32
    %25 = vector.broadcast %cst_13 : f32 to vector<16x128xf32>
    %26 = arith.addf %24, %25 : vector<16x128xf32>
    %27 = arith.mulf %26, %19 : vector<16x128xf32>
    %cst_14 = arith.constant 0.284496725 : f32
    %28 = vector.broadcast %cst_14 : f32 to vector<16x128xf32>
    %29 = arith.subf %27, %28 : vector<16x128xf32>
    %30 = arith.mulf %29, %19 : vector<16x128xf32>
    %cst_15 = arith.constant 0.254829586 : f32
    %31 = vector.broadcast %cst_15 : f32 to vector<16x128xf32>
    %32 = arith.addf %30, %31 : vector<16x128xf32>
    %33 = arith.mulf %32, %19 : vector<16x128xf32>
    %cst_16 = arith.constant 0.000000e+00 : f32
    %34 = vector.broadcast %cst_16 : f32 to vector<16x128xf32>
    %35 = arith.subf %34, %13 : vector<16x128xf32>
    %36 = arith.mulf %35, %13 : vector<16x128xf32>
    %37 = math.exp %36 : vector<16x128xf32>
    %38 = arith.mulf %33, %37 : vector<16x128xf32>
    %cst_17 = arith.constant 1.000000e+00 : f32
    %39 = vector.broadcast %cst_17 : f32 to vector<16x128xf32>
    %40 = arith.subf %39, %38 : vector<16x128xf32>
    %cst_18 = arith.constant 0.000000e+00 : f32
    %41 = vector.broadcast %cst_18 : f32 to vector<16x128xf32>
    %42 = arith.cmpf olt, %12, %41 : vector<16x128xf32>
    %cst_19 = arith.constant 0.000000e+00 : f32
    %43 = vector.broadcast %cst_19 : f32 to vector<16x128xf32>
    %44 = arith.subf %43, %40 : vector<16x128xf32>
    %45 = arith.select %42, %44, %40 : vector<16x128xi1>, vector<16x128xf32>
    %cst_20 = arith.constant 1.000000e+00 : f32
    %46 = vector.broadcast %cst_20 : f32 to vector<16x128xf32>
    %47 = arith.addf %46, %45 : vector<16x128xf32>
    %48 = arith.mulf %10, %47 : vector<16x128xf32>
    %c0_21 = arith.constant 0 : index
    %c0_22 = arith.constant 0 : index
    %49 = vector.load %arg12[%c0_21, %c0_22] : memref<16x32xf32, #tpu.memory_space<vmem>>, vector<16x32xf32>
    %50 = arith.truncf %48 : vector<16x128xf32> to vector<16x128xbf16>
    %c0_23 = arith.constant 0 : index
    %c0_24 = arith.constant 0 : index
    %51 = vector.load %arg7[%c0_23, %c0_24] : memref<128x32xbf16, #tpu.memory_space<vmem>>, vector<128x32xbf16>
    %cst_25 = arith.constant dense<0.000000e+00> : vector<16x32xf32>
    %52 = tpu.matmul %50, %51, %cst_25 {dimension_numbers = #tpu.dot_dimension_numbers<[1], [0], [0], [1], [0, 0, 1, 1], [], []>} : vector<16x128xbf16>, vector<128x32xbf16>, vector<16x32xf32> -> vector<16x32xf32>
    %53 = arith.addf %49, %52 : vector<16x32xf32>
    %c0_26 = arith.constant 0 : index
    %c0_27 = arith.constant 0 : index
    %54 = vector.load %arg12[%c0_26, %c0_27] : memref<16x32xf32, #tpu.memory_space<vmem>>, vector<16x32xf32>
    tpu.vector_store %arg12[%c0_26, %c0_27], %53 {strides = array<i32>} : memref<16x32xf32, #tpu.memory_space<vmem>>, vector<16x32xf32>,
    %c0_i32_28 = arith.constant 0 : i32
    %55 = arith.cmpi eq, %arg1, %c0_i32_28 : i32
    %56 = arith.extui %55 : i1 to i32
    %c0_i32_29 = arith.constant 0 : i32
    %57 = arith.cmpi ne, %56, %c0_i32_29 : i32
    scf.if %57 {
      %c0_30 = arith.constant 0 : index
      %c0_31 = arith.constant 0 : index
      %58 = vector.load %arg12[%c0_30, %c0_31] : memref<16x32xf32, #tpu.memory_space<vmem>>, vector<16x32xf32>
      %c0_32 = arith.constant 0 : index
      %c0_33 = arith.constant 0 : index
      %59 = vector.load %arg9[%c0_32, %c0_33] : memref<1x32xf32, #tpu.memory_space<vmem>>, vector<1x32xf32>
      %c0_34 = arith.constant 0 : index
      %c0_35 = arith.constant 0 : index
      %60 = vector.load %arg10[%c0_34, %c0_35] : memref<1x32xf32, #tpu.memory_space<vmem>>, vector<1x32xf32>
      %cst_36 = arith.constant dense<0.000000e+00> : vector<16xf32>
      %61 = vector.multi_reduction <add>, %58, %cst_36 [1] : vector<16x32xf32> to vector<16xf32>
      %62 = vector.shape_cast %61 : vector<16xf32> to vector<16x1xf32>
      %cst_37 = arith.constant 3.200000e+01 : f32
      %63 = vector.broadcast %cst_37 : f32 to vector<16x1xf32>
      %64 = arith.divf %62, %63 : vector<16x1xf32>
      %65 = vector.broadcast %64 : vector<16x1xf32> to vector<16x32xf32>
      %66 = arith.subf %58, %65 : vector<16x32xf32>
      %67 = arith.mulf %66, %66 : vector<16x32xf32>
      %cst_38 = arith.constant dense<0.000000e+00> : vector<16xf32>
      %68 = vector.multi_reduction <add>, %67, %cst_38 [1] : vector<16x32xf32> to vector<16xf32>
      %69 = vector.shape_cast %68 : vector<16xf32> to vector<16x1xf32>
      %cst_39 = arith.constant 3.200000e+01 : f32
      %70 = vector.broadcast %cst_39 : f32 to vector<16x1xf32>
      %71 = arith.divf %69, %70 : vector<16x1xf32>
      %72 = vector.broadcast %64 : vector<16x1xf32> to vector<16x32xf32>
      %73 = arith.subf %58, %72 : vector<16x32xf32>
      %cst_40 = arith.constant 9.99999974E-6 : f32
      %74 = vector.broadcast %cst_40 : f32 to vector<16x1xf32>
      %75 = arith.addf %71, %74 : vector<16x1xf32>
      %76 = math.rsqrt %75 : vector<16x1xf32>
      %77 = vector.broadcast %76 : vector<16x1xf32> to vector<16x32xf32>
      %78 = arith.mulf %73, %77 : vector<16x32xf32>
      %79 = vector.broadcast %59 : vector<1x32xf32> to vector<16x32xf32>
      %80 = arith.mulf %78, %79 : vector<16x32xf32>
      %81 = vector.broadcast %60 : vector<1x32xf32> to vector<16x32xf32>
      %82 = arith.addf %80, %81 : vector<16x32xf32>
      %c0_41 = arith.constant 0 : index
      %c0_42 = arith.constant 0 : index
      %83 = vector.load %arg11[%c0_41, %c0_42] : memref<16x32xf32, #tpu.memory_space<vmem>>, vector<16x32xf32>
      tpu.vector_store %arg11[%c0_41, %c0_42], %82 {strides = array<i32>} : memref<16x32xf32, #tpu.memory_space<vmem>>, vector<16x32xf32>,
    } else {
    }
    return
  }
  func.func @transform_0(%arg0: i32, %arg1: i32) -> (i32, i32) {
    %c0_i32 = arith.constant 0 : i32
    %c0_i32_0 = arith.constant 0 : i32
    return %arg0, %c0_i32 : i32, i32
  }
  func.func @transform_1(%arg0: i32, %arg1: i32) -> (i32, i32) {
    %c0_i32 = arith.constant 0 : i32
    %c0_i32_0 = arith.constant 0 : i32
    %c0_i32_1 = arith.constant 0 : i32
    return %c0_i32, %c0_i32_0 : i32, i32
  }
  func.func @transform_2(%arg0: i32, %arg1: i32) -> (i32, i32) {
    %c0_i32 = arith.constant 0 : i32
    %c0_i32_0 = arith.constant 0 : i32
    %c0_i32_1 = arith.constant 0 : i32
    return %c0_i32, %c0_i32_0 : i32, i32
  }
  func.func @transform_3(%arg0: i32, %arg1: i32) -> (i32, i32) {
    %c0_i32 = arith.constant 0 : i32
    %c0_i32_0 = arith.constant 0 : i32
    return %c0_i32, %arg1 : i32, i32
  }
  func.func @transform_4(%arg0: i32, %arg1: i32) -> (i32, i32) {
    %c0_i32 = arith.constant 0 : i32
    %c0_i32_0 = arith.constant 0 : i32
    return %c0_i32, %arg1 : i32, i32
  }
  func.func @transform_5(%arg0: i32, %arg1: i32) -> (i32, i32) {
    %c0_i32 = arith.constant 0 : i32
    %c0_i32_0 = arith.constant 0 : i32
    return %arg1, %c0_i32 : i32, i32
  }
  func.func @transform_6(%arg0: i32, %arg1: i32) -> (i32, i32) {
    %c0_i32 = arith.constant 0 : i32
    %c0_i32_0 = arith.constant 0 : i32
    %c0_i32_1 = arith.constant 0 : i32
    return %c0_i32, %c0_i32_0 : i32, i32
  }
  func.func @transform_7(%arg0: i32, %arg1: i32) -> (i32, i32) {
    %c0_i32 = arith.constant 0 : i32
    %c0_i32_0 = arith.constant 0 : i32
    %c0_i32_1 = arith.constant 0 : i32
    return %c0_i32, %c0_i32_0 : i32, i32
  }
  func.func @transform_8(%arg0: i32, %arg1: i32) -> (i32, i32) {
    %c0_i32 = arith.constant 0 : i32
    %c0_i32_0 = arith.constant 0 : i32
    %c0_i32_1 = arith.constant 0 : i32
    return %c0_i32, %c0_i32_0 : i32, i32
  }
  func.func @transform_9(%arg0: i32, %arg1: i32) -> (i32, i32) {
    %c0_i32 = arith.constant 0 : i32
    %c0_i32_0 = arith.constant 0 : i32
    return %arg0, %c0_i32 : i32, i32
  }
}

</mosaic_0001>

<bundles_post_ra>
// kernel: base_transformer_cross_attn.11
= control target key start
LH: loop header
LB: loop body
LE: loop exit
PB: predicated region body
PF: predicated region fallthrough
CT: control target
= control target key end

     0   :  { %vm42_vm0 = vcmask 261120   ;;  %s664_s0 = inlined_call_operand.vmem [shape: f32[16,32], index: 0, kind: input, shape index: {}]   ;;  %s665_s1 = inlined_call_operand.vmem [shape: f32[1,32], index: 1, kind: input, shape index: {}]   ;;  %s666_s2 = inlined_call_operand.vmem [shape: f32[1,32], index: 2, kind: input, shape index: {}]   ;;  %s667_s3 = inlined_call_operand.vmem [shape: bf16[32,128], index: 3, kind: input, shape index: {}]   ;;  %s668_s4 = inlined_call_operand.vmem [shape: f32[1,128], index: 4, kind: input, shape index: {}]   ;;  %s669_s5 = inlined_call_operand.vmem [shape: bf16[128,32], index: 5, kind: input, shape index: {}]   ;;  %s670_s6 = inlined_call_operand.vmem [shape: f32[1,32], index: 6, kind: input, shape index: {}]   ;;  %s671_s7 = inlined_call_operand.vmem [shape: f32[1,32], index: 7, kind: input, shape index: {}]   ;;  %s672_s8 = inlined_call_operand.vmem [shape: f32[1,32], index: 8, kind: input, shape index: {}]   ;;  %s673_s9 = inlined_call_operand.hbm [shape: f32[16,32], index: 9, kind: output, shape index: {}]  }
   0x1   :  { %v38_v0 = vld [vmem:[%s664_s0] sm:$0xff]  ;;  %v39_v2 = vld [vmem:[%s664_s0 + $0x8] sm:$0xff] }
   0x2   :  { %v421_v1 = vld [vmem:[%s670_s6] ss:$0 sm:$0xff]  ;;  %v43_v3 = vsel %vm42_vm0, %v38_v0, 0.0  ;;  %v46_v5 = vsel %vm42_vm0, %v39_v2, 0.0 }
   0x3   :  { %v104_v4 = vadd.f32 %v421_v1, %v38_v0  ;;  %v105_v6 = vadd.f32 %v421_v1, %v39_v2  ;;  %44 = vadd.xlane.f32.xlu0 %v43_v3 }
   0x5   :  { %106 = vst.msk [vmem:[#allocation2] sm:$0xff] %vm42_vm0, %v104_v4  ;;  %107 = vst.msk [vmem:[#allocation2 + $0x8] sm:$0xff] %vm42_vm0, %v105_v6 }
   0x7   :  { %47 = vadd.xlane.f32.xlu0 %v46_v5 }
   0x8   :  { %14 = vsyncpa [#allocation5], 0  ;;  %v488_v17 = vld [vmem:[%s667_s3 + $0x8] sm:$0xff]   ;;  %v537_v18 = vmov 0.0   ;;  %vm538_vm1 = vmmov 0   ;;  %v489_v19 = vld [vmem:[%s667_s3] sm:$0xff]  }
   0x9   :  { %455 = vmatprep.subr.bf16.mxu0 %v537_v18  ;;  %459 = vmatprep.mubr.msk.bf16.mxu0 %vm538_vm1, %v537_v18  ;;  %v417_v27 = vld [vmem:[%s665_s1] ss:$0 sm:$0xff]  ;;  %vm94_vm2 = vcmask 257024   ;;  %v491_v39 = vld [vmem:[%s669_s5 + $0x38] sm:$0xff]   ;;  %v492_v40 = vld [vmem:[%s669_s5 + $0x30] sm:$0xff]   ;;  %s539_s15 = smov [#allocation4]  }
   0xa   :  { %456 = vmatpush3.bf16.msra.mxu0 %v488_v17  ;;  %463 = vmatprep.subr.bf16.mxu1 %v537_v18  ;;  %v418_v29 = vld [vmem:[%s666_s2] ss:$0 sm:$0xff]  ;;  %v493_v41 = vld [vmem:[%s669_s5 + $0x28] sm:$0xff]   ;;  %v495_v43 = vld [vmem:[%s669_s5 + $0x18] sm:$0xff]   ;;  %s406_s16 = sshll.u32 %s539_s15, 4  ;;  %s407_s16 = int_to_ptr.vmem [resolvable:$true] %s406_s16 }
   0xb   :  { %457 = vmatprep.subr.bf16.mxu0 %v537_v18  ;;  %479 = vmatprep.mubr.msk.bf16.mxu1 %vm538_vm1, %v537_v18  ;;  %v494_v42 = vld [vmem:[%s669_s5 + $0x20] sm:$0xff]   ;;  %v496_v44 = vld [vmem:[%s669_s5 + $0x10] sm:$0xff]   ;;  %v497_v45 = vld [vmem:[%s669_s5 + $0x8] sm:$0xff]   ;;  %s515_s17 = scalar_lea.vmem %s407_s16, 256  ;;  %p520_p1 = scmp.lt.s32.totalorder %s407_s16, %s407_s16 }
   0xc   :  { %464 = vmatpush3.bf16.msra.mxu1 %v491_v39  ;;  %v498_v46 = vld [vmem:[%s669_s5] sm:$0xff]   ;;  %p516_p0 = scmp.ne.s32.totalorder %s407_s16, %s515_s17  ;;  %p521_p2 = scmp.lt.s32.totalorder %s515_s17, %s515_s17 }
   0xd   :  { %465 = vmatprep.subr.bf16.mxu1 %v537_v18  ;;  %v422_v47 = vld [vmem:[%s668_s4] ss:$0 sm:$0xff] }
   0xe   :  { %458 = vmatpush3.bf16.msra.mxu0 %v489_v19  ;;  %p522_p3 = por %p521_p2, %p520_p1 }
  0x10   :  { %466 = vmatpush3.bf16.msra.mxu1 %v492_v40  ;;  %p523_p4 = pnand %p522_p3, %p516_p0 }
  0x11   :  { %467 = vmatprep.subr.bf16.mxu1 %v537_v18 }
  0x14   :  { %468 = vmatpush3.bf16.msra.mxu1 %v493_v41  ;;  %v237_v41 = vld [vmem:[#allocation2] sm:$0xff] }
  0x15   :  { %469 = vmatprep.subr.bf16.mxu1 %v537_v18 }
  0x18   :  { %470 = vmatpush3.bf16.msra.mxu1 %v494_v42 }
  0x19   :  { %471 = vmatprep.subr.bf16.mxu1 %v537_v18 }
  0x1c   :  { %472 = vmatpush3.bf16.msra.mxu1 %v495_v43 }
  0x1d   :  { %473 = vmatprep.subr.bf16.mxu1 %v537_v18 }
  0x20   :  { %474 = vmatpush3.bf16.msra.mxu1 %v496_v44 }
  0x21   :  { %475 = vmatprep.subr.bf16.mxu1 %v537_v18 }
  0x24   :  { %476 = vmatpush3.bf16.msra.mxu1 %v497_v45  ;;  %v238_v45 = vld [vmem:[#allocation2 + $0x8] sm:$0xff] }
  0x25   :  { %477 = vmatprep.subr.bf16.mxu1 %v537_v18 }
  0x28   :  { %478 = vmatpush3.bf16.msra.mxu1 %v498_v46 }
  0x8c   :  { %v45_v7 = vpop.xlane.xlu0 %44 }
  0x8d   :  { %v50_v8 = vmul.f32 0.03125, %v45_v7 }
  0x8f   :  { %v52_v9 = vsub.f32 %v38_v0, %v50_v8 }
  0x90   :  { %v48_v10 = vpop.xlane.xlu0 %47 }
  0x91   :  { %v51_v11 = vmul.f32 0.03125, %v48_v10  ;;  %v54_v12 = vmul.f32 %v52_v9, %v52_v9 }
  0x93   :  { %v53_v13 = vsub.f32 %v39_v2, %v51_v11  ;;  %v56_v14 = vsel %vm42_vm0, %v54_v12, 0.0 }
  0x94   :  { %57 = vadd.xlane.f32.xlu1 %v56_v14 }
  0x95   :  { %v55_v15 = vmul.f32 %v53_v13, %v53_v13 }
  0x97   :  { %v59_v16 = vsel %vm42_vm0, %v55_v15, 0.0 }
  0x98   :  { %60 = vadd.xlane.f32.xlu1 %v59_v16 }
 0x11d   :  { %v58_v20 = vpop.xlane.xlu1 %57 }
 0x11e   :  { %v62_v21 = vmul.f32 0.03125, %v58_v20 }
 0x120   :  { %v64_v22 = vadd.f32 1e-05, %v62_v21 }
 0x121   :  { %v61_v23 = vpop.xlane.xlu1 %60 }
 0x122   :  { %499 = vrsqrt.f32 %v64_v22  ;;  %v63_v24 = vmul.f32 0.03125, %v61_v23 }
 0x124   :  { %v65_v25 = vadd.f32 1e-05, %v63_v24 }
 0x126   :  { %501 = vrsqrt.f32 %v65_v25 }
 0x12f   :  { %v500_v26 = vpop.eup %499 }
 0x130   :  { %v68_v28 = vmul.f32 %v500_v26, %v52_v9 }
 0x132   :  { %v76_v30 = vmul.f32 %v417_v27, %v68_v28 }
 0x133   :  { %v502_v31 = vpop.eup %501 }
 0x134   :  { %v84_v32 = vadd.f32 %v418_v29, %v76_v30  ;;  %v69_v33 = vmul.f32 %v502_v31, %v53_v13 }
 0x136   :  { %v441_v34 = vpack.c.bf16 %v84_v32, %v84_v32  ;;  %v77_v35 = vmul.f32 %v417_v27, %v69_v33 }
 0x138   :  { %95 = vst.msk [vmem:[#allocation3] sm:$0xf] %vm94_vm2, %v441_v34  ;;  %v85_v36 = vadd.f32 %v418_v29, %v77_v35 }
 0x13a   :  { %v442_v37 = vpack.c.bf16 %v85_v36, %v85_v36 }
 0x13c   :  { %96 = vst.msk [vmem:[#allocation3 + $0x4] sm:$0xf] %vm94_vm2, %v442_v37 }
 0x143   :  { %v490_v38 = vld [vmem:[#allocation3] sm:$0xff]  }
 0x144   :  { %460 = vmatmul.mubr.msk.bf16.vlgmr.msra.gmra.mxu0 %vm42_vm0, %v490_v38 }
 0x204   :  { %v176_v48 = vpop.f32.mrf.mxu0 }
 0x205   :  { %v177_v49 = vadd.f32 %v422_v47, %v176_v48 }
 0x206   :  { %v461_v50 = vpop.f32.mrf.mxu0 }
 0x207   :  { %v185_v51 = vmul.f32 0.70710677, %v177_v49  ;;  %v183_v35 = vmul.f32 0.5, %v177_v49 }
 0x208   :  { %v179_v52 = vpop.f32.mrf.mxu0 }
 0x209   :  { %v187_v53 = vand.u32 2147483647, %v185_v51  ;;  %v180_v54 = vadd.f32 %v422_v47, %v179_v52  ;;  %vm227_vm3 = vcmp.lt.f32.partialorder %v185_v51, 0.0 }
 0x20a   :  { %v462_v55 = vpop.f32.mrf.mxu0 }
 0x20b   :  { %v189_v56 = vmul.f32 0.3275911, %v187_v53  ;;  %v186_v57 = vmul.f32 0.70710677, %v180_v54  ;;  %v215_v62 = vsub.f32 0.0, %v187_v53  ;;  %v184_v36 = vmul.f32 0.5, %v180_v54 }
 0x20d   :  { %v191_v58 = vadd.f32 1.0, %v189_v56  ;;  %v188_v59 = vand.u32 2147483647, %v186_v57  ;;  %v217_v63 = vmul.f32 %v215_v62, %v187_v53  ;;  %vm228_vm4 = vcmp.lt.f32.partialorder %v186_v57, 0.0 }
 0x20f   :  { %503 = vrcp.f32 %v191_v58  ;;  %v190_v60 = vmul.f32 0.3275911, %v188_v59  ;;  %v216_v0 = vsub.f32 0.0, %v188_v59  ;;  %v219_v3 = vmul.f32 1.442695, %v217_v63 }
 0x211   :  { %v192_v61 = vadd.f32 1.0, %v190_v60  ;;  %v218_v4 = vmul.f32 %v216_v0, %v188_v59 }
 0x213   :  { %505 = vrcp.f32 %v192_v61  ;;  %v221_v9 = vmul.f32 1.442695, %v218_v4 }
 0x214   :  { %507 = vpow2.f32 %v219_v3 }
 0x215   :  { %509 = vpow2.f32 %v221_v9 }
 0x21c   :  { %v504_v1 = vpop.eup %503 }
 0x21d   :  { %v197_v2 = vmul.f32 1.0614054, %v504_v1 }
 0x21f   :  { %v427_v5 = vadd.f32 -1.4531521, %v197_v2 }
 0x220   :  { %v506_v6 = vpop.eup %505 }
 0x221   :  { %v201_v7 = vmul.f32 %v504_v1, %v427_v5  ;;  %v198_v8 = vmul.f32 1.0614054, %v506_v6  ;;  %v508_v22 = vpop.eup %507 }
 0x222   :  { %v510_v27 = vpop.eup %509 }
 0x223   :  { %v203_v10 = vadd.f32 1.4214138, %v201_v7  ;;  %v428_v11 = vadd.f32 -1.4531521, %v198_v8  ;;  %v440_v8 = vld [vmem:[%s672_s8] ss:$0 sm:$0xff] }
 0x225   :  { %v205_v12 = vmul.f32 %v504_v1, %v203_v10  ;;  %v202_v13 = vmul.f32 %v506_v6, %v428_v11 }
 0x227   :  { %v429_v14 = vadd.f32 -0.28449672, %v205_v12  ;;  %v204_v15 = vadd.f32 1.4214138, %v202_v13 }
 0x229   :  { %v209_v16 = vmul.f32 %v504_v1, %v429_v14  ;;  %v206_v17 = vmul.f32 %v506_v6, %v204_v15 }
 0x22b   :  { %v211_v18 = vadd.f32 0.2548296, %v209_v16  ;;  %v430_v19 = vadd.f32 -0.28449672, %v206_v17 }
 0x22d   :  { %v213_v20 = vmul.f32 %v504_v1, %v211_v18  ;;  %v210_v21 = vmul.f32 %v506_v6, %v430_v19 }
 0x22f   :  { %v223_v23 = vmul.f32 %v508_v22, %v213_v20  ;;  %v212_v24 = vadd.f32 0.2548296, %v210_v21 }
 0x231   :  { %v225_v25 = vsub.f32 1.0, %v223_v23  ;;  %v214_v26 = vmul.f32 %v506_v6, %v212_v24  ;;  %v439_v6 = vld [vmem:[%s671_s7] ss:$0 sm:$0xff] }
 0x233   :  { %v229_v28 = vsub.f32 0.0, %v225_v25  ;;  %v224_v29 = vmul.f32 %v510_v27, %v214_v26 }
 0x235   :  { %v231_v30 = vsel %vm227_vm3, %v229_v28, %v225_v25  ;;  %v226_v31 = vsub.f32 1.0, %v224_v29 }
 0x236   :  { %v233_v33 = vadd.f32 1.0, %v231_v30 }
 0x237   :  { %v230_v32 = vsub.f32 0.0, %v226_v31 }
 0x238   :  { %v235_v38 = vmul.f32 %v233_v33, %v183_v35 }
 0x239   :  { %v232_v34 = vsel %vm228_vm4, %v230_v32, %v226_v31 }
 0x23a   :  { %v234_v37 = vadd.f32 1.0, %v232_v34 }
 0x23c   :  { %v236_v39 = vmul.f32 %v234_v37, %v184_v36 }
 0x23e   :  { %v239_v40 = vpack.c.bf16 %v236_v39, %v235_v38 }
 0x240   :  { %480 = vmatmul.mubr.bf16.vlgmr.msra.gmra.mxu1 %v239_v40 }
 0x300   :  { %v338_v42 = vpop.f32.mrf.mxu1 }
 0x301   :  { %v345_v43 = vadd.f32 %v338_v42, %v237_v41 }
 0x302   :  { %v481_v44 = vpop.f32.mrf.mxu1 }
 0x303   :  { %347 = vst.msk [vmem:[#allocation2] sm:$0xff] %vm42_vm0, %v345_v43 }
 0x304   :  { %v341_v46 = vpop.f32.mrf.mxu1 }
 0x305   :  { %v346_v47 = vadd.f32 %v341_v46, %v238_v45 }
 0x306   :  { %v482_v48 = vpop.f32.mrf.mxu1 }
 0x307   :  { %348 = vst.msk [vmem:[#allocation2 + $0x8] sm:$0xff] %vm42_vm0, %v346_v47 }
 0x30a   :  { %v352_v50 = vld [vmem:[#allocation2] sm:$0xff] }
 0x30b   :  { %v356_v49 = vsel %vm42_vm0, %v352_v50, 0.0 }
 0x30c   :  { %357 = vadd.xlane.f32.xlu0 %v356_v49 }
 0x30e   :  { %v353_v51 = vld [vmem:[#allocation2 + $0x8] sm:$0xff] }
 0x30f   :  { %v359_v52 = vsel %vm42_vm0, %v353_v51, 0.0 }
 0x310   :  { %360 = vadd.xlane.f32.xlu1 %v359_v52 }
 0x395   :  { %v358_v53 = vpop.xlane.xlu0 %357 }
 0x396   :  { %v363_v54 = vmul.f32 0.03125, %v358_v53 }
 0x398   :  { %v365_v55 = vsub.f32 %v352_v50, %v363_v54 }
 0x399   :  { %v361_v56 = vpop.xlane.xlu1 %360 }
 0x39a   :  { %v364_v57 = vmul.f32 0.03125, %v361_v56  ;;  %v367_v58 = vmul.f32 %v365_v55, %v365_v55 }
 0x39c   :  { %v366_v59 = vsub.f32 %v353_v51, %v364_v57  ;;  %v369_v60 = vsel %vm42_vm0, %v367_v58, 0.0 }
 0x39d   :  { %370 = vadd.xlane.f32.xlu0 %v369_v60 }
 0x39e   :  { %v368_v61 = vmul.f32 %v366_v59, %v366_v59 }
 0x3a0   :  { %v372_v62 = vsel %vm42_vm0, %v368_v61, 0.0 }
 0x3a1   :  { %373 = vadd.xlane.f32.xlu1 %v372_v62 }
 0x426   :  { %v371_v63 = vpop.xlane.xlu0 %370 }
 0x427   :  { %v375_v0 = vmul.f32 0.03125, %v371_v63 }
 0x429   :  { %v377_v1 = vadd.f32 1e-05, %v375_v0 }
 0x42a   :  { %v374_v2 = vpop.xlane.xlu1 %373 }
 0x42b   :  { %511 = vrsqrt.f32 %v377_v1  ;;  %v376_v3 = vmul.f32 0.03125, %v374_v2 }
 0x42d   :  { %v378_v4 = vadd.f32 1e-05, %v376_v3 }
 0x42f   :  { %513 = vrsqrt.f32 %v378_v4 }
 0x438   :  { %v512_v5 = vpop.eup %511 }
 0x439   :  { %v381_v7 = vmul.f32 %v512_v5, %v365_v55 }
 0x43b   :  { %v389_v9 = vmul.f32 %v439_v6, %v381_v7 }
 0x43c   :  { %v514_v10 = vpop.eup %513 }
 0x43d   :  { %v382_v11 = vmul.f32 %v514_v10, %v366_v59  ;;  %v397_v12 = vadd.f32 %v440_v8, %v389_v9 }
 0x43f   :  { %v390_v13 = vmul.f32 %v439_v6, %v382_v11  ;;  %399 = vst.msk [vmem:[#allocation4] sm:$0xff] %vm42_vm0, %v397_v12 }
 0x441   :  { %v398_v14 = vadd.f32 %v440_v8, %v390_v13 }
 0x443   :  { %400 = vst.msk [vmem:[#allocation4 + $0x8] sm:$0xff] %vm42_vm0, %v398_v14 }
 0x444   :  { %526 = shalt.err (!%p523_p4)
}
 0x445   :  { %s540_s7 = smov 128   ;;  %s541_s8 = smov 8  }
 0x446   :  { %412 = dma.vmem_to_hbm [thread:$0]  %s407_s16, 256, %s673_s9, [#allocation5], %s540_s7, %s540_s7, %s541_s8  }
 0x447   :  { %535 = dma.done.wait [#allocation5], 256  }
 0x448   :  { %536 = vsyncadd [#allocation5], 4294967040 }
 0x449   :  { %416 = vsyncpa [#allocation5], 1 }

// kernel: base_transformer_cross_attn.8
= control target key start
LH: loop header
LB: loop body
LE: loop exit
PB: predicated region body
PF: predicated region fallthrough
CT: control target
= control target key end

     0   :  { %vm41_vm0 = vcmask 261120   ;;  %v448_v18 = vmov 0.0   ;;  %vm449_vm1 = vmmov 0   ;;  %vm93_vm2 = vcmask 257024   ;;  %s565_s0 = inlined_call_operand.vmem [shape: f32[16,32], index: 0, kind: input, shape index: {}]   ;;  %s566_s6 = inlined_call_operand.vmem [shape: f32[1,32], index: 6, kind: input, shape index: {}]   ;;  %s567_s7 = inlined_call_operand.vmem [shape: f32[1,32], index: 7, kind: input, shape index: {}]   ;;  %s568_s8 = inlined_call_operand.vmem [shape: f32[1,32], index: 8, kind: input, shape index: {}]   ;;  %s569_s3 = inlined_call_operand.vmem [shape: bf16[32,128], index: 3, kind: input, shape index: {}]   ;;  %s570_s1 = inlined_call_operand.vmem [shape: f32[1,32], index: 1, kind: input, shape index: {}]   ;;  %s571_s2 = inlined_call_operand.vmem [shape: f32[1,32], index: 2, kind: input, shape index: {}]   ;;  %s572_s5 = inlined_call_operand.vmem [shape: bf16[128,32], index: 5, kind: input, shape index: {}]   ;;  %s573_s4 = inlined_call_operand.vmem [shape: f32[1,128], index: 4, kind: input, shape index: {}]   ;;  %s574_s9 = inlined_call_operand.vmem [shape: f32[16,32], index: 9, kind: output, shape index: {}]  }
   0x1   :  { %v37_v0 = vld [vmem:[%s565_s0] sm:$0xff]  ;;  %v38_v2 = vld [vmem:[%s565_s0 + $0x8] sm:$0xff]  ;;  %395 = vmatprep.subr.bf16.mxu0 %v448_v18  ;;  %403 = vmatprep.subr.bf16.mxu1 %v448_v18  ;;  %v428_v39 = vld [vmem:[%s572_s5 + $0x38] sm:$0xff]  }
   0x2   :  { %v363_v1 = vld [vmem:[%s566_s6] ss:$0 sm:$0xff]  ;;  %v42_v3 = vsel %vm41_vm0, %v37_v0, 0.0  ;;  %v45_v6 = vsel %vm41_vm0, %v38_v2, 0.0  ;;  %v425_v17 = vld [vmem:[%s569_s3 + $0x8] sm:$0xff]   ;;  %399 = vmatprep.mubr.msk.bf16.mxu0 %vm449_vm1, %v448_v18  ;;  %419 = vmatprep.mubr.msk.bf16.mxu1 %vm449_vm1, %v448_v18  ;;  %v429_v40 = vld [vmem:[%s572_s5 + $0x30] sm:$0xff]  }
   0x3   :  { %v103_v4 = vadd.f32 %v363_v1, %v37_v0  ;;  %v104_v5 = vadd.f32 %v363_v1, %v38_v2  ;;  %43 = vadd.xlane.f32.xlu0 %v42_v3  ;;  %396 = vmatpush3.bf16.msra.mxu0 %v425_v17  ;;  %v426_v19 = vld [vmem:[%s569_s3] sm:$0xff]   ;;  %v430_v41 = vld [vmem:[%s572_s5 + $0x28] sm:$0xff]   ;;  %v432_v43 = vld [vmem:[%s572_s5 + $0x18] sm:$0xff]  }
   0x4   :  { %397 = vmatprep.subr.bf16.mxu0 %v448_v18  ;;  %v359_v27 = vld [vmem:[%s570_s1] ss:$0 sm:$0xff]  ;;  %404 = vmatpush3.bf16.msra.mxu1 %v428_v39  ;;  %v433_v44 = vld [vmem:[%s572_s5 + $0x10] sm:$0xff]   ;;  %v434_v45 = vld [vmem:[%s572_s5 + $0x8] sm:$0xff]  }
   0x5   :  { %105 = vst.msk [vmem:[#allocation2] sm:$0xff] %vm41_vm0, %v103_v4  ;;  %106 = vst.msk [vmem:[#allocation2 + $0x8] sm:$0xff] %vm41_vm0, %v104_v5  ;;  %v360_v29 = vld [vmem:[%s571_s2] ss:$0 sm:$0xff]  ;;  %405 = vmatprep.subr.bf16.mxu1 %v448_v18 }
   0x6   :  { %v431_v42 = vld [vmem:[%s572_s5 + $0x20] sm:$0xff]  }
   0x7   :  { %46 = vadd.xlane.f32.xlu0 %v45_v6  ;;  %398 = vmatpush3.bf16.msra.mxu0 %v426_v19  ;;  %v435_v46 = vld [vmem:[%s572_s5] sm:$0xff]  }
   0x8   :  { %406 = vmatpush3.bf16.msra.mxu1 %v429_v40  ;;  %v364_v47 = vld [vmem:[%s573_s4] ss:$0 sm:$0xff] }
   0x9   :  { %407 = vmatprep.subr.bf16.mxu1 %v448_v18 }
   0xc   :  { %408 = vmatpush3.bf16.msra.mxu1 %v430_v41  ;;  %v236_v41 = vld [vmem:[#allocation2] sm:$0xff] }
   0xd   :  { %409 = vmatprep.subr.bf16.mxu1 %v448_v18 }
  0x10   :  { %410 = vmatpush3.bf16.msra.mxu1 %v431_v42 }
  0x11   :  { %411 = vmatprep.subr.bf16.mxu1 %v448_v18 }
  0x14   :  { %412 = vmatpush3.bf16.msra.mxu1 %v432_v43 }
  0x15   :  { %413 = vmatprep.subr.bf16.mxu1 %v448_v18 }
  0x18   :  { %414 = vmatpush3.bf16.msra.mxu1 %v433_v44 }
  0x19   :  { %415 = vmatprep.subr.bf16.mxu1 %v448_v18 }
  0x1c   :  { %416 = vmatpush3.bf16.msra.mxu1 %v434_v45  ;;  %v237_v45 = vld [vmem:[#allocation2 + $0x8] sm:$0xff] }
  0x1d   :  { %417 = vmatprep.subr.bf16.mxu1 %v448_v18 }
  0x20   :  { %418 = vmatpush3.bf16.msra.mxu1 %v435_v46 }
  0x8c   :  { %v44_v7 = vpop.xlane.xlu0 %43 }
  0x8d   :  { %v49_v8 = vmul.f32 0.03125, %v44_v7 }
  0x8f   :  { %v51_v9 = vsub.f32 %v37_v0, %v49_v8 }
  0x90   :  { %v47_v10 = vpop.xlane.xlu0 %46 }
  0x91   :  { %v50_v11 = vmul.f32 0.03125, %v47_v10  ;;  %v53_v12 = vmul.f32 %v51_v9, %v51_v9 }
  0x93   :  { %v52_v13 = vsub.f32 %v38_v2, %v50_v11  ;;  %v55_v14 = vsel %vm41_vm0, %v53_v12, 0.0 }
  0x94   :  { %56 = vadd.xlane.f32.xlu1 %v55_v14 }
  0x95   :  { %v54_v15 = vmul.f32 %v52_v13, %v52_v13 }
  0x97   :  { %v58_v16 = vsel %vm41_vm0, %v54_v15, 0.0 }
  0x98   :  { %59 = vadd.xlane.f32.xlu1 %v58_v16 }
 0x11d   :  { %v57_v20 = vpop.xlane.xlu1 %56 }
 0x11e   :  { %v61_v21 = vmul.f32 0.03125, %v57_v20 }
 0x120   :  { %v63_v22 = vadd.f32 1e-05, %v61_v21 }
 0x121   :  { %v60_v23 = vpop.xlane.xlu1 %59 }
 0x122   :  { %436 = vrsqrt.f32 %v63_v22  ;;  %v62_v24 = vmul.f32 0.03125, %v60_v23 }
 0x124   :  { %v64_v25 = vadd.f32 1e-05, %v62_v24 }
 0x126   :  { %438 = vrsqrt.f32 %v64_v25 }
 0x12f   :  { %v437_v26 = vpop.eup %436 }
 0x130   :  { %v67_v28 = vmul.f32 %v437_v26, %v51_v9 }
 0x132   :  { %v75_v30 = vmul.f32 %v359_v27, %v67_v28 }
 0x133   :  { %v439_v31 = vpop.eup %438 }
 0x134   :  { %v83_v32 = vadd.f32 %v360_v29, %v75_v30  ;;  %v68_v33 = vmul.f32 %v439_v31, %v52_v13 }
 0x136   :  { %v381_v34 = vpack.c.bf16 %v83_v32, %v83_v32  ;;  %v76_v35 = vmul.f32 %v359_v27, %v68_v33 }
 0x138   :  { %94 = vst.msk [vmem:[#allocation3] sm:$0xf] %vm93_vm2, %v381_v34  ;;  %v84_v36 = vadd.f32 %v360_v29, %v76_v35 }
 0x13a   :  { %v382_v37 = vpack.c.bf16 %v84_v36, %v84_v36 }
 0x13c   :  { %95 = vst.msk [vmem:[#allocation3 + $0x4] sm:$0xf] %vm93_vm2, %v382_v37 }
 0x143   :  { %v427_v38 = vld [vmem:[#allocation3] sm:$0xff]  }
 0x144   :  { %400 = vmatmul.mubr.msk.bf16.vlgmr.msra.gmra.mxu0 %vm41_vm0, %v427_v38 }
 0x204   :  { %v175_v48 = vpop.f32.mrf.mxu0 }
 0x205   :  { %v176_v49 = vadd.f32 %v364_v47, %v175_v48 }
 0x206   :  { %v401_v50 = vpop.f32.mrf.mxu0 }
 0x207   :  { %v184_v51 = vmul.f32 0.70710677, %v176_v49  ;;  %v182_v35 = vmul.f32 0.5, %v176_v49 }
 0x208   :  { %v178_v52 = vpop.f32.mrf.mxu0 }
 0x209   :  { %v186_v53 = vand.u32 2147483647, %v184_v51  ;;  %v179_v54 = vadd.f32 %v364_v47, %v178_v52  ;;  %vm226_vm3 = vcmp.lt.f32.partialorder %v184_v51, 0.0 }
 0x20a   :  { %v402_v55 = vpop.f32.mrf.mxu0 }
 0x20b   :  { %v188_v56 = vmul.f32 0.3275911, %v186_v53  ;;  %v185_v57 = vmul.f32 0.70710677, %v179_v54  ;;  %v214_v62 = vsub.f32 0.0, %v186_v53  ;;  %v183_v36 = vmul.f32 0.5, %v179_v54 }
 0x20d   :  { %v190_v58 = vadd.f32 1.0, %v188_v56  ;;  %v187_v59 = vand.u32 2147483647, %v185_v57  ;;  %v216_v63 = vmul.f32 %v214_v62, %v186_v53  ;;  %vm227_vm4 = vcmp.lt.f32.partialorder %v185_v57, 0.0 }
 0x20f   :  { %440 = vrcp.f32 %v190_v58  ;;  %v189_v60 = vmul.f32 0.3275911, %v187_v59  ;;  %v215_v0 = vsub.f32 0.0, %v187_v59  ;;  %v218_v3 = vmul.f32 1.442695, %v216_v63 }
 0x211   :  { %v191_v61 = vadd.f32 1.0, %v189_v60  ;;  %v217_v4 = vmul.f32 %v215_v0, %v187_v59 }
 0x213   :  { %442 = vrcp.f32 %v191_v61  ;;  %v220_v9 = vmul.f32 1.442695, %v217_v4 }
 0x214   :  { %444 = vpow2.f32 %v218_v3 }
 0x215   :  { %446 = vpow2.f32 %v220_v9 }
 0x21c   :  { %v441_v1 = vpop.eup %440 }
 0x21d   :  { %v196_v2 = vmul.f32 1.0614054, %v441_v1 }
 0x21f   :  { %v369_v5 = vadd.f32 -1.4531521, %v196_v2 }
 0x220   :  { %v443_v6 = vpop.eup %442 }
 0x221   :  { %v200_v7 = vmul.f32 %v441_v1, %v369_v5  ;;  %v197_v8 = vmul.f32 1.0614054, %v443_v6  ;;  %v445_v22 = vpop.eup %444 }
 0x222   :  { %v447_v27 = vpop.eup %446 }
 0x223   :  { %v202_v10 = vadd.f32 1.4214138, %v200_v7  ;;  %v370_v11 = vadd.f32 -1.4531521, %v197_v8 }
 0x225   :  { %v204_v12 = vmul.f32 %v441_v1, %v202_v10  ;;  %v201_v13 = vmul.f32 %v443_v6, %v370_v11 }
 0x227   :  { %v371_v14 = vadd.f32 -0.28449672, %v204_v12  ;;  %v203_v15 = vadd.f32 1.4214138, %v201_v13 }
 0x229   :  { %v208_v16 = vmul.f32 %v441_v1, %v371_v14  ;;  %v205_v17 = vmul.f32 %v443_v6, %v203_v15 }
 0x22b   :  { %v210_v18 = vadd.f32 0.2548296, %v208_v16  ;;  %v372_v19 = vadd.f32 -0.28449672, %v205_v17 }
 0x22d   :  { %v212_v20 = vmul.f32 %v441_v1, %v210_v18  ;;  %v209_v21 = vmul.f32 %v443_v6, %v372_v19 }
 0x22f   :  { %v222_v23 = vmul.f32 %v445_v22, %v212_v20  ;;  %v211_v24 = vadd.f32 0.2548296, %v209_v21 }
 0x231   :  { %v224_v25 = vsub.f32 1.0, %v222_v23  ;;  %v213_v26 = vmul.f32 %v443_v6, %v211_v24 }
 0x233   :  { %v228_v28 = vsub.f32 0.0, %v224_v25  ;;  %v223_v29 = vmul.f32 %v447_v27, %v213_v26 }
 0x235   :  { %v230_v30 = vsel %vm226_vm3, %v228_v28, %v224_v25  ;;  %v225_v31 = vsub.f32 1.0, %v223_v29 }
 0x236   :  { %v232_v33 = vadd.f32 1.0, %v230_v30 }
 0x237   :  { %v229_v32 = vsub.f32 0.0, %v225_v31 }
 0x238   :  { %v234_v38 = vmul.f32 %v232_v33, %v182_v35 }
 0x239   :  { %v231_v34 = vsel %vm227_vm4, %v229_v32, %v225_v31 }
 0x23a   :  { %v233_v37 = vadd.f32 1.0, %v231_v34 }
 0x23c   :  { %v235_v39 = vmul.f32 %v233_v37, %v183_v36 }
 0x23e   :  { %v238_v40 = vpack.c.bf16 %v235_v39, %v234_v38 }
 0x240   :  { %420 = vmatmul.mubr.bf16.vlgmr.msra.gmra.mxu1 %v238_v40 }
 0x300   :  { %v337_v42 = vpop.f32.mrf.mxu1 }
 0x301   :  { %v344_v43 = vadd.f32 %v337_v42, %v236_v41 }
 0x302   :  { %v421_v44 = vpop.f32.mrf.mxu1 }
 0x303   :  { %346 = vst.msk [vmem:[#allocation2] sm:$0xff] %vm41_vm0, %v344_v43 }
 0x304   :  { %v340_v46 = vpop.f32.mrf.mxu1 }
 0x305   :  { %v345_v47 = vadd.f32 %v340_v46, %v237_v45 }
 0x306   :  { %v422_v48 = vpop.f32.mrf.mxu1 }
 0x307   :  { %347 = vst.msk [vmem:[#allocation2 + $0x8] sm:$0xff] %vm41_vm0, %v345_v47 }
 0x30a   :  { %v351_v50 = vld [vmem:[#allocation2] sm:$0xff] }
 0x30b   :  { %353 = vst.msk [vmem:[%s574_s9] sm:$0xff] %vm41_vm0, %v351_v50 }
 0x30e   :  { %v352_v49 = vld [vmem:[#allocation2 + $0x8] sm:$0xff] }
 0x30f   :  { %354 = vst.msk [vmem:[%s574_s9 + $0x8] sm:$0xff] %vm41_vm0, %v352_v49 }

// kernel: base_transformer_cross_attn.6
= control target key start
LH: loop header
LB: loop body
LE: loop exit
PB: predicated region body
PF: predicated region fallthrough
CT: control target
= control target key end

     0   :  { %15 = vsyncpa [#allocation5], 0  ;;  %s2703_s0 = inlined_call_operand.vmem [shape: f32[2,8,32], index: 0, kind: input, shape index: {}, may-alias: {0,1}]   ;;  %s2704_s1 = inlined_call_operand.vmem [shape: f32[2,8,32], index: 1, kind: input, shape index: {}, may-alias: {0,1}]   ;;  %s2705_s2 = inlined_call_operand.hbm [shape: f32[1,32], index: 2, kind: input, shape index: {}]   ;;  %s2706_s3 = inlined_call_operand.hbm [shape: f32[1,32], index: 3, kind: input, shape index: {}]   ;;  %s2707_s4 = inlined_call_operand.vmem [shape: bf16[32,32], index: 4, kind: input, shape index: {}]   ;;  %s2708_s5 = inlined_call_operand.vmem [shape: bf16[32,32], index: 5, kind: input, shape index: {}]   ;;  %s2709_s6 = inlined_call_operand.vmem [shape: bf16[32,32], index: 6, kind: input, shape index: {}]   ;;  %s2710_s7 = inlined_call_operand.vmem [shape: bf16[4,8,8], index: 7, kind: input, shape index: {}]   ;;  %s2711_s8 = inlined_call_operand.vmem [shape: bf16[32,32], index: 8, kind: input, shape index: {}]   ;;  %s2712_s9 = inlined_call_operand.hbm [shape: f32[1,32], index: 9, kind: input, shape index: {}]   ;;  %s2713_s10 = inlined_call_operand.vmem [shape: f32[2,8,32], index: 10, kind: output, shape index: {}]  }
   0x1   :  { %16 = vsyncpa [#allocation7], 0  ;;  %s2393_s13 = smov 0   ;;  %s2395_s14 = smov 0  }
   0x2   :  { %s2397_s15 = smov 0  }
   0x3 LB: > { %s2324_s16 = smov [#allocation6]   ;;  %s1957_s18 = sadd.s32 4294967295, %s2322_s15   ;;  %s2322_s15 = sphi %s2397_s15, %s22_s15   ;;  %s2318_s14 = sphi %s2395_s14, %s2719_s14   ;;  %s2314_s13 = sphi %s2393_s13, %s2718_s13  }
   0x4   : > { %s318_s17 = sshll.u32 %s2324_s16, 4  ;;  %p1959_p0 = scmp.ge.s32.totalorder %s2322_s15, 1  ;;  %s319_s17 = int_to_ptr.vmem [resolvable:$true] %s318_s17 }
   0x5   : > { %p294_p1 = scmp.lt.s32.totalorder %s2322_s15, 3  ;;  %p2411_p2 = scmp.eq.s32.totalorder %s1957_s18, 0 }
   0x6   : > { %s34_s21 = sadd.s32 1, %s2318_s14  ;;  %s2325_s24 = smov [#allocation4]  }
   0x7   : > { %p2415_p3 = pnand %p1959_p0, %p294_p1  ;;  %p2428_p6 = scmp.ge.s32.totalorder %s34_s21, 2 }
   0x8   : > { %s307_s25 = sshll.u32 %s2325_s24, 4  ;;  %s2225_s26 = scalar_lea.vmem %s319_s17, 16  ;;  %s308_s25 = int_to_ptr.vmem [resolvable:$true] %s307_s25 }
   0x9   : > { %p2132_p4 = pneg %p2415_p3  ;;  %p2226_p8 = scmp.ne.s32.totalorder %s319_s17, %s2225_s26 }
   0xa   : > { %s2232_s27 = scalar_lea.vmem %s319_s17, 32  ;;  %p2233_p11 = scmp.lt.s32.totalorder %s319_s17, %s319_s17 }
   0xb   : > { %p2424_p5 = pnand %p2411_p2, %p2132_p4  ;;  %p2234_p12 = scmp.lt.s32.totalorder %s2232_s27, %s2225_s26 }
   0xd   : > { %p2216_p7 = pneg %p2424_p5  ;;  %p2235_p13 = por %p2234_p12, %p2233_p11 }
   0xf   : > { %p2228_p9 = pnand %p2226_p8, %p2216_p7 }
  0x11   : > { %p2229_p10 = pneg %p2228_p9 }
  0x13   : > { %p2236_p0 = pnand %p2235_p13, %p2229_p10 }
  0x15   : > { %2239 = shalt.err (!%p2236_p0)
}
  0x16   : > { %2138 = dma.hbm_to_vmem [thread:$0]  (!%p2424_p5), %s2706_s3, 16, %s319_s17, [#allocation7]  }
  0x17   : > { %s2721_s21 = smov (%p2428_p6, %s34_s21), 0  ;;  %s2251_s30 = scalar_lea.vmem %s308_s25, 16 }
  0x18   : > { %p2252_p1 = scmp.ne.s32.totalorder %s308_s25, %s2251_s30  ;;  %s2258_s11 = scalar_lea.vmem %s308_s25, 32 }
  0x19   : > { %p2259_p9 = scmp.lt.s32.totalorder %s308_s25, %s308_s25  ;;  %p2260_p10 = scmp.lt.s32.totalorder %s2258_s11, %s2251_s30 }
  0x1a   : > { %p2254_p4 = pnand %p2252_p1, %p2216_p7 }
  0x1b   : > { %p2261_p11 = por %p2260_p10, %p2259_p9 }
  0x1c   : > { %p2255_p8 = pneg %p2254_p4 }
  0x1e   : > { %p2262_p12 = pnand %p2261_p11, %p2255_p8 }
  0x20   : > { %2265 = shalt.err (!%p2262_p12)
}
  0x21   : > { %2135 = dma.hbm_to_vmem [thread:$0]  (!%p2424_p5), %s2705_s2, 16, %s308_s25, [#allocation5]  }
  0x22   : > { %s2326_s17 = smov [#allocation8]  }
  0x23   : > { %s348_s18 = sshll.u32 %s2326_s17, 4  ;;  %s349_s18 = int_to_ptr.vmem [resolvable:$true] %s348_s18 }
  0x24   : > { %s2277_s23 = scalar_lea.vmem %s349_s18, 16  ;;  %s2284_s24 = scalar_lea.vmem %s349_s18, 32 }
  0x25   : > { %p2278_p6 = scmp.ne.s32.totalorder %s349_s18, %s2277_s23  ;;  %p2285_p1 = scmp.lt.s32.totalorder %s349_s18, %s349_s18 }
  0x26   : > { %p2286_p4 = scmp.lt.s32.totalorder %s2284_s24, %s2277_s23 }
  0x27   : > { %p2280_p13 = pnand %p2278_p6, %p2216_p7 }
  0x28   : > { %p2287_p8 = por %p2286_p4, %p2285_p1 }
  0x29   : > { %p2281_p0 = pneg %p2280_p13 }
  0x2b   : > { %p2288_p9 = pnand %p2287_p8, %p2281_p0 }
  0x2d   : > { %2291 = shalt.err (!%p2288_p9)
}
  0x2e   : > { %2141 = dma.hbm_to_vmem [thread:$0]  (!%p2424_p5), %s2712_s9, 16, %s349_s18, [#allocation7]  }
  0x2f   : > { %378 = sbr.rel (%p2415_p3) target bundleno = 1821 (0x71d), region = 60 }
  0x34   : > { %2305 = dma.done.wait (%p2411_p2), [#allocation5], 16  }
  0x35   : > { %2307 = vsyncadd (%p2411_p2), [#allocation5], 4294967280 }
  0x36   : > { %2309 = dma.done.wait (%p2411_p2), [#allocation7], 32  }
  0x37   : > { %2311 = vsyncadd (%p2411_p2), [#allocation7], 4294967264  ;;  %p436_p7 = scmp.lt.s32.totalorder %s2314_s13, 1  ;;  %vm466_vm0 = vcmask 261120   ;;  %v2186_v14 = vld [vmem:[%s2708_s5 + $0x8] sm:$0xff]   ;;  %v2327_v16 = vmov 0.0   ;;  %v482_v55 = vlaneseq }
  0x38   : > { %v2187_v15 = vld [vmem:[%s2709_s6 + $0x8] sm:$0xff]   ;;  %2040 = vmatprep.subr.bf16.mxu0 %v2327_v16  ;;  %2048 = vmatprep.subr.bf16.mxu1 %v2327_v16  ;;  %v2188_v17 = vld [vmem:[%s2708_s5] sm:$0xff]   ;;  %vm2328_vm1 = vmmov 0   ;;  %vm556_vm2 = vcmask 257024   ;;  %s2330_s29 = smov 120   ;;  %s2331_s30 = smov 104  }
  0x39   : > { %s2723_s13 = smov (!%p436_p7, %s2314_s13), 1  ;;  %2041 = vmatpush3.bf16.msra.mxu0 %v2186_v14  ;;  %2049 = vmatpush3.bf16.msra.mxu1 %v2187_v15  ;;  %v2189_v18 = vld [vmem:[%s2709_s6] sm:$0xff]   ;;  %v2010_v26 = vld [vmem:[#allocation4] ss:$0 sm:$0xff]  ;;  %v2011_v28 = vld [vmem:[#allocation6] ss:$0 sm:$0xff] }
  0x3a   : > { %s2474_s22 = sshll.u32 %s2723_s13, 3  ;;  %2042 = vmatprep.subr.bf16.mxu0 %v2327_v16  ;;  %2050 = vmatprep.subr.bf16.mxu1 %v2327_v16  ;;  %v2190_v33 = vld [vmem:[%s2707_s4 + $0x8] sm:$0xff]   ;;  %v2191_v36 = vld [vmem:[%s2707_s4] sm:$0xff]   ;;  %v2332_v56 = vmov 1983009808   ;;  %v483_v58 = vshrl.u32 %v482_v55, 7 }
  0x3b   : > { %s446_s28 = scalar_lea.vmem %s2704_s1, %s2474_s22  ;;  %s442_s11 = scalar_lea.vmem %s2703_s0, %s2474_s22  ;;  %2044 = vmatprep.mubr.msk.bf16.mxu0 %vm2328_vm1, %v2327_v16  ;;  %2052 = vmatprep.mubr.msk.bf16.mxu1 %vm2328_vm1, %v2327_v16  ;;  %v715_v57 = vunpack.c.l.s4 %v2332_v56  ;;  %v2333_v60 = vmov 1934713408   ;;  %vm1183_vm3 = vcmask 64512   ;;  %vm1419_vm4 = vcmask 1043456  }
  0x3c   : > { %v465_v0 = vld [vmem:[%s446_s28] sm:$0xff]  ;;  %s2329_s28 = smov 112   ;;  %v732_v61 = vunpack.c.l.s4 %v2333_v60  ;;  %s2335_s24 = smov 16   ;;  %vm1750_vm5 = vcmask 130048   ;;  %vm1752_vm6 = vcmask 195584  }
  0x3d   : > { %v2484_v1 = vld [vmem:[%s442_s11] sm:$0xff]  ;;  %v467_v2 = vsel %vm466_vm0, %v465_v0, 0.0  ;;  %2043 = vmatpush3.bf16.msra.mxu0 %v2188_v17  ;;  %2051 = vmatpush3.bf16.msra.mxu1 %v2189_v18  ;;  %v716_v59 = vunpack.c.0.s8 %v715_v57  ;;  %s2336_s26 = smov 8   ;;  %s2337_s27 = smov 24  }
  0x3e   : > { %v618_v3 = vsel %vm466_vm0, %v2484_v1, 0.0  ;;  %468 = vadd.xlane.f32.xlu0 %v467_v2  ;;  %2056 = vmatprep.subr.bf16.mxu0 %v2327_v16 }
  0x3f   : > { %2064 = vmatprep.subr.bf16.mxu1 %v2327_v16  ;;  %v2537_v63 = vsub.s32 %v716_v59, %v483_v58 }
  0x42   : > { %619 = vadd.xlane.f32.xlu0 %v618_v3  ;;  %v733_v3 = vunpack.c.0.s8 %v732_v61 }
  0x44   : > { %v2541_v14 = vsub.s32 %v733_v3, %v483_v58 }
  0xc7   : > { %v469_v4 = vpop.xlane.xlu0 %468 }
  0xc8   : > { %v471_v5 = vmul.f32 0.03125, %v469_v4 }
  0xca   : > { %v472_v6 = vsub.f32 %v465_v0, %v471_v5 }
  0xcb   : > { %v620_v7 = vpop.xlane.xlu0 %619 }
  0xcc   : > { %v622_v8 = vmul.f32 0.03125, %v620_v7  ;;  %v473_v9 = vmul.f32 %v472_v6, %v472_v6 }
  0xce   : > { %v623_v10 = vsub.f32 %v2484_v1, %v622_v8  ;;  %v474_v11 = vsel %vm466_vm0, %v473_v9, 0.0 }
  0xcf   : > { %475 = vadd.xlane.f32.xlu1 %v474_v11 }
  0xd0   : > { %v624_v12 = vmul.f32 %v623_v10, %v623_v10 }
  0xd2   : > { %v625_v13 = vsel %vm466_vm0, %v624_v12, 0.0 }
  0xd3   : > { %626 = vadd.xlane.f32.xlu1 %v625_v13 }
 0x158   : > { %v476_v19 = vpop.xlane.xlu1 %475 }
 0x159   : > { %v477_v20 = vmul.f32 0.03125, %v476_v19 }
 0x15b   : > { %v478_v21 = vadd.f32 1e-05, %v477_v20 }
 0x15c   : > { %v627_v22 = vpop.xlane.xlu1 %626 }
 0x15d   : > { %2194 = vrsqrt.f32 %v478_v21  ;;  %v628_v23 = vmul.f32 0.03125, %v627_v22 }
 0x15f   : > { %v629_v24 = vadd.f32 1e-05, %v628_v23 }
 0x161   : > { %2196 = vrsqrt.f32 %v629_v24 }
 0x16a   : > { %v2195_v25 = vpop.eup %2194 }
 0x16b   : > { %v480_v27 = vmul.f32 %v2195_v25, %v472_v6 }
 0x16d   : > { %v487_v29 = vmul.f32 %v2010_v26, %v480_v27 }
 0x16e   : > { %v2197_v30 = vpop.eup %2196 }
 0x16f   : > { %v494_v31 = vadd.f32 %v2011_v28, %v487_v29  ;;  %v631_v32 = vmul.f32 %v2197_v30, %v623_v10 }
 0x171   : > { %v495_v34 = vpack.c.bf16 %v494_v31, %v494_v31  ;;  %v638_v35 = vmul.f32 %v2010_v26, %v631_v32 }
 0x173   : > { %2045 = vmatmul.mubr.msk.bf16.vlgmr.msra.gmra.mxu0 %vm466_vm0, %v495_v34  ;;  %2053 = vmatmul.mubr.msk.bf16.vlgmr.msra.gmra.mxu1 %vm466_vm0, %v495_v34  ;;  %v645_v37 = vadd.f32 %v2011_v28, %v638_v35 }
 0x174   : > { %2057 = vmatpush3.bf16.msra.mxu0 %v2190_v33  ;;  %2060 = vmatprep.mubr.msk.bf16.mxu0 %vm2328_vm1, %v2327_v16 }
 0x175   : > { %2058 = vmatprep.subr.bf16.mxu0 %v2327_v16  ;;  %2066 = vmatprep.mubr.msk.bf16.mxu1 %vm2328_vm1, %v2327_v16  ;;  %v646_v38 = vpack.c.bf16 %v645_v37, %v645_v37  ;;  %v2334_v37 = vmov 0  }
 0x178   : > { %2059 = vmatpush3.bf16.msra.mxu0 %v2191_v36 }
 0x179   : > { %2070 = vmatprep.subr.bf16.mxu0 %v2327_v16 }
 0x17b   : > { %2061 = vmatmul.mubr.msk.bf16.vlgmr.msra.gmra.mxu0 %vm466_vm0, %v646_v38 }
 0x17c   : > { %2072 = vmatprep.mubr.msk.bf16.mxu0 %vm2328_vm1, %v2327_v16 }
 0x233   : > { %v549_v39 = vpop.f32.mrf.mxu0  ;;  %v608_v40 = vpop.f32.mrf.mxu1 }
 0x234   : > { %v555_v41 = vpack.c.bf16 %v549_v39, %v549_v39  ;;  %v614_v42 = vpack.c.bf16 %v608_v40, %v608_v40 }
 0x235   : > { %v2046_v43 = vpop.f32.mrf.mxu0  ;;  %v2054_v44 = vpop.f32.mrf.mxu1 }
 0x236   : > { %557 = vst.msk [vmem:[#allocation2] sm:$0xf] %vm556_vm2, %v555_v41  ;;  %615 = vst.msk [vmem:[#allocation3] sm:$0xf] %vm556_vm2, %v614_v42 }
 0x237   : > { %v552_v45 = vpop.f32.mrf.mxu0  ;;  %v611_v46 = vpop.f32.mrf.mxu1 }
 0x239   : > { %v2047_v47 = vpop.f32.mrf.mxu0  ;;  %v2055_v48 = vpop.f32.mrf.mxu1 }
 0x23b   : > { %v700_v49 = vpop.f32.mrf.mxu0 }
 0x23c   : > { %v706_v53 = vpack.c.bf16 %v700_v49, %v700_v49 }
 0x23d   : > { %v2062_v50 = vpop.f32.mrf.mxu0  ;;  %v875_v51 = vld [vmem:[#allocation2] sm:$0xf] }
 0x23e   : > { %879 = vrot.lane.b32.xlu1 %v875_v51, %s2329_s28  ;;  %877 = vrot.lane.b32.xlu0 %v875_v51, %s2330_s29  ;;  %v886_v5 = vshrl.u32 %v875_v51, 16  ;;  %v720_v9 = vrot.slane %v706_v53, %v2537_v63 }
 0x23f   : > { %v703_v52 = vpop.f32.mrf.mxu0 }
 0x241   : > { %v2063_v54 = vpop.f32.mrf.mxu0 }
 0x242   : > { %881 = vrot.lane.b32.xlu1 %v875_v51, %s2331_s30  ;;  %710 = vrot.lane.b32.xlu0 %v706_v53, %s2329_s28 }
 0x246   : > { %708 = vrot.lane.b32.xlu1 %v706_v53, %s2330_s29 }
 0x24a   : > { %712 = vrot.lane.b32.xlu1 %v706_v53, %s2331_s30 }
 0x2b0   : > { %v880_v62 = vpop.permute.xlu1 %879  ;;  %v878_v0 = vpop.permute.xlu0 %877 }
 0x2b1   : > { %v887_v2 = vshrl.u32 %v878_v0, 16  ;;  %v885_v4 = vpack.i.b16 %v878_v0, %v875_v51  ;;  %v892_v6 = vshrl.u32 %v880_v62, 16 }
 0x2b3   : > { %v888_v10 = vpack.i.b16 %v887_v2, %v886_v5  ;;  %v902_v15 = vrot.slane %v885_v4, %v2537_v63 }
 0x2b4   : > { %v882_v7 = vpop.permute.xlu1 %881  ;;  %v711_v8 = vpop.permute.xlu0 %710 }
 0x2b5   : > { %v891_v11 = vpack.i.b16 %v882_v7, %v880_v62  ;;  %v893_v12 = vshrl.u32 %v882_v7, 16  ;;  %v728_v13 = vrot.slane %v711_v8, %v2537_v63  ;;  %v936_v22 = vrot.slane %v888_v10, %v2537_v63 }
 0x2b7   : > { %v894_v17 = vpack.i.b16 %v893_v12, %v892_v6  ;;  %v910_v18 = vrot.slane %v891_v11, %v2537_v63  ;;  %v729_v19 = vcombine.low %v720_v9, %v728_v13  ;;  %v730_v20 = vcombine.high %v720_v9, %v728_v13 }
 0x2b8   : > { %v709_v21 = vpop.permute.xlu1 %708 }
 0x2b9   : > { %v911_v23 = vcombine.low %v902_v15, %v910_v18  ;;  %v912_v24 = vcombine.high %v902_v15, %v910_v18  ;;  %v944_v25 = vrot.slane %v894_v17, %v2537_v63  ;;  %v737_v26 = vrot.slane %v729_v19, %v2541_v14 }
 0x2ba   : > { %v744_v31 = vrot.slane %v730_v20, %v2541_v14  ;;  %v754_v39 = vrot.slane %v709_v21, %v2537_v63 }
 0x2bb   : > { %v919_v27 = vrot.slane %v911_v23, %v2541_v14  ;;  %v926_v28 = vrot.slane %v912_v24, %v2541_v14  ;;  %v945_v29 = vcombine.low %v936_v22, %v944_v25  ;;  %v946_v30 = vcombine.high %v936_v22, %v944_v25 }
 0x2bc   : > { %v713_v32 = vpop.permute.xlu1 %712  ;;  %v745_v38 = vcombine.high %v737_v26, %v2334_v37  ;;  %v746_v49 = vcombine.high %v744_v31, %v2334_v37  ;;  %v785_v51 = vshrl.u32 %v737_v26, 16  ;;  %v801_v55 = vshrl.u32 %v744_v31, 16 }
 0x2bd   : > { %v953_v33 = vrot.slane %v945_v29, %v2541_v14  ;;  %v960_v34 = vrot.slane %v946_v30, %v2541_v14  ;;  %v963_v35 = vcombine.low %v919_v27, %v926_v28  ;;  %v1981_v36 = vcombine.high %v919_v27, %v926_v28 }
 0x2be   : > { %v762_v40 = vrot.slane %v713_v32, %v2537_v63  ;;  %v793_v54 = vshrl.u32 %v745_v38, 16  ;;  %v809_v62 = vshrl.u32 %v746_v49, 16 }
 0x2bf   : > { %v970_v41 = vrot.slane %v963_v35, %v2537_v63  ;;  %v978_v42 = vrot.slane %v1981_v36, %v2537_v63  ;;  %v988_v43 = vcombine.low %v953_v33, %v960_v34  ;;  %v1982_v44 = vcombine.high %v953_v33, %v960_v34 }
 0x2c0   : > { %v763_v45 = vcombine.low %v754_v39, %v762_v40  ;;  %v764_v46 = vcombine.high %v754_v39, %v762_v40 }
 0x2c1   : > { %v995_v47 = vrot.slane %v988_v43, %v2537_v63  ;;  %v1003_v48 = vrot.slane %v1982_v44, %v2537_v63  ;;  %v979_v50 = vcombine.low %v970_v41, %v978_v42 }
 0x2c2   : > { %v771_v52 = vrot.slane %v763_v45, %v2541_v14  ;;  %v778_v53 = vrot.slane %v764_v46, %v2541_v14 }
 0x2c3   : > { %v986_v56 = vrot.slane %v979_v50, %v2541_v14  ;;  %v1004_v57 = vcombine.low %v995_v47, %v1003_v48 }
 0x2c4   : > { %v779_v58 = vcombine.high %v771_v52, %v2334_v37  ;;  %v780_v59 = vcombine.high %v778_v53, %v2334_v37  ;;  %v783_v60 = vpack.i.b16 %v771_v52, %v737_v26  ;;  %v786_v61 = vshrl.u32 %v771_v52, 16 }
 0x2c5   : > { %v799_v0 = vpack.i.b16 %v778_v53, %v744_v31  ;;  %v802_v2 = vshrl.u32 %v778_v53, 16  ;;  %v1011_v3 = vrot.slane %v1004_v57, %v2541_v14  ;;  %v1016_v15 = vshrl.u32 %v986_v56, 16 }
 0x2c6   : > { %v787_v4 = vpack.i.b16 %v786_v61, %v785_v51  ;;  %v791_v5 = vpack.i.b16 %v779_v58, %v745_v38  ;;  %v794_v6 = vshrl.u32 %v779_v58, 16  ;;  %v807_v7 = vpack.i.b16 %v780_v59, %v746_v49  ;;  %v2002_v51 = vld [vmem:[%s2710_s7] sm:$0xff]   ;;  %v2009_v58 = vld [vmem:[%s2710_s7 + $0x8] sm:$0xff]  }
 0x2c7   : > { %v803_v8 = vpack.i.b16 %v802_v2, %v801_v55  ;;  %v810_v9 = vshrl.u32 %v780_v59, 16  ;;  %v813_v10 = vcombine.low %v783_v60, %v799_v0  ;;  %v1015_v11 = vpack.i.b16 %v1011_v3, %v986_v56 }
 0x2c8   : > { %v795_v12 = vpack.i.b16 %v794_v6, %v793_v54  ;;  %v821_v13 = vcombine.low %v791_v5, %v807_v7  ;;  %v1017_v17 = vshrl.u32 %v1011_v3, 16  ;;  %v1012_v25 = vcombine.high %v1011_v3, %v2334_v37 }
 0x2c9   : > { %v811_v18 = vpack.i.b16 %v810_v9, %v809_v62  ;;  %v838_v19 = vcombine.low %v787_v4, %v803_v8  ;;  %v1188_v20 = vsel %vm1183_vm3, %v1015_v11, 0  ;;  %v820_v21 = vrot.slane %v813_v10, %v2537_v63 }
 0x2ca   : > { %v828_v22 = vrot.slane %v821_v13, %v2537_v63  ;;  %2065 = vmatpush3.bf16.xpose.msra.mxu1 %v1188_v20  ;;  %v1018_v23 = vpack.i.b16 %v1017_v17, %v1016_v15  ;;  %v987_v30 = vcombine.high %v986_v56, %v2334_v37  ;;  %v1023_v33 = vshrl.u32 %v1012_v25, 16 }
 0x2cb   : > { %v846_v24 = vcombine.low %v795_v12, %v811_v18  ;;  %2076 = vmatprep.subr.bf16.mxu1 %v2327_v16  ;;  %v845_v28 = vrot.slane %v838_v19, %v2537_v63  ;;  %v2003_v52 = vunpack.c.l.bf16 %v2002_v51  ;;  %v2004_v53 = vunpack.c.h.bf16 %v2002_v51 }
 0x2cc   : > { %v829_v26 = vcombine.low %v820_v21, %v828_v22  ;;  %v1234_v27 = vsel %vm1183_vm3, %v1018_v23, 0  ;;  %v1021_v35 = vpack.i.b16 %v1012_v25, %v987_v30  ;;  %v1022_v36 = vshrl.u32 %v987_v30, 16  ;;  %v1025_v21 = vld [vmem:[#allocation3] sm:$0xf] }
 0x2cd   : > { %v853_v29 = vrot.slane %v846_v24, %v2537_v63  ;;  %2071 = vmatpush3.bf16.xpose.msra.mxu0 %v1234_v27  ;;  %v2007_v2 = vunpack.c.l.bf16 %v2009_v58  ;;  %v2008_v5 = vunpack.c.h.bf16 %v2009_v58 }
 0x2ce   : > { %2082 = vmatprep.subr.bf16.mxu0 %v2327_v16  ;;  %v836_v32 = vrot.slane %v829_v26, %v2541_v14  ;;  %v1024_v41 = vpack.i.b16 %v1023_v33, %v1022_v36  ;;  %v1280_v42 = vsel %vm1183_vm3, %v1021_v35, 0 }
 0x2cf   : > { %v854_v31 = vcombine.low %v845_v28, %v853_v29 }
 0x2d0   : > { %v866_v39 = vshrl.u32 %v836_v32, 16  ;;  %v1326_v45 = vsel %vm1183_vm3, %v1024_v41, 0  ;;  %v837_v46 = vcombine.high %v836_v32, %v2334_v37 }
 0x2d1   : > { %v861_v34 = vrot.slane %v854_v31, %v2541_v14 }
 0x2d2   : > { %v872_v49 = vshrl.u32 %v837_v46, 16 }
 0x2d3   : > { %v865_v38 = vpack.i.b16 %v861_v34, %v836_v32  ;;  %v867_v40 = vshrl.u32 %v861_v34, 16  ;;  %v862_v44 = vcombine.high %v861_v34, %v2334_v37 }
 0x2d5   : > { %2067 = vmatmul.mubr.msk.bf16.vlgmr.msra.gmra.mxu1 %vm1183_vm3, %v865_v38  ;;  %v868_v43 = vpack.i.b16 %v867_v40, %v866_v39  ;;  %v873_v47 = vshrl.u32 %v862_v44, 16  ;;  %v871_v48 = vpack.i.b16 %v862_v44, %v837_v46 }
 0x2d6   : > { %2077 = vmatpush3.bf16.xpose.msra.mxu1 %v1280_v42  ;;  %2078 = vmatprep.mubr.msk.bf16.mxu1 %vm2328_vm1, %v2327_v16 }
 0x2d7   : > { %2073 = vmatmul.mubr.msk.bf16.vlgmr.msra.gmra.mxu0 %vm1183_vm3, %v868_v43  ;;  %2088 = vmatprep.subr.bf16.mxu1 %v2327_v16  ;;  %v874_v50 = vpack.i.b16 %v873_v47, %v872_v49  ;;  %v1036_v47 = vshrl.u32 %v1025_v21, 16 }
 0x2d8   : > { %2083 = vmatpush3.bf16.xpose.msra.mxu0 %v1326_v45  ;;  %2084 = vmatprep.mubr.msk.bf16.mxu0 %vm2328_vm1, %v2327_v16 }
 0x2d9   : > { %2094 = vmatprep.subr.bf16.mxu0 %v2327_v16 }
 0x2dd   : > { %2079 = vmatmul.mubr.msk.bf16.vlgmr.msra.gmra.mxu1 %vm1183_vm3, %v871_v48 }
 0x2de   : > { %2090 = vmatprep.mubr.msk.bf16.mxu1 %vm2328_vm1, %v2327_v16 }
 0x2df   : > { %2085 = vmatmul.mubr.msk.bf16.vlgmr.msra.gmra.mxu0 %vm1183_vm3, %v874_v50 }
 0x2e0   : > { %2096 = vmatprep.mubr.msk.bf16.mxu0 %vm2328_vm1, %v2327_v16 }
 0x395   : > { %v1224_v54 = vpop.f32.mrf.mxu1 }
 0x396   : > { %v1225_v55 = vadd.f32 %v2003_v52, %v1224_v54 }
 0x397   : > { %v2068_v56 = vpop.f32.mrf.mxu1  ;;  %v1270_v57 = vpop.f32.mrf.mxu0 }
 0x398   : > { %v1271_v59 = vadd.f32 %v2004_v53, %v1270_v57  ;;  %v1368_v60 = vsel %vm1183_vm3, %v1225_v55, -inf }
 0x399   : > { %1369 = vmax.xlane.f32.xlu0 %v1368_v60  ;;  %v1227_v61 = vpop.f32.mrf.mxu1  ;;  %v2074_v62 = vpop.f32.mrf.mxu0 }
 0x39a   : > { %v1371_v0 = vsel %vm1183_vm3, %v1271_v59, -inf }
 0x39b   : > { %v2069_v3 = vpop.f32.mrf.mxu1  ;;  %1372 = vmax.xlane.f32.xlu1 %v1371_v0  ;;  %v1273_v4 = vpop.f32.mrf.mxu0 }
 0x39d   : > { %v2075_v6 = vpop.f32.mrf.mxu0  ;;  %v1316_v7 = vpop.f32.mrf.mxu1 }
 0x39e   : > { %v1317_v8 = vadd.f32 %v2007_v2, %v1316_v7 }
 0x39f   : > { %v2080_v9 = vpop.f32.mrf.mxu1  ;;  %v1362_v10 = vpop.f32.mrf.mxu0 }
 0x3a0   : > { %v1363_v11 = vadd.f32 %v2008_v5, %v1362_v10  ;;  %v1374_v12 = vsel %vm1183_vm3, %v1317_v8, -inf }
 0x3a1   : > { %1375 = vmax.xlane.f32.xlu0 %v1374_v12  ;;  %v1319_v13 = vpop.f32.mrf.mxu1  ;;  %v2086_v15 = vpop.f32.mrf.mxu0 }
 0x3a2   : > { %v1377_v19 = vsel %vm1183_vm3, %v1363_v11, -inf }
 0x3a3   : > { %v2081_v17 = vpop.f32.mrf.mxu1  ;;  %v1365_v18 = vpop.f32.mrf.mxu0 }
 0x3a5   : > { %1378 = vmax.xlane.f32.xlu0 %v1377_v19  ;;  %v2087_v20 = vpop.f32.mrf.mxu0 }
 0x3ac   : > { %1029 = vrot.lane.b32.xlu1 %v1025_v21, %s2329_s28  ;;  %s457_s28 = scalar_lea.vmem %s2713_s10, %s2474_s22 }
 0x422   : > { %v1370_v22 = vpop.xlane.xlu0 %1369 }
 0x423   : > { %v1380_v23 = vsub.f32 %v1225_v55, %v1370_v22 }
 0x424   : > { %v1373_v24 = vpop.xlane.xlu1 %1372 }
 0x425   : > { %v1384_v25 = vmul.f32 1.442695, %v1380_v23  ;;  %v1381_v26 = vsub.f32 %v1271_v59, %v1373_v24 }
 0x427   : > { %2198 = vpow2.f32 %v1384_v25  ;;  %v1386_v27 = vmul.f32 1.442695, %v1381_v26 }
 0x428   : > { %v1030_v43 = vpop.permute.xlu1 %1029 }
 0x429   : > { %2200 = vpow2.f32 %v1386_v27  ;;  %v1042_v51 = vshrl.u32 %v1030_v43, 16 }
 0x42a   : > { %v1376_v32 = vpop.xlane.xlu0 %1375 }
 0x42b   : > { %v1382_v35 = vsub.f32 %v1317_v8, %v1376_v32 }
 0x42d   : > { %v1388_v38 = vmul.f32 1.442695, %v1382_v35 }
 0x42e   : > { %v1379_v33 = vpop.xlane.xlu0 %1378 }
 0x42f   : > { %v1383_v34 = vsub.f32 %v1363_v11, %v1379_v33 }
 0x431   : > { %v1390_v36 = vmul.f32 1.442695, %v1383_v34 }
 0x433   : > { %2202 = vpow2.f32 %v1390_v36 }
 0x434   : > { %v2608_v28 = vpop.eup %2198  ;;  %2204 = vpow2.f32 %v1388_v38 }
 0x435   : > { %v1392_v29 = vsel %vm1183_vm3, %v2608_v28, 0.0 }
 0x436   : > { %v2612_v30 = vpop.eup %2200  ;;  %1393 = vadd.xlane.f32.xlu0 %v1392_v29 }
 0x437   : > { %v1395_v31 = vsel %vm1183_vm3, %v2612_v30, 0.0 }
 0x438   : > { %1396 = vadd.xlane.f32.xlu1 %v1395_v31 }
 0x440   : > { %v2618_v39 = vpop.eup %2202 }
 0x441   : > { %v2620_v40 = vpop.eup %2204  ;;  %v1401_v41 = vsel %vm1183_vm3, %v2618_v39, 0.0 }
 0x442   : > { %v1398_v42 = vsel %vm1183_vm3, %v2620_v40, 0.0 }
 0x449   : > { %1031 = vrot.lane.b32.xlu1 %v1025_v21, %s2331_s30 }
 0x44c   : > { %1027 = vrot.lane.b32.xlu0 %v1025_v21, %s2330_s29 }
 0x46b   : > { %1402 = vadd.xlane.f32.xlu0 %v1401_v41 }
 0x46d   : > { %1399 = vadd.xlane.f32.xlu1 %v1398_v42 }
 0x4bf   : > { %v1394_v44 = vpop.xlane.xlu0 %1393 }
 0x4c0   : > { %2206 = vrcp.f32 %v1394_v44 }
 0x4c1   : > { %v1397_v45 = vpop.xlane.xlu1 %1396 }
 0x4c2   : > { %2208 = vrcp.f32 %v1397_v45 }
 0x4c3   : > { %v1028_v46 = vpop.permute.xlu0 %1027 }
 0x4c4   : > { %v1035_v48 = vpack.i.b16 %v1028_v46, %v1025_v21  ;;  %v1037_v49 = vshrl.u32 %v1028_v46, 16 }
 0x4c5   : > { %v1032_v50 = vpop.permute.xlu1 %1031 }
 0x4c6   : > { %v1038_v52 = vpack.i.b16 %v1037_v49, %v1036_v47  ;;  %v1041_v53 = vpack.i.b16 %v1032_v50, %v1030_v43  ;;  %v1043_v54 = vshrl.u32 %v1032_v50, 16  ;;  %v1052_v55 = vrot.slane %v1035_v48, %v2537_v63  ;;  %v2192_v50 = vld [vmem:[%s2711_s8 + $0x8] sm:$0xff]  }
 0x4c8   : > { %v1044_v56 = vpack.i.b16 %v1043_v54, %v1042_v51  ;;  %v1060_v57 = vrot.slane %v1041_v53, %v2537_v63  ;;  %v1086_v58 = vrot.slane %v1038_v52, %v2537_v63 }
 0x4ca   : > { %v1061_v59 = vcombine.low %v1052_v55, %v1060_v57  ;;  %v1062_v60 = vcombine.high %v1052_v55, %v1060_v57  ;;  %v1094_v61 = vrot.slane %v1044_v56, %v2537_v63 }
 0x4cc   : > { %v1069_v62 = vrot.slane %v1061_v59, %v2541_v14  ;;  %v1076_v0 = vrot.slane %v1062_v60, %v2541_v14  ;;  %v1095_v2 = vcombine.low %v1086_v58, %v1094_v61  ;;  %v1096_v3 = vcombine.high %v1086_v58, %v1094_v61 }
 0x4cd   : > { %v2207_v17 = vpop.eup %2206 }
 0x4ce   : > { %v1103_v4 = vrot.slane %v1095_v2, %v2541_v14  ;;  %v1110_v5 = vrot.slane %v1096_v3, %v2541_v14  ;;  %v1113_v6 = vcombine.low %v1069_v62, %v1076_v0  ;;  %v1983_v7 = vcombine.high %v1069_v62, %v1076_v0 }
 0x4cf   : > { %v2209_v20 = vpop.eup %2208  ;;  %v1408_v23 = vmul.f32 %v2207_v17, %v2608_v28 }
 0x4d0   : > { %v1120_v8 = vrot.slane %v1113_v6, %v2537_v63  ;;  %v1128_v9 = vrot.slane %v1983_v7, %v2537_v63  ;;  %v1138_v10 = vcombine.low %v1103_v4, %v1110_v5  ;;  %v1984_v11 = vcombine.high %v1103_v4, %v1110_v5 }
 0x4d1   : > { %v1409_v29 = vmul.f32 %v2209_v20, %v2612_v30  ;;  %v1412_v38 = vpack.c.bf16 %v1408_v23, %v1408_v23 }
 0x4d2   : > { %v1145_v12 = vrot.slane %v1138_v10, %v2537_v63  ;;  %v1153_v13 = vrot.slane %v1984_v11, %v2537_v63  ;;  %v1129_v15 = vcombine.low %v1120_v8, %v1128_v9 }
 0x4d3   : > { %v1413_v41 = vpack.c.bf16 %v1409_v29, %v1409_v29 }
 0x4d4   : > { %v1136_v18 = vrot.slane %v1129_v15, %v2541_v14  ;;  %v1154_v19 = vcombine.low %v1145_v12, %v1153_v13  ;;  %v2193_v15 = vld [vmem:[%s2711_s8] sm:$0xff]  }
 0x4d6   : > { %v1161_v21 = vrot.slane %v1154_v19, %v2541_v14  ;;  %v1137_v22 = vcombine.high %v1136_v18, %v2334_v37  ;;  %v1166_v25 = vshrl.u32 %v1136_v18, 16 }
 0x4d8   : > { %v1165_v24 = vpack.i.b16 %v1161_v21, %v1136_v18  ;;  %v1167_v26 = vshrl.u32 %v1161_v21, 16  ;;  %v1162_v27 = vcombine.high %v1161_v21, %v2334_v37  ;;  %v1172_v31 = vshrl.u32 %v1137_v22, 16 }
 0x4da   : > { %v1421_v32 = vsel %vm1419_vm4, %v1165_v24, 0  ;;  %v1168_v33 = vpack.i.b16 %v1167_v26, %v1166_v25  ;;  %v1171_v34 = vpack.i.b16 %v1162_v27, %v1137_v22  ;;  %v1173_v35 = vshrl.u32 %v1162_v27, 16 }
 0x4db   : > { %2089 = vmatpush3.bf16.msra.mxu1 %v1421_v32 }
 0x4dc   : > { %v1467_v36 = vsel %vm1419_vm4, %v1168_v33, 0  ;;  %2100 = vmatprep.subr.bf16.mxu1 %v2327_v16  ;;  %v1174_v28 = vpack.i.b16 %v1173_v35, %v1172_v31  ;;  %v1513_v37 = vsel %vm1419_vm4, %v1171_v34, 0 }
 0x4dd   : > { %2095 = vmatpush3.bf16.msra.mxu0 %v1467_v36 }
 0x4de   : > { %2091 = vmatmul.mubr.msk.bf16.vlgmr.msra.gmra.mxu1 %vm1183_vm3, %v1412_v38  ;;  %2106 = vmatprep.subr.bf16.mxu0 %v2327_v16  ;;  %v1559_v30 = vsel %vm1419_vm4, %v1174_v28, 0 }
 0x4df   : > { %2101 = vmatpush3.bf16.msra.mxu1 %v1513_v37  ;;  %2102 = vmatprep.mubr.msk.bf16.mxu1 %vm2328_vm1, %v2327_v16 }
 0x4e0   : > { %2097 = vmatmul.mubr.msk.bf16.vlgmr.msra.gmra.mxu0 %vm1183_vm3, %v1413_v41  ;;  %2112 = vmatprep.subr.bf16.mxu1 %v2327_v16 }
 0x4e1   : > { %2107 = vmatpush3.bf16.msra.mxu0 %v1559_v30  ;;  %2108 = vmatprep.mubr.msk.bf16.mxu0 %vm2328_vm1, %v2327_v16 }
 0x4f4   : > { %v1403_v42 = vpop.xlane.xlu0 %1402 }
 0x4f5   : > { %2210 = vrcp.f32 %v1403_v42 }
 0x4f6   : > { %v1400_v43 = vpop.xlane.xlu1 %1399 }
 0x4f7   : > { %2212 = vrcp.f32 %v1400_v43 }
 0x502   : > { %v2211_v44 = vpop.eup %2210 }
 0x503   : > { %v1411_v45 = vmul.f32 %v2211_v44, %v2618_v39 }
 0x504   : > { %v2213_v46 = vpop.eup %2212 }
 0x505   : > { %v1415_v47 = vpack.c.bf16 %v1411_v45, %v1411_v45  ;;  %v1410_v48 = vmul.f32 %v2213_v46, %v2620_v40 }
 0x507   : > { %2109 = vmatmul.mubr.msk.bf16.vlgmr.msra.gmra.mxu0 %vm1183_vm3, %v1415_v47  ;;  %v1414_v49 = vpack.c.bf16 %v1410_v48, %v1410_v48 }
 0x509   : > { %2103 = vmatmul.mubr.msk.bf16.vlgmr.msra.gmra.mxu1 %vm1183_vm3, %v1414_v49  ;;  %v1998_v49 = vld [vmem:[#allocation8] ss:$0 sm:$0xff] }
 0x50a   : > { %2116 = vmatprep.mubr.msk.bf16.mxu1 %vm2328_vm1, %v2327_v16  ;;  %2113 = vmatpush3.bf16.msra.mxu1 %v2192_v50 }
 0x50b   : > { %2114 = vmatprep.subr.bf16.mxu1 %v2327_v16 }
 0x50e   : > { %2115 = vmatpush3.bf16.msra.mxu1 %v2193_v15 }
 0x59e   : > { %v1457_v39 = vpop.f32.mrf.mxu1 }
 0x5a0   : > { %v2092_v51 = vpop.f32.mrf.mxu1  ;;  %v1503_v52 = vpop.f32.mrf.mxu0 }
 0x5a2   : > { %v1460_v53 = vpop.f32.mrf.mxu1  ;;  %v2098_v40 = vpop.f32.mrf.mxu0 }
 0x5a4   : > { %v2093_v54 = vpop.f32.mrf.mxu1  ;;  %v1506_v55 = vpop.f32.mrf.mxu0 }
 0x5a6   : > { %v2099_v56 = vpop.f32.mrf.mxu0 }
 0x5c7   : > { %v1595_v57 = vpop.f32.mrf.mxu0 }
 0x5c8   : > { %v1617_v58 = vcombine.low %v1503_v52, %v1595_v57  ;;  %v1618_v59 = vcombine.high %v1503_v52, %v1595_v57 }
 0x5c9   : > { %v1549_v60 = vpop.f32.mrf.mxu1  ;;  %v2110_v61 = vpop.f32.mrf.mxu0 }
 0x5ca   : > { %v1601_v62 = vcombine.low %v1457_v39, %v1549_v60  ;;  %v1602_v0 = vcombine.high %v1457_v39, %v1549_v60  ;;  %v1625_v4 = vrot.slane %v1617_v58, %v2537_v63  ;;  %v1632_v16 = vrot.slane %v1618_v59, %v2537_v63 }
 0x5cb   : > { %v2104_v2 = vpop.f32.mrf.mxu1  ;;  %v1598_v3 = vpop.f32.mrf.mxu0 }
 0x5cc   : > { %v1609_v5 = vrot.slane %v1601_v62, %v2537_v63  ;;  %v1616_v6 = vrot.slane %v1602_v0, %v2537_v63 }
 0x5cd   : > { %v1552_v7 = vpop.f32.mrf.mxu1  ;;  %v2111_v8 = vpop.f32.mrf.mxu0 }
 0x5ce   : > { %v1633_v9 = vcombine.low %v1609_v5, %v1625_v4  ;;  %v1634_v10 = vcombine.high %v1609_v5, %v1625_v4  ;;  %v1649_v11 = vcombine.low %v1616_v6, %v1632_v16  ;;  %v1650_v12 = vcombine.high %v1616_v6, %v1632_v16 }
 0x5cf   : > { %v2105_v13 = vpop.f32.mrf.mxu1 }
 0x5d0   : > { %v1641_v17 = vrot.slane %v1633_v9, %v2541_v14  ;;  %v1648_v18 = vrot.slane %v1634_v10, %v2541_v14  ;;  %v1657_v19 = vrot.slane %v1649_v11, %v2541_v14  ;;  %v1664_v20 = vrot.slane %v1650_v12, %v2541_v14 }
 0x5d2   : > { %v1669_v21 = vcombine.low %v1641_v17, %v1648_v18  ;;  %v1993_v22 = vcombine.high %v1641_v17, %v1648_v18  ;;  %v1685_v23 = vcombine.low %v1657_v19, %v1664_v20  ;;  %v1994_v24 = vcombine.high %v1657_v19, %v1664_v20 }
 0x5d4   : > { %v1676_v25 = vrot.slane %v1669_v21, %v2537_v63  ;;  %v1684_v26 = vrot.slane %v1993_v22, %v2537_v63  ;;  %v1692_v27 = vrot.slane %v1685_v23, %v2537_v63  ;;  %v1700_v29 = vrot.slane %v1994_v24, %v2537_v63 }
 0x5d6   : > { %v1702_v31 = vcombine.high %v1676_v25, %v1684_v26  ;;  %v1718_v32 = vcombine.high %v1692_v27, %v1700_v29  ;;  %v1701_v33 = vcombine.low %v1676_v25, %v1684_v26  ;;  %v1717_v34 = vcombine.low %v1692_v27, %v1700_v29 }
 0x5d8   : > { %v1716_v35 = vrot.slane %v1702_v31, %v2541_v14  ;;  %v1732_v36 = vrot.slane %v1718_v32, %v2541_v14  ;;  %v1709_v38 = vrot.slane %v1701_v33, %v2541_v14  ;;  %v1725_v28 = vrot.slane %v1717_v34, %v2541_v14 }
 0x5da   : > { %v1735_v37 = vcombine.low %v1716_v35, %v1732_v36  ;;  %v1734_v41 = vcombine.high %v1709_v38, %v1725_v28  ;;  %v1733_v30 = vcombine.low %v1709_v38, %v1725_v28  ;;  %v1736_v63 = vcombine.high %v1716_v35, %v1732_v36 }
 0x5dc   : > { %1742 = vrot.lane.b32.xlu1 %v1735_v37, %s2335_s24  ;;  %1738 = vrot.lane.b32.xlu0 %v1734_v41, %s2336_s26 }
 0x5e0   : > { %1746 = vrot.lane.b32.xlu1 %v1736_v63, %s2337_s27 }
 0x64e   : > { %v1743_v42 = vpop.permute.xlu1 %1742  ;;  %v1739_v43 = vpop.permute.xlu0 %1738 }
 0x64f   : > { %v1749_v44 = vsel %vm1183_vm3, %v1733_v30, %v1739_v43 }
 0x650   : > { %v1751_v46 = vsel %vm1750_vm5, %v1749_v44, %v1743_v42 }
 0x652   : > { %v1747_v45 = vpop.permute.xlu1 %1746 }
 0x653   : > { %v1753_v14 = vsel %vm1752_vm6, %v1751_v46, %v1747_v45 }
 0x654   : > { %v1754_v47 = vpack.c.bf16 %v1753_v14, %v1753_v14 }
 0x656   : > { %2117 = vmatmul.mubr.msk.bf16.vlgmr.msra.gmra.mxu1 %vm466_vm0, %v1754_v47 }
 0x716   : > { %v1808_v48 = vpop.f32.mrf.mxu1 }
 0x717   : > { %v1814_v50 = vadd.f32 %v1808_v48, %v2484_v1 }
 0x718   : > { %v2118_v39 = vpop.f32.mrf.mxu1 }
 0x719   : > { %v1822_v51 = vadd.f32 %v1998_v49, %v1814_v50 }
 0x71a   : > { %v1811_v52 = vpop.f32.mrf.mxu1 }
 0x71b   : > { %1823 = vst.msk [vmem:[%s457_s28] sm:$0xff] %vm466_vm0, %v1822_v51 }
 0x71c   : > { %v2119_v53 = vpop.f32.mrf.mxu1 }
 0x71d PF: > { %s22_s15 = sadd.s32 1, %s2322_s15   ;;  %s2718_s13 = smov %s2318_s14 }
 0x71e   : > { %p19_p2 = scmp.ge.s32.totalorder %s22_s15, 4   ;;  %s2719_s14 = smov %s2721_s21 }
 0x720   :  { %21 = sbr.rel (!%p19_p2) target bundleno = 3 (0x3), region = 113 }
 0x725   :  { %1849 = vsyncpa [#allocation5], 1 }
 0x726   :  { %1851 = vsyncpa [#allocation5 + $0x1], 1 }
 0x727   :  { %1852 = vsyncpa [#allocation7], 1 }

// kernel: base_transformer_cross_attn.7
= control target key start
LH: loop header
LB: loop body
LE: loop exit
PB: predicated region body
PF: predicated region fallthrough
CT: control target
= control target key end

     0   :  { %s2198_s13 = smov 0   ;;  %s2200_s14 = smov 0   ;;  %s2454_s0 = inlined_call_operand.vmem [shape: f32[2,8,32], index: 0, kind: input, shape index: {}, may-alias: {0,1}]   ;;  %s2455_s1 = inlined_call_operand.vmem [shape: f32[2,8,32], index: 1, kind: input, shape index: {}, may-alias: {0,1}]   ;;  %s2456_s2 = inlined_call_operand.vmem [shape: f32[1,32], index: 2, kind: input, shape index: {}]   ;;  %s2457_s3 = inlined_call_operand.vmem [shape: f32[1,32], index: 3, kind: input, shape index: {}]   ;;  %s2458_s4 = inlined_call_operand.vmem [shape: bf16[32,32], index: 4, kind: input, shape index: {}]   ;;  %s2459_s5 = inlined_call_operand.vmem [shape: bf16[32,32], index: 5, kind: input, shape index: {}]   ;;  %s2460_s6 = inlined_call_operand.vmem [shape: bf16[32,32], index: 6, kind: input, shape index: {}]   ;;  %s2461_s7 = inlined_call_operand.vmem [shape: bf16[4,8,8], index: 7, kind: input, shape index: {}]   ;;  %s2462_s8 = inlined_call_operand.vmem [shape: bf16[32,32], index: 8, kind: input, shape index: {}]   ;;  %s2463_s9 = inlined_call_operand.vmem [shape: f32[1,32], index: 9, kind: input, shape index: {}]   ;;  %s2464_s10 = inlined_call_operand.vmem [shape: f32[2,8,32], index: 10, kind: output, shape index: {}]  }
   0x1   :  { %s2202_s15 = smov 0  }
   0x2 LB: > { %s32_s16 = sadd.s32 1, %s2126_s14  ;;  %p1893_p0 = scmp.ge.s32.totalorder %s2130_s15, 1  ;;  %s2130_s15 = sphi %s2202_s15, %s20_s15   ;;  %s2126_s14 = sphi %s2200_s14, %s2466_s14   ;;  %s2122_s13 = sphi %s2198_s13, %s2465_s13  }
   0x3   : > { %p34_p1 = scmp.ge.s32.totalorder %s32_s16, 2  ;;  %p348_p2 = scmp.lt.s32.totalorder %s2130_s15, 3 }
   0x5   : > { %s2468_s16 = smov (%p34_p1, %s32_s16), 0  ;;  %p349_p3 = pnand %p1893_p0, %p348_p2 }
   0x6   : > { %p398_p4 = scmp.lt.s32.totalorder (!%p349_p3), %s2122_s13, 1  ;;  %s2134_s24 = smov (!%p349_p3), 120  }
   0x7   : > { %352 = sbr.rel (%p349_p3) target bundleno = 1776 (0x6f0), region = 60  ;;  %s2135_s25 = smov (!%p349_p3), 112  }
   0x8   : > { %s2136_s26 = smov (!%p349_p3), 104   ;;  %s2140_s19 = smov (!%p349_p3), 16  }
   0x9   : > { %s2142_s21 = smov (!%p349_p3), 24  }
   0xc   : > { %s2470_s13 = smov (!%p398_p4, %s2122_s13), 1  ;;  %vm428_vm0 = vcmask 261120   ;;  %v2080_v14 = vld [vmem:[%s2459_s5 + $0x8] sm:$0xff]   ;;  %v2132_v16 = vmov 0.0   ;;  %v2082_v17 = vld [vmem:[%s2459_s5] sm:$0xff]   ;;  %vm2133_vm1 = vmmov 0   ;;  %v444_v55 = vlaneseq }
   0xd   : > { %s2216_s17 = sshll.u32 %s2470_s13, 3  ;;  %v2081_v15 = vld [vmem:[%s2460_s6 + $0x8] sm:$0xff]   ;;  %1965 = vmatprep.subr.bf16.mxu0 %v2132_v16  ;;  %1973 = vmatprep.subr.bf16.mxu1 %v2132_v16  ;;  %v2083_v18 = vld [vmem:[%s2460_s6] sm:$0xff]   ;;  %vm518_vm2 = vcmask 257024   ;;  %v2137_v56 = vmov 1983009808  }
   0xe   : > { %s408_s20 = scalar_lea.vmem %s2455_s1, %s2216_s17  ;;  %s404_s23 = scalar_lea.vmem %s2454_s0, %s2216_s17  ;;  %1966 = vmatpush3.bf16.msra.mxu0 %v2080_v14  ;;  %1974 = vmatpush3.bf16.msra.mxu1 %v2081_v15  ;;  %v1935_v26 = vld [vmem:[%s2456_s2] ss:$0 sm:$0xff]  ;;  %v2084_v33 = vld [vmem:[%s2458_s4 + $0x8] sm:$0xff]   ;;  %v677_v57 = vunpack.c.l.s4 %v2137_v56  ;;  %v445_v58 = vshrl.u32 %v444_v55, 7  ;;  %v2138_v60 = vmov 1934713408  }
   0xf   : > { %v427_v0 = vld [vmem:[%s408_s20] sm:$0xff]  ;;  %1967 = vmatprep.subr.bf16.mxu0 %v2132_v16  ;;  %1975 = vmatprep.subr.bf16.mxu1 %v2132_v16  ;;  %v694_v61 = vunpack.c.l.s4 %v2138_v60  ;;  %vm1145_vm3 = vcmask 64512   ;;  %vm1381_vm4 = vcmask 1043456   ;;  %s2141_s20 = smov 8   ;;  %vm1712_vm5 = vcmask 130048  }
  0x10   : > { %v429_v1 = vsel %vm428_vm0, %v427_v0, 0.0  ;;  %v2227_v2 = vld [vmem:[%s404_s23] sm:$0xff]  ;;  %1969 = vmatprep.mubr.msk.bf16.mxu0 %vm2133_vm1, %v2132_v16  ;;  %1977 = vmatprep.mubr.msk.bf16.mxu1 %vm2133_vm1, %v2132_v16  ;;  %v678_v59 = vunpack.c.0.s8 %v677_v57  ;;  %vm1714_vm6 = vcmask 195584  }
  0x11   : > { %430 = vadd.xlane.f32.xlu0 %v429_v1  ;;  %v580_v3 = vsel %vm428_vm0, %v2227_v2, 0.0  ;;  %v1936_v28 = vld [vmem:[%s2457_s3] ss:$0 sm:$0xff] }
  0x12   : > { %1968 = vmatpush3.bf16.msra.mxu0 %v2082_v17  ;;  %1976 = vmatpush3.bf16.msra.mxu1 %v2083_v18  ;;  %v2085_v36 = vld [vmem:[%s2458_s4] sm:$0xff]   ;;  %v2285_v63 = vsub.s32 %v678_v59, %v445_v58 }
  0x13   : > { %1981 = vmatprep.subr.bf16.mxu0 %v2132_v16  ;;  %1989 = vmatprep.subr.bf16.mxu1 %v2132_v16 }
  0x15   : > { %581 = vadd.xlane.f32.xlu0 %v580_v3  ;;  %v695_v3 = vunpack.c.0.s8 %v694_v61 }
  0x17   : > { %v2289_v14 = vsub.s32 %v695_v3, %v445_v58 }
  0x9a   : > { %v431_v4 = vpop.xlane.xlu0 %430 }
  0x9b   : > { %v433_v5 = vmul.f32 0.03125, %v431_v4 }
  0x9d   : > { %v434_v6 = vsub.f32 %v427_v0, %v433_v5 }
  0x9e   : > { %v582_v7 = vpop.xlane.xlu0 %581 }
  0x9f   : > { %v584_v8 = vmul.f32 0.03125, %v582_v7  ;;  %v435_v9 = vmul.f32 %v434_v6, %v434_v6 }
  0xa1   : > { %v585_v10 = vsub.f32 %v2227_v2, %v584_v8  ;;  %v436_v11 = vsel %vm428_vm0, %v435_v9, 0.0 }
  0xa2   : > { %437 = vadd.xlane.f32.xlu1 %v436_v11 }
  0xa3   : > { %v586_v12 = vmul.f32 %v585_v10, %v585_v10 }
  0xa5   : > { %v587_v13 = vsel %vm428_vm0, %v586_v12, 0.0 }
  0xa6   : > { %588 = vadd.xlane.f32.xlu1 %v587_v13 }
 0x12b   : > { %v438_v19 = vpop.xlane.xlu1 %437 }
 0x12c   : > { %v439_v20 = vmul.f32 0.03125, %v438_v19 }
 0x12e   : > { %v440_v21 = vadd.f32 1e-05, %v439_v20 }
 0x12f   : > { %v589_v22 = vpop.xlane.xlu1 %588 }
 0x130   : > { %2088 = vrsqrt.f32 %v440_v21  ;;  %v590_v23 = vmul.f32 0.03125, %v589_v22 }
 0x132   : > { %v591_v24 = vadd.f32 1e-05, %v590_v23 }
 0x134   : > { %2090 = vrsqrt.f32 %v591_v24 }
 0x13d   : > { %v2089_v25 = vpop.eup %2088 }
 0x13e   : > { %v442_v27 = vmul.f32 %v2089_v25, %v434_v6 }
 0x140   : > { %v449_v29 = vmul.f32 %v1935_v26, %v442_v27 }
 0x141   : > { %v2091_v30 = vpop.eup %2090 }
 0x142   : > { %v456_v31 = vadd.f32 %v1936_v28, %v449_v29  ;;  %v593_v32 = vmul.f32 %v2091_v30, %v585_v10 }
 0x144   : > { %v457_v34 = vpack.c.bf16 %v456_v31, %v456_v31  ;;  %v600_v35 = vmul.f32 %v1935_v26, %v593_v32 }
 0x146   : > { %1970 = vmatmul.mubr.msk.bf16.vlgmr.msra.gmra.mxu0 %vm428_vm0, %v457_v34  ;;  %1978 = vmatmul.mubr.msk.bf16.vlgmr.msra.gmra.mxu1 %vm428_vm0, %v457_v34  ;;  %v607_v37 = vadd.f32 %v1936_v28, %v600_v35 }
 0x147   : > { %1982 = vmatpush3.bf16.msra.mxu0 %v2084_v33  ;;  %1985 = vmatprep.mubr.msk.bf16.mxu0 %vm2133_vm1, %v2132_v16 }
 0x148   : > { %1983 = vmatprep.subr.bf16.mxu0 %v2132_v16  ;;  %1991 = vmatprep.mubr.msk.bf16.mxu1 %vm2133_vm1, %v2132_v16  ;;  %v608_v38 = vpack.c.bf16 %v607_v37, %v607_v37  ;;  %v2139_v37 = vmov 0  }
 0x14b   : > { %1984 = vmatpush3.bf16.msra.mxu0 %v2085_v36 }
 0x14c   : > { %1995 = vmatprep.subr.bf16.mxu0 %v2132_v16 }
 0x14e   : > { %1986 = vmatmul.mubr.msk.bf16.vlgmr.msra.gmra.mxu0 %vm428_vm0, %v608_v38 }
 0x14f   : > { %1997 = vmatprep.mubr.msk.bf16.mxu0 %vm2133_vm1, %v2132_v16 }
 0x206   : > { %v511_v39 = vpop.f32.mrf.mxu0  ;;  %v570_v40 = vpop.f32.mrf.mxu1 }
 0x207   : > { %v517_v41 = vpack.c.bf16 %v511_v39, %v511_v39  ;;  %v576_v42 = vpack.c.bf16 %v570_v40, %v570_v40 }
 0x208   : > { %v1971_v43 = vpop.f32.mrf.mxu0  ;;  %v1979_v44 = vpop.f32.mrf.mxu1 }
 0x209   : > { %519 = vst.msk [vmem:[#allocation2] sm:$0xf] %vm518_vm2, %v517_v41  ;;  %577 = vst.msk [vmem:[#allocation3] sm:$0xf] %vm518_vm2, %v576_v42 }
 0x20a   : > { %v514_v45 = vpop.f32.mrf.mxu0  ;;  %v573_v46 = vpop.f32.mrf.mxu1 }
 0x20c   : > { %v1972_v47 = vpop.f32.mrf.mxu0  ;;  %v1980_v48 = vpop.f32.mrf.mxu1 }
 0x20e   : > { %v662_v49 = vpop.f32.mrf.mxu0 }
 0x20f   : > { %v668_v53 = vpack.c.bf16 %v662_v49, %v662_v49 }
 0x210   : > { %v1987_v50 = vpop.f32.mrf.mxu0  ;;  %v837_v51 = vld [vmem:[#allocation2] sm:$0xf] }
 0x211   : > { %839 = vrot.lane.b32.xlu0 %v837_v51, %s2134_s24  ;;  %841 = vrot.lane.b32.xlu1 %v837_v51, %s2135_s25  ;;  %v848_v4 = vshrl.u32 %v837_v51, 16  ;;  %v682_v8 = vrot.slane %v668_v53, %v2285_v63 }
 0x212   : > { %v665_v52 = vpop.f32.mrf.mxu0 }
 0x214   : > { %v1988_v54 = vpop.f32.mrf.mxu0 }
 0x215   : > { %843 = vrot.lane.b32.xlu1 %v837_v51, %s2136_s26  ;;  %672 = vrot.lane.b32.xlu0 %v668_v53, %s2135_s25 }
 0x219   : > { %670 = vrot.lane.b32.xlu1 %v668_v53, %s2134_s24 }
 0x21d   : > { %674 = vrot.lane.b32.xlu1 %v668_v53, %s2136_s26 }
 0x283   : > { %v842_v62 = vpop.permute.xlu1 %841  ;;  %v840_v0 = vpop.permute.xlu0 %839 }
 0x284   : > { %v849_v1 = vshrl.u32 %v840_v0, 16  ;;  %v847_v5 = vpack.i.b16 %v840_v0, %v837_v51  ;;  %v854_v6 = vshrl.u32 %v842_v62, 16 }
 0x286   : > { %v850_v10 = vpack.i.b16 %v849_v1, %v848_v4  ;;  %v864_v15 = vrot.slane %v847_v5, %v2285_v63 }
 0x287   : > { %v844_v7 = vpop.permute.xlu1 %843  ;;  %v673_v9 = vpop.permute.xlu0 %672 }
 0x288   : > { %v853_v11 = vpack.i.b16 %v844_v7, %v842_v62  ;;  %v855_v12 = vshrl.u32 %v844_v7, 16  ;;  %v690_v13 = vrot.slane %v673_v9, %v2285_v63  ;;  %v898_v22 = vrot.slane %v850_v10, %v2285_v63 }
 0x28a   : > { %v856_v17 = vpack.i.b16 %v855_v12, %v854_v6  ;;  %v872_v18 = vrot.slane %v853_v11, %v2285_v63  ;;  %v691_v19 = vcombine.low %v682_v8, %v690_v13  ;;  %v692_v20 = vcombine.high %v682_v8, %v690_v13 }
 0x28b   : > { %v671_v21 = vpop.permute.xlu1 %670 }
 0x28c   : > { %v873_v23 = vcombine.low %v864_v15, %v872_v18  ;;  %v874_v24 = vcombine.high %v864_v15, %v872_v18  ;;  %v906_v25 = vrot.slane %v856_v17, %v2285_v63  ;;  %v699_v26 = vrot.slane %v691_v19, %v2289_v14 }
 0x28d   : > { %v706_v31 = vrot.slane %v692_v20, %v2289_v14  ;;  %v716_v39 = vrot.slane %v671_v21, %v2285_v63 }
 0x28e   : > { %v881_v27 = vrot.slane %v873_v23, %v2289_v14  ;;  %v888_v28 = vrot.slane %v874_v24, %v2289_v14  ;;  %v907_v29 = vcombine.low %v898_v22, %v906_v25  ;;  %v908_v30 = vcombine.high %v898_v22, %v906_v25 }
 0x28f   : > { %v675_v32 = vpop.permute.xlu1 %674  ;;  %v707_v38 = vcombine.high %v699_v26, %v2139_v37  ;;  %v708_v49 = vcombine.high %v706_v31, %v2139_v37  ;;  %v747_v51 = vshrl.u32 %v699_v26, 16  ;;  %v763_v55 = vshrl.u32 %v706_v31, 16 }
 0x290   : > { %v915_v33 = vrot.slane %v907_v29, %v2289_v14  ;;  %v922_v34 = vrot.slane %v908_v30, %v2289_v14  ;;  %v925_v35 = vcombine.low %v881_v27, %v888_v28  ;;  %v1906_v36 = vcombine.high %v881_v27, %v888_v28 }
 0x291   : > { %v724_v40 = vrot.slane %v675_v32, %v2285_v63  ;;  %v755_v54 = vshrl.u32 %v707_v38, 16  ;;  %v771_v62 = vshrl.u32 %v708_v49, 16 }
 0x292   : > { %v932_v41 = vrot.slane %v925_v35, %v2285_v63  ;;  %v940_v42 = vrot.slane %v1906_v36, %v2285_v63  ;;  %v950_v43 = vcombine.low %v915_v33, %v922_v34  ;;  %v1907_v44 = vcombine.high %v915_v33, %v922_v34 }
 0x293   : > { %v725_v45 = vcombine.low %v716_v39, %v724_v40  ;;  %v726_v46 = vcombine.high %v716_v39, %v724_v40 }
 0x294   : > { %v957_v47 = vrot.slane %v950_v43, %v2285_v63  ;;  %v965_v48 = vrot.slane %v1907_v44, %v2285_v63  ;;  %v941_v50 = vcombine.low %v932_v41, %v940_v42 }
 0x295   : > { %v733_v52 = vrot.slane %v725_v45, %v2289_v14  ;;  %v740_v53 = vrot.slane %v726_v46, %v2289_v14 }
 0x296   : > { %v948_v56 = vrot.slane %v941_v50, %v2289_v14  ;;  %v966_v57 = vcombine.low %v957_v47, %v965_v48 }
 0x297   : > { %v741_v58 = vcombine.high %v733_v52, %v2139_v37  ;;  %v742_v59 = vcombine.high %v740_v53, %v2139_v37  ;;  %v745_v60 = vpack.i.b16 %v733_v52, %v699_v26  ;;  %v748_v61 = vshrl.u32 %v733_v52, 16 }
 0x298   : > { %v761_v0 = vpack.i.b16 %v740_v53, %v706_v31  ;;  %v764_v1 = vshrl.u32 %v740_v53, 16  ;;  %v973_v3 = vrot.slane %v966_v57, %v2289_v14  ;;  %v978_v15 = vshrl.u32 %v948_v56, 16 }
 0x299   : > { %v749_v4 = vpack.i.b16 %v748_v61, %v747_v51  ;;  %v753_v5 = vpack.i.b16 %v741_v58, %v707_v38  ;;  %v756_v6 = vshrl.u32 %v741_v58, 16  ;;  %v769_v7 = vpack.i.b16 %v742_v59, %v708_v49  ;;  %v1927_v51 = vld [vmem:[%s2461_s7] sm:$0xff]   ;;  %v1934_v58 = vld [vmem:[%s2461_s7 + $0x8] sm:$0xff]  }
 0x29a   : > { %v765_v8 = vpack.i.b16 %v764_v1, %v763_v55  ;;  %v772_v9 = vshrl.u32 %v742_v59, 16  ;;  %v775_v10 = vcombine.low %v745_v60, %v761_v0  ;;  %v977_v11 = vpack.i.b16 %v973_v3, %v948_v56 }
 0x29b   : > { %v757_v12 = vpack.i.b16 %v756_v6, %v755_v54  ;;  %v783_v13 = vcombine.low %v753_v5, %v769_v7  ;;  %v979_v17 = vshrl.u32 %v973_v3, 16  ;;  %v974_v25 = vcombine.high %v973_v3, %v2139_v37 }
 0x29c   : > { %v773_v18 = vpack.i.b16 %v772_v9, %v771_v62  ;;  %v800_v19 = vcombine.low %v749_v4, %v765_v8  ;;  %v1150_v20 = vsel %vm1145_vm3, %v977_v11, 0  ;;  %v782_v21 = vrot.slane %v775_v10, %v2285_v63 }
 0x29d   : > { %v790_v22 = vrot.slane %v783_v13, %v2285_v63  ;;  %1990 = vmatpush3.bf16.xpose.msra.mxu1 %v1150_v20  ;;  %v980_v23 = vpack.i.b16 %v979_v17, %v978_v15  ;;  %v949_v30 = vcombine.high %v948_v56, %v2139_v37  ;;  %v985_v33 = vshrl.u32 %v974_v25, 16 }
 0x29e   : > { %v808_v24 = vcombine.low %v757_v12, %v773_v18  ;;  %2001 = vmatprep.subr.bf16.mxu1 %v2132_v16  ;;  %v807_v28 = vrot.slane %v800_v19, %v2285_v63  ;;  %v1928_v52 = vunpack.c.l.bf16 %v1927_v51  ;;  %v1929_v53 = vunpack.c.h.bf16 %v1927_v51 }
 0x29f   : > { %v791_v26 = vcombine.low %v782_v21, %v790_v22  ;;  %v1196_v27 = vsel %vm1145_vm3, %v980_v23, 0  ;;  %v983_v35 = vpack.i.b16 %v974_v25, %v949_v30  ;;  %v984_v36 = vshrl.u32 %v949_v30, 16  ;;  %v987_v21 = vld [vmem:[#allocation3] sm:$0xf] }
 0x2a0   : > { %v815_v29 = vrot.slane %v808_v24, %v2285_v63  ;;  %1996 = vmatpush3.bf16.xpose.msra.mxu0 %v1196_v27  ;;  %v1932_v1 = vunpack.c.l.bf16 %v1934_v58  ;;  %v1933_v5 = vunpack.c.h.bf16 %v1934_v58 }
 0x2a1   : > { %2007 = vmatprep.subr.bf16.mxu0 %v2132_v16  ;;  %v798_v32 = vrot.slane %v791_v26, %v2289_v14  ;;  %v986_v41 = vpack.i.b16 %v985_v33, %v984_v36  ;;  %v1242_v42 = vsel %vm1145_vm3, %v983_v35, 0 }
 0x2a2   : > { %v816_v31 = vcombine.low %v807_v28, %v815_v29 }
 0x2a3   : > { %v828_v39 = vshrl.u32 %v798_v32, 16  ;;  %v1288_v45 = vsel %vm1145_vm3, %v986_v41, 0  ;;  %v799_v46 = vcombine.high %v798_v32, %v2139_v37 }
 0x2a4   : > { %v823_v34 = vrot.slane %v816_v31, %v2289_v14 }
 0x2a5   : > { %v834_v49 = vshrl.u32 %v799_v46, 16 }
 0x2a6   : > { %v827_v38 = vpack.i.b16 %v823_v34, %v798_v32  ;;  %v829_v40 = vshrl.u32 %v823_v34, 16  ;;  %v824_v44 = vcombine.high %v823_v34, %v2139_v37 }
 0x2a8   : > { %1992 = vmatmul.mubr.msk.bf16.vlgmr.msra.gmra.mxu1 %vm1145_vm3, %v827_v38  ;;  %v830_v43 = vpack.i.b16 %v829_v40, %v828_v39  ;;  %v835_v47 = vshrl.u32 %v824_v44, 16  ;;  %v833_v48 = vpack.i.b16 %v824_v44, %v799_v46 }
 0x2a9   : > { %2002 = vmatpush3.bf16.xpose.msra.mxu1 %v1242_v42  ;;  %2003 = vmatprep.mubr.msk.bf16.mxu1 %vm2133_vm1, %v2132_v16 }
 0x2aa   : > { %1998 = vmatmul.mubr.msk.bf16.vlgmr.msra.gmra.mxu0 %vm1145_vm3, %v830_v43  ;;  %2013 = vmatprep.subr.bf16.mxu1 %v2132_v16  ;;  %v836_v50 = vpack.i.b16 %v835_v47, %v834_v49  ;;  %v998_v47 = vshrl.u32 %v987_v21, 16 }
 0x2ab   : > { %2008 = vmatpush3.bf16.xpose.msra.mxu0 %v1288_v45  ;;  %2009 = vmatprep.mubr.msk.bf16.mxu0 %vm2133_vm1, %v2132_v16 }
 0x2ac   : > { %2019 = vmatprep.subr.bf16.mxu0 %v2132_v16 }
 0x2b0   : > { %2004 = vmatmul.mubr.msk.bf16.vlgmr.msra.gmra.mxu1 %vm1145_vm3, %v833_v48 }
 0x2b1   : > { %2015 = vmatprep.mubr.msk.bf16.mxu1 %vm2133_vm1, %v2132_v16 }
 0x2b2   : > { %2010 = vmatmul.mubr.msk.bf16.vlgmr.msra.gmra.mxu0 %vm1145_vm3, %v836_v50 }
 0x2b3   : > { %2021 = vmatprep.mubr.msk.bf16.mxu0 %vm2133_vm1, %v2132_v16 }
 0x368   : > { %v1186_v54 = vpop.f32.mrf.mxu1 }
 0x369   : > { %v1187_v55 = vadd.f32 %v1928_v52, %v1186_v54 }
 0x36a   : > { %v1993_v56 = vpop.f32.mrf.mxu1  ;;  %v1232_v57 = vpop.f32.mrf.mxu0 }
 0x36b   : > { %v1233_v59 = vadd.f32 %v1929_v53, %v1232_v57  ;;  %v1330_v60 = vsel %vm1145_vm3, %v1187_v55, -inf }
 0x36c   : > { %v1999_v61 = vpop.f32.mrf.mxu0  ;;  %1331 = vmax.xlane.f32.xlu0 %v1330_v60  ;;  %v1189_v62 = vpop.f32.mrf.mxu1 }
 0x36d   : > { %v1333_v0 = vsel %vm1145_vm3, %v1233_v59, -inf }
 0x36e   : > { %1334 = vmax.xlane.f32.xlu1 %v1333_v0  ;;  %v1994_v3 = vpop.f32.mrf.mxu1  ;;  %v1235_v4 = vpop.f32.mrf.mxu0 }
 0x370   : > { %v2000_v6 = vpop.f32.mrf.mxu0  ;;  %v1278_v7 = vpop.f32.mrf.mxu1 }
 0x371   : > { %v1279_v8 = vadd.f32 %v1932_v1, %v1278_v7 }
 0x372   : > { %v2005_v9 = vpop.f32.mrf.mxu1  ;;  %v1324_v10 = vpop.f32.mrf.mxu0 }
 0x373   : > { %v1325_v11 = vadd.f32 %v1933_v5, %v1324_v10  ;;  %v1336_v12 = vsel %vm1145_vm3, %v1279_v8, -inf }
 0x374   : > { %v2011_v13 = vpop.f32.mrf.mxu0  ;;  %1337 = vmax.xlane.f32.xlu0 %v1336_v12  ;;  %v1281_v15 = vpop.f32.mrf.mxu1 }
 0x375   : > { %v1339_v19 = vsel %vm1145_vm3, %v1325_v11, -inf }
 0x376   : > { %v2006_v17 = vpop.f32.mrf.mxu1  ;;  %v1327_v18 = vpop.f32.mrf.mxu0 }
 0x378   : > { %v2012_v20 = vpop.f32.mrf.mxu0  ;;  %1340 = vmax.xlane.f32.xlu0 %v1339_v19 }
 0x37f   : > { %991 = vrot.lane.b32.xlu1 %v987_v21, %s2135_s25 }
 0x3f5   : > { %v1332_v22 = vpop.xlane.xlu0 %1331 }
 0x3f6   : > { %v1342_v23 = vsub.f32 %v1187_v55, %v1332_v22 }
 0x3f7   : > { %v1335_v24 = vpop.xlane.xlu1 %1334 }
 0x3f8   : > { %v1346_v25 = vmul.f32 1.442695, %v1342_v23  ;;  %v1343_v26 = vsub.f32 %v1233_v59, %v1335_v24 }
 0x3fa   : > { %2092 = vpow2.f32 %v1346_v25  ;;  %v1348_v27 = vmul.f32 1.442695, %v1343_v26 }
 0x3fb   : > { %v992_v43 = vpop.permute.xlu1 %991 }
 0x3fc   : > { %2094 = vpow2.f32 %v1348_v27  ;;  %v1004_v51 = vshrl.u32 %v992_v43, 16 }
 0x3fd   : > { %v1338_v32 = vpop.xlane.xlu0 %1337 }
 0x3fe   : > { %v1344_v35 = vsub.f32 %v1279_v8, %v1338_v32 }
 0x400   : > { %v1350_v38 = vmul.f32 1.442695, %v1344_v35 }
 0x401   : > { %v1341_v33 = vpop.xlane.xlu0 %1340 }
 0x402   : > { %v1345_v34 = vsub.f32 %v1325_v11, %v1341_v33 }
 0x404   : > { %v1352_v36 = vmul.f32 1.442695, %v1345_v34 }
 0x406   : > { %2096 = vpow2.f32 %v1352_v36 }
 0x407   : > { %v2356_v28 = vpop.eup %2092  ;;  %2098 = vpow2.f32 %v1350_v38 }
 0x408   : > { %v1354_v29 = vsel %vm1145_vm3, %v2356_v28, 0.0 }
 0x409   : > { %v2360_v30 = vpop.eup %2094  ;;  %1355 = vadd.xlane.f32.xlu0 %v1354_v29 }
 0x40a   : > { %v1357_v31 = vsel %vm1145_vm3, %v2360_v30, 0.0 }
 0x40b   : > { %1358 = vadd.xlane.f32.xlu1 %v1357_v31 }
 0x413   : > { %v2366_v39 = vpop.eup %2096 }
 0x414   : > { %v2368_v40 = vpop.eup %2098  ;;  %v1363_v41 = vsel %vm1145_vm3, %v2366_v39, 0.0 }
 0x415   : > { %v1360_v42 = vsel %vm1145_vm3, %v2368_v40, 0.0 }
 0x41c   : > { %993 = vrot.lane.b32.xlu1 %v987_v21, %s2136_s26  ;;  %s419_s26 = scalar_lea.vmem %s2464_s10, %s2216_s17 }
 0x41f   : > { %989 = vrot.lane.b32.xlu0 %v987_v21, %s2134_s24 }
 0x43e   : > { %1364 = vadd.xlane.f32.xlu0 %v1363_v41 }
 0x440   : > { %1361 = vadd.xlane.f32.xlu1 %v1360_v42 }
 0x492   : > { %v1356_v44 = vpop.xlane.xlu0 %1355 }
 0x493   : > { %2100 = vrcp.f32 %v1356_v44 }
 0x494   : > { %v1359_v45 = vpop.xlane.xlu1 %1358 }
 0x495   : > { %2102 = vrcp.f32 %v1359_v45 }
 0x496   : > { %v990_v46 = vpop.permute.xlu0 %989 }
 0x497   : > { %v997_v48 = vpack.i.b16 %v990_v46, %v987_v21  ;;  %v999_v49 = vshrl.u32 %v990_v46, 16 }
 0x498   : > { %v994_v50 = vpop.permute.xlu1 %993 }
 0x499   : > { %v1000_v52 = vpack.i.b16 %v999_v49, %v998_v47  ;;  %v1003_v53 = vpack.i.b16 %v994_v50, %v992_v43  ;;  %v1005_v54 = vshrl.u32 %v994_v50, 16  ;;  %v1014_v55 = vrot.slane %v997_v48, %v2285_v63  ;;  %v2086_v50 = vld [vmem:[%s2462_s8 + $0x8] sm:$0xff]  }
 0x49b   : > { %v1006_v56 = vpack.i.b16 %v1005_v54, %v1004_v51  ;;  %v1022_v57 = vrot.slane %v1003_v53, %v2285_v63  ;;  %v1048_v58 = vrot.slane %v1000_v52, %v2285_v63 }
 0x49d   : > { %v1023_v59 = vcombine.low %v1014_v55, %v1022_v57  ;;  %v1024_v60 = vcombine.high %v1014_v55, %v1022_v57  ;;  %v1056_v61 = vrot.slane %v1006_v56, %v2285_v63 }
 0x49f   : > { %v1031_v62 = vrot.slane %v1023_v59, %v2289_v14  ;;  %v1038_v0 = vrot.slane %v1024_v60, %v2289_v14  ;;  %v1057_v1 = vcombine.low %v1048_v58, %v1056_v61  ;;  %v1058_v3 = vcombine.high %v1048_v58, %v1056_v61 }
 0x4a0   : > { %v2101_v17 = vpop.eup %2100 }
 0x4a1   : > { %v1065_v4 = vrot.slane %v1057_v1, %v2289_v14  ;;  %v1072_v5 = vrot.slane %v1058_v3, %v2289_v14  ;;  %v1075_v6 = vcombine.low %v1031_v62, %v1038_v0  ;;  %v1908_v7 = vcombine.high %v1031_v62, %v1038_v0 }
 0x4a2   : > { %v2103_v20 = vpop.eup %2102  ;;  %v1370_v23 = vmul.f32 %v2101_v17, %v2356_v28 }
 0x4a3   : > { %v1082_v8 = vrot.slane %v1075_v6, %v2285_v63  ;;  %v1090_v9 = vrot.slane %v1908_v7, %v2285_v63  ;;  %v1100_v10 = vcombine.low %v1065_v4, %v1072_v5  ;;  %v1909_v11 = vcombine.high %v1065_v4, %v1072_v5 }
 0x4a4   : > { %v1371_v29 = vmul.f32 %v2103_v20, %v2360_v30  ;;  %v1374_v38 = vpack.c.bf16 %v1370_v23, %v1370_v23 }
 0x4a5   : > { %v1107_v12 = vrot.slane %v1100_v10, %v2285_v63  ;;  %v1115_v13 = vrot.slane %v1909_v11, %v2285_v63  ;;  %v1091_v15 = vcombine.low %v1082_v8, %v1090_v9 }
 0x4a6   : > { %v1375_v41 = vpack.c.bf16 %v1371_v29, %v1371_v29 }
 0x4a7   : > { %v1098_v18 = vrot.slane %v1091_v15, %v2289_v14  ;;  %v1116_v19 = vcombine.low %v1107_v12, %v1115_v13  ;;  %v2087_v15 = vld [vmem:[%s2462_s8] sm:$0xff]  }
 0x4a9   : > { %v1123_v21 = vrot.slane %v1116_v19, %v2289_v14  ;;  %v1099_v22 = vcombine.high %v1098_v18, %v2139_v37  ;;  %v1128_v25 = vshrl.u32 %v1098_v18, 16 }
 0x4ab   : > { %v1127_v24 = vpack.i.b16 %v1123_v21, %v1098_v18  ;;  %v1129_v26 = vshrl.u32 %v1123_v21, 16  ;;  %v1124_v27 = vcombine.high %v1123_v21, %v2139_v37  ;;  %v1134_v31 = vshrl.u32 %v1099_v22, 16 }
 0x4ad   : > { %v1383_v32 = vsel %vm1381_vm4, %v1127_v24, 0  ;;  %v1130_v33 = vpack.i.b16 %v1129_v26, %v1128_v25  ;;  %v1133_v34 = vpack.i.b16 %v1124_v27, %v1099_v22  ;;  %v1135_v35 = vshrl.u32 %v1124_v27, 16 }
 0x4ae   : > { %2014 = vmatpush3.bf16.msra.mxu1 %v1383_v32 }
 0x4af   : > { %v1429_v36 = vsel %vm1381_vm4, %v1130_v33, 0  ;;  %2025 = vmatprep.subr.bf16.mxu1 %v2132_v16  ;;  %v1136_v28 = vpack.i.b16 %v1135_v35, %v1134_v31  ;;  %v1475_v37 = vsel %vm1381_vm4, %v1133_v34, 0 }
 0x4b0   : > { %2020 = vmatpush3.bf16.msra.mxu0 %v1429_v36 }
 0x4b1   : > { %2016 = vmatmul.mubr.msk.bf16.vlgmr.msra.gmra.mxu1 %vm1145_vm3, %v1374_v38  ;;  %2031 = vmatprep.subr.bf16.mxu0 %v2132_v16  ;;  %v1521_v30 = vsel %vm1381_vm4, %v1136_v28, 0 }
 0x4b2   : > { %2026 = vmatpush3.bf16.msra.mxu1 %v1475_v37  ;;  %2027 = vmatprep.mubr.msk.bf16.mxu1 %vm2133_vm1, %v2132_v16 }
 0x4b3   : > { %2022 = vmatmul.mubr.msk.bf16.vlgmr.msra.gmra.mxu0 %vm1145_vm3, %v1375_v41  ;;  %2037 = vmatprep.subr.bf16.mxu1 %v2132_v16 }
 0x4b4   : > { %2032 = vmatpush3.bf16.msra.mxu0 %v1521_v30  ;;  %2033 = vmatprep.mubr.msk.bf16.mxu0 %vm2133_vm1, %v2132_v16 }
 0x4c7   : > { %v1365_v42 = vpop.xlane.xlu0 %1364 }
 0x4c8   : > { %2104 = vrcp.f32 %v1365_v42 }
 0x4c9   : > { %v1362_v43 = vpop.xlane.xlu1 %1361 }
 0x4ca   : > { %2106 = vrcp.f32 %v1362_v43 }
 0x4d5   : > { %v2105_v44 = vpop.eup %2104 }
 0x4d6   : > { %v1373_v45 = vmul.f32 %v2105_v44, %v2366_v39 }
 0x4d7   : > { %v2107_v46 = vpop.eup %2106 }
 0x4d8   : > { %v1377_v47 = vpack.c.bf16 %v1373_v45, %v1373_v45  ;;  %v1372_v48 = vmul.f32 %v2107_v46, %v2368_v40 }
 0x4da   : > { %2034 = vmatmul.mubr.msk.bf16.vlgmr.msra.gmra.mxu0 %vm1145_vm3, %v1377_v47  ;;  %v1376_v49 = vpack.c.bf16 %v1372_v48, %v1372_v48 }
 0x4dc   : > { %2028 = vmatmul.mubr.msk.bf16.vlgmr.msra.gmra.mxu1 %vm1145_vm3, %v1376_v49  ;;  %v1923_v49 = vld [vmem:[%s2463_s9] ss:$0 sm:$0xff] }
 0x4dd   : > { %2041 = vmatprep.mubr.msk.bf16.mxu1 %vm2133_vm1, %v2132_v16  ;;  %2038 = vmatpush3.bf16.msra.mxu1 %v2086_v50 }
 0x4de   : > { %2039 = vmatprep.subr.bf16.mxu1 %v2132_v16 }
 0x4e1   : > { %2040 = vmatpush3.bf16.msra.mxu1 %v2087_v15 }
 0x571   : > { %v1419_v39 = vpop.f32.mrf.mxu1 }
 0x573   : > { %v2017_v51 = vpop.f32.mrf.mxu1  ;;  %v1465_v52 = vpop.f32.mrf.mxu0 }
 0x575   : > { %v1422_v53 = vpop.f32.mrf.mxu1  ;;  %v2023_v40 = vpop.f32.mrf.mxu0 }
 0x577   : > { %v2018_v54 = vpop.f32.mrf.mxu1  ;;  %v1468_v55 = vpop.f32.mrf.mxu0 }
 0x579   : > { %v2024_v56 = vpop.f32.mrf.mxu0 }
 0x59a   : > { %v1557_v57 = vpop.f32.mrf.mxu0 }
 0x59b   : > { %v1579_v58 = vcombine.low %v1465_v52, %v1557_v57  ;;  %v1580_v59 = vcombine.high %v1465_v52, %v1557_v57 }
 0x59c   : > { %v1511_v60 = vpop.f32.mrf.mxu1  ;;  %v2035_v61 = vpop.f32.mrf.mxu0 }
 0x59d   : > { %v1563_v62 = vcombine.low %v1419_v39, %v1511_v60  ;;  %v1564_v0 = vcombine.high %v1419_v39, %v1511_v60  ;;  %v1587_v4 = vrot.slane %v1579_v58, %v2285_v63  ;;  %v1594_v16 = vrot.slane %v1580_v59, %v2285_v63 }
 0x59e   : > { %v2029_v1 = vpop.f32.mrf.mxu1  ;;  %v1560_v3 = vpop.f32.mrf.mxu0 }
 0x59f   : > { %v1571_v5 = vrot.slane %v1563_v62, %v2285_v63  ;;  %v1578_v6 = vrot.slane %v1564_v0, %v2285_v63 }
 0x5a0   : > { %v1514_v7 = vpop.f32.mrf.mxu1  ;;  %v2036_v8 = vpop.f32.mrf.mxu0 }
 0x5a1   : > { %v1595_v9 = vcombine.low %v1571_v5, %v1587_v4  ;;  %v1596_v10 = vcombine.high %v1571_v5, %v1587_v4  ;;  %v1611_v11 = vcombine.low %v1578_v6, %v1594_v16  ;;  %v1612_v12 = vcombine.high %v1578_v6, %v1594_v16 }
 0x5a2   : > { %v2030_v13 = vpop.f32.mrf.mxu1 }
 0x5a3   : > { %v1603_v17 = vrot.slane %v1595_v9, %v2289_v14  ;;  %v1610_v18 = vrot.slane %v1596_v10, %v2289_v14  ;;  %v1619_v19 = vrot.slane %v1611_v11, %v2289_v14  ;;  %v1626_v20 = vrot.slane %v1612_v12, %v2289_v14 }
 0x5a5   : > { %v1631_v21 = vcombine.low %v1603_v17, %v1610_v18  ;;  %v1918_v22 = vcombine.high %v1603_v17, %v1610_v18  ;;  %v1647_v23 = vcombine.low %v1619_v19, %v1626_v20  ;;  %v1919_v24 = vcombine.high %v1619_v19, %v1626_v20 }
 0x5a7   : > { %v1638_v25 = vrot.slane %v1631_v21, %v2285_v63  ;;  %v1646_v26 = vrot.slane %v1918_v22, %v2285_v63  ;;  %v1654_v27 = vrot.slane %v1647_v23, %v2285_v63  ;;  %v1662_v29 = vrot.slane %v1919_v24, %v2285_v63 }
 0x5a9   : > { %v1664_v31 = vcombine.high %v1638_v25, %v1646_v26  ;;  %v1680_v32 = vcombine.high %v1654_v27, %v1662_v29  ;;  %v1663_v33 = vcombine.low %v1638_v25, %v1646_v26  ;;  %v1679_v34 = vcombine.low %v1654_v27, %v1662_v29 }
 0x5ab   : > { %v1678_v35 = vrot.slane %v1664_v31, %v2289_v14  ;;  %v1694_v36 = vrot.slane %v1680_v32, %v2289_v14  ;;  %v1671_v38 = vrot.slane %v1663_v33, %v2289_v14  ;;  %v1687_v28 = vrot.slane %v1679_v34, %v2289_v14 }
 0x5ad   : > { %v1697_v37 = vcombine.low %v1678_v35, %v1694_v36  ;;  %v1696_v41 = vcombine.high %v1671_v38, %v1687_v28  ;;  %v1695_v30 = vcombine.low %v1671_v38, %v1687_v28  ;;  %v1698_v63 = vcombine.high %v1678_v35, %v1694_v36 }
 0x5af   : > { %1704 = vrot.lane.b32.xlu1 %v1697_v37, %s2140_s19  ;;  %1700 = vrot.lane.b32.xlu0 %v1696_v41, %s2141_s20 }
 0x5b3   : > { %1708 = vrot.lane.b32.xlu1 %v1698_v63, %s2142_s21 }
 0x621   : > { %v1705_v42 = vpop.permute.xlu1 %1704  ;;  %v1701_v43 = vpop.permute.xlu0 %1700 }
 0x622   : > { %v1711_v44 = vsel %vm1145_vm3, %v1695_v30, %v1701_v43 }
 0x623   : > { %v1713_v46 = vsel %vm1712_vm5, %v1711_v44, %v1705_v42 }
 0x625   : > { %v1709_v45 = vpop.permute.xlu1 %1708 }
 0x626   : > { %v1715_v14 = vsel %vm1714_vm6, %v1713_v46, %v1709_v45 }
 0x627   : > { %v1716_v47 = vpack.c.bf16 %v1715_v14, %v1715_v14 }
 0x629   : > { %2042 = vmatmul.mubr.msk.bf16.vlgmr.msra.gmra.mxu1 %vm428_vm0, %v1716_v47 }
 0x6e9   : > { %v1770_v48 = vpop.f32.mrf.mxu1 }
 0x6ea   : > { %v1776_v50 = vadd.f32 %v1770_v48, %v2227_v2 }
 0x6eb   : > { %v2043_v39 = vpop.f32.mrf.mxu1 }
 0x6ec   : > { %v1784_v51 = vadd.f32 %v1923_v49, %v1776_v50 }
 0x6ed   : > { %v1773_v52 = vpop.f32.mrf.mxu1 }
 0x6ee   : > { %1785 = vst.msk [vmem:[%s419_s26] sm:$0xff] %vm428_vm0, %v1784_v51 }
 0x6ef   : > { %v2044_v53 = vpop.f32.mrf.mxu1 }
 0x6f0 PF: > { %s20_s15 = sadd.s32 1, %s2130_s15   ;;  %s2465_s13 = smov %s2126_s14 }
 0x6f1   : > { %p17_p5 = scmp.ge.s32.totalorder %s20_s15, 4   ;;  %s2466_s14 = smov %s2468_s16 }
 0x6f3   :  { %19 = sbr.rel (!%p17_p5) target bundleno = 2 (0x2), region = 100 }

</bundles_post_ra>
